<compile_context>
chip_gen: v6e
topology: v6e:2x2x1
jax: 0.10.0
libtpu: 0.0.40
codegen_flags: <defaults>
</compile_context>

<pallas_src>
import functools

import jax
import jax.numpy as jnp
from jax import lax
from jax.experimental import pallas as pl
from jax.experimental.pallas import tpu as pltpu

VMEM_SPEC = pl.BlockSpec(memory_space=pltpu.MemorySpace.VMEM)
NEG_BIG = -1e30


# -----------------------------------------------------------------------------
# Single fused kernel: embedding -> 2x biLSTM -> attention pool -> MLP head
# -----------------------------------------------------------------------------
def make_siamese_kernel(B, Sh, Sb, H, dict_pad):
    S = max(Sh, Sb)      # common (padded) sequence length
    TB = 2 * B           # [head; body] batch rows per time step
    R = 4 * B            # recurrence rows: [head_fwd, body_fwd, head_bwd, body_bwd]
    G4 = 4 * H
    G8 = 8 * H
    D2 = 2 * H
    NTOK = S * TB

    def kernel(tok_ref, feat_ref, emb_ref,
               w1_ih_ref, w1_hh_ref, b1_ref,
               w2_ih_ref, w2_hh_ref, b2_ref,
               wl_ref, aw_ref,
               wf_ref, bf_ref, w1m_ref, b1m_ref,
               w2m_ref, b2m_ref, w3_ref, b3_ref,
               out_ref):
        f32 = jnp.float32

        # Hoisted iota-derived constants (JAX does not CSE broadcasts).
        row4 = lax.broadcasted_iota(jnp.int32, (R, 1), 0)            # (4B, 1)
        row2 = lax.broadcasted_iota(jnp.int32, (TB, 1), 0)           # (2B, 1)
        rdir = lax.broadcasted_iota(jnp.int32, (R, D2), 0)
        cdir = lax.broadcasted_iota(jnp.int32, (R, D2), 1)
        # Forward rows keep h in cols [0:H], backward rows in cols [H:2H].
        dir_mask = ((rdir < TB) == (cdir < H)).astype(f32)           # (4B, 2H)

        # ---- In-kernel embedding gather (one-hot matmul against VMEM table).
        # Padded token ids are an out-of-range sentinel -> all-zero one-hot row
        # -> zero embedding row (same as zero-padding the input).
        tok = tok_ref[...]                                            # (S*2B, 1) int32
        onehot = (tok == lax.broadcasted_iota(jnp.int32, (NTOK, dict_pad), 1)
                  ).astype(f32)                                       # (S*2B, dict_pad)
        x_tm = jnp.dot(onehot, emb_ref[...],
                       preferred_element_type=f32)                    # (S*2B, I) time-major

        # ---- One bidirectional LSTM layer over BOTH sequences at once.
        # Per step: ONE (4B, 2H) x (2H, 4H) matmul covers head+body, fwd+bwd.
        def run_bilstm(gx, w_hh):
            h_wide = jnp.zeros((R, D2), f32)     # [h_f | 0] / [0 | h_b] per row group
            c = jnp.zeros((R, H), f32)
            h_fwd = [None] * S
            h_bwd = [None] * S
            for k in range(S):
                pos = S - 1 - k
                g_in = jnp.concatenate(
                    [gx[k * TB:(k + 1) * TB, 0:G4],          # fwd gates @ time k
                     gx[pos * TB:(pos + 1) * TB, G4:G8]],    # bwd gates @ time pos
                    axis=0)                                   # (4B, 4H)
                gates = g_in + jnp.dot(h_wide, w_hh,
                                       preferred_element_type=f32)
                i_g = jax.nn.sigmoid(gates[:, 0:H])
                f_g = jax.nn.sigmoid(gates[:, H:2 * H])
                g_g = jnp.tanh(gates[:, 2 * H:3 * H])
                o_g = jax.nn.sigmoid(gates[:, 3 * H:4 * H])
                c_new = f_g * c + i_g * g_g
                h_new = o_g * jnp.tanh(c_new)

                # Backward carry freeze on the padded tail (static per-step mask;
                # only emitted for steps where at least one sequence is padded).
                hv, bv = pos < Sh, pos < Sb
                if not (hv and bv):
                    keep = row4 < TB                          # forward rows always live
                    if hv:
                        keep = keep | ((row4 >= TB) & (row4 < TB + B))
                    if bv:
                        keep = keep | (row4 >= TB + B)
                    keep_f = keep.astype(f32)
                    h_new = h_new * keep_f
                    c_new = c_new * keep_f

                c = c_new
                h_fwd[k] = h_new[0:TB]                        # registers, not scratch
                h_bwd[pos] = h_new[TB:R]
                h_wide = jnp.concatenate([h_new, h_new], axis=1) * dir_mask

            hcat = [jnp.concatenate([h_fwd[t], h_bwd[t]], axis=1)     # (2B, 2H)
                    for t in range(S)]
            return jnp.concatenate(hcat, axis=0), hcat                # (S*2B, 2H)

        # Hoisted input projections: one big matmul per layer (both directions).
        gx1 = jnp.dot(x_tm, w1_ih_ref[...],
                      preferred_element_type=f32) + b1_ref[...]       # (S*2B, 8H)
        out1, _ = run_bilstm(gx1, w1_hh_ref[...])
        gx2 = jnp.dot(out1, w2_ih_ref[...],
                      preferred_element_type=f32) + b2_ref[...]
        out2, hcat2 = run_bilstm(gx2, w2_hh_ref[...])

        # ---- Attention pooling (softmax over time; padded steps masked out).
        t_act = jnp.tanh(jnp.dot(out2, wl_ref[...],
                                 preferred_element_type=f32))         # (S*2B, H)
        aw = aw_ref[...]                                              # (1, H)
        scores = []
        for t in range(S):
            sc = jnp.sum(t_act[t * TB:(t + 1) * TB, :] * aw,
                         axis=1, keepdims=True)                       # (2B, 1)
            if t >= Sh:
                sc = sc + jnp.where(row2 < B, NEG_BIG, 0.0)
            if t >= Sb:
                sc = sc + jnp.where(row2 >= B, NEG_BIG, 0.0)
            scores.append(sc)
        m = scores[0]
        for t in range(1, S):
            m = jnp.maximum(m, scores[t])
        num = jnp.zeros((TB, D2), f32)
        den = jnp.zeros((TB, 1), f32)
        for t in range(S):
            e = jnp.exp(scores[t] - m)
            den = den + e
            num = num + e * hcat2[t]
        pooled = num / den                                            # (2B, 2H)

        # ---- Comparison features + MLP head + log_softmax.
        ph = pooled[0:B]
        pb = pooled[B:TB]
        cat = jnp.concatenate([ph, pb, jnp.abs(ph - pb), ph * pb], axis=1)  # (B, 8H)
        h1 = jnp.maximum(
            jnp.dot(cat, w1m_ref[...], preferred_element_type=f32) + b1m_ref[...],
            0.0)                                                      # (B, H)
        hf = jnp.maximum(
            jnp.dot(feat_ref[...], wf_ref[...], preferred_element_type=f32)
            + bf_ref[...], 0.0)                                       # (B, 28)
        h2 = jnp.maximum(
            jnp.dot(jnp.concatenate([h1, hf], axis=1), w2m_ref[...],
                    preferred_element_type=f32) + b2m_ref[...], 0.0)  # (B, H)
        logits = (jnp.dot(h2, w3_ref[...], preferred_element_type=f32)
                  + b3_ref[...])                                      # (B, 2)
        mx = jnp.max(logits, axis=1, keepdims=True)
        lse = jnp.log(jnp.sum(jnp.exp(logits - mx), axis=1, keepdims=True)) + mx
        out_ref[...] = logits - lse

    return kernel


# -----------------------------------------------------------------------------
# Full forward pass (one pallas_call)
# -----------------------------------------------------------------------------
def siamese_forward(params, head, body, features):
    B, Sh = head.shape
    _, Sb = body.shape
    S = max(Sh, Sb)
    emb_pad = params["emb_pad"]
    dict_pad = emb_pad.shape[0]
    H = params["lstm"][0]["w_hh"].shape[1] // 4

    # Only remaining host-side glue: pack token ids into one time-major
    # (S*2B, 1) int32 array.  Padding uses an out-of-range sentinel so the
    # in-kernel one-hot gather yields a zero embedding row.  This is a few
    # hundred bytes of int32; all heavy gather/transpose/pad of the (B,S,I)
    # activations happens inside the kernel.
    head_p = jnp.pad(head.astype(jnp.int32), ((0, 0), (0, S - Sh)),
                     constant_values=dict_pad)
    body_p = jnp.pad(body.astype(jnp.int32), ((0, 0), (0, S - Sb)),
                     constant_values=dict_pad)
    tok = jnp.concatenate([head_p, body_p], axis=0).T.reshape(S * 2 * B, 1)

    kernel = make_siamese_kernel(B, Sh, Sb, H, dict_pad)
    l1, l2 = params["lstm"]
    return pl.pallas_call(
        kernel,
        out_shape=jax.ShapeDtypeStruct((B, 2), jnp.float32),
        in_specs=[VMEM_SPEC] * 19,
        out_specs=VMEM_SPEC,
    )(tok, features, emb_pad,
      l1["w_ih"], l1["w_hh"], l1["b"],
      l2["w_ih"], l2["w_hh"], l2["b"],
      params["wl_t"], params["aw"],
      params["wf_t"], params["bf"], params["w1_t"], params["b1"],
      params["w2_t"], params["b2"], params["w3_t"], params["b3"])


# -----------------------------------------------------------------------------
# Deterministic parameter init (synthetic; mirrors PyTorch __init__ shapes) with
# kernel-ready layouts: fused/transposed LSTM weights, transposed MLP weights.
# -----------------------------------------------------------------------------
def xavier_uniform(key, shape):
    fan_out, fan_in = shape
    bound = (6.0 / (fan_in + fan_out)) ** 0.5
    return jax.random.uniform(key, shape, jnp.float32, -bound, bound)


def init_params(key, dict_sz, inp_sz, num_layer=2):
    H = inp_sz  # the module sets self.hid_sz = inp_sz
    keys = iter(jax.random.split(key, 64))
    p = {}
    emb = jax.random.normal(next(keys), (dict_sz, inp_sz), jnp.float32)
    p["embedding"] = emb
    dict_pad = ((dict_sz + 7) // 8) * 8
    p["emb_pad"] = jnp.pad(emb, ((0, dict_pad - dict_sz), (0, 0)))

    k_lstm = 1.0 / (H ** 0.5)

    def u(shape):
        return jax.random.uniform(next(keys), shape, jnp.float32, -k_lstm, k_lstm)

    lstm_layers = []
    for layer in range(num_layer):
        in_sz = inp_sz if layer == 0 else 2 * H
        dirs = {}
        for d in ("fwd", "bwd"):
            dirs[d] = dict(w_ih=u((4 * H, in_sz)), w_hh=u((4 * H, H)),
                           b_ih=u((4 * H,)), b_hh=u((4 * H,)))
        lstm_layers.append(dict(
            # fused input projection for both directions: (in, 8H)
            w_ih=jnp.concatenate([dirs["fwd"]["w_ih"].T,
                                  dirs["bwd"]["w_ih"].T], axis=1),
            # stacked recurrent weights for both directions: (2H, 4H)
            w_hh=jnp.concatenate([dirs["fwd"]["w_hh"].T,
                                  dirs["bwd"]["w_hh"].T], axis=0),
            b=jnp.concatenate([dirs["fwd"]["b_ih"] + dirs["fwd"]["b_hh"],
                               dirs["bwd"]["b_ih"] + dirs["bwd"]["b_hh"]])[None, :],
        ))
    p["lstm"] = lstm_layers

    p["wl_t"] = xavier_uniform(next(keys), (H, 2 * H)).T          # (2H, H), bias=False
    p["aw"] = jax.random.normal(next(keys), (H,), jnp.float32)[None, :]   # (1, H)

    p["wf_t"] = xavier_uniform(next(keys), (28, 14)).T            # (14, 28)
    p["bf"] = jnp.zeros((1, 28), jnp.float32)
    p["w1_t"] = xavier_uniform(next(keys), (H, 2 * H * 4)).T      # (8H, H)
    p["b1"] = jnp.zeros((1, H), jnp.float32)
    p["w2_t"] = xavier_uniform(next(keys), (H, H + 28)).T         # (H+28, H)
    p["b2"] = jnp.zeros((1, H), jnp.float32)
    p["w3_t"] = xavier_uniform(next(keys), (2, H)).T              # (H, 2)
    p["b3"] = jnp.zeros((1, 2), jnp.float32)
    return p


# -----------------------------------------------------------------------------
# Pure-JAX reference (mirrors the PyTorch forward) for validation.
# -----------------------------------------------------------------------------
def reference_forward(params, head, body, features):
    emb = params["embedding"]

    def bilstm_ref(x, layer):                      # x: (B, S, F) -> (B, S, 2H)
        Bx, Sx, _ = x.shape
        H = layer["w_hh"].shape[1] // 4
        gx = jnp.einsum("bsf,fg->bsg", x, layer["w_ih"]) + layer["b"][0]
        w_hh_f = layer["w_hh"][:H]
        w_hh_b = layer["w_hh"][H:]

        def run(gxd, w_hh, reverse):
            h = jnp.zeros((Bx, H), jnp.float32)
            c = jnp.zeros((Bx, H), jnp.float32)
            outs = [None] * Sx
            order = range(Sx - 1, -1, -1) if reverse else range(Sx)
            for t in order:
                g = gxd[:, t, :] + h @ w_hh
                i_g = jax.nn.sigmoid(g[:, 0:H])
                f_g = jax.nn.sigmoid(g[:, H:2 * H])
                g_g = jnp.tanh(g[:, 2 * H:3 * H])
                o_g = jax.nn.sigmoid(g[:, 3 * H:4 * H])
                c = f_g * c + i_g * g_g
                h = o_g * jnp.tanh(c)
                outs[t] = h
            return jnp.stack(outs, axis=1)

        fwd = run(gx[..., 0:4 * H], w_hh_f, reverse=False)
        bwd = run(gx[..., 4 * H:8 * H], w_hh_b, reverse=True)
        return jnp.concatenate([fwd, bwd], axis=-1)

    def pipeline(tokens):
        out = jnp.take(emb, tokens, axis=0)
        for layer in params["lstm"]:
            out = bilstm_ref(out, layer)
        t = jnp.tanh(out @ params["wl_t"])                        # (B, S, H)
        scores = jnp.einsum("bsh,h->bs", t, params["aw"][0])
        a = jax.nn.softmax(scores, axis=1)
        return jnp.einsum("bs,bsd->bd", a, out)

    ph, pb = pipeline(head), pipeline(body)
    cat = jnp.concatenate([ph, pb, jnp.abs(ph - pb), ph * pb], axis=1)
    o1 = jax.nn.relu(cat @ params["w1_t"] + params["b1"])
    of = jax.nn.relu(features @ params["wf_t"] + params["bf"])
    o2 = jax.nn.relu(jnp.concatenate([o1, of], axis=1) @ params["w2_t"] + params["b2"])
    logits = o2 @ params["w3_t"] + params["b3"]
    return jax.nn.log_softmax(logits, axis=1)


if __name__ == "__main__":
    DICT_SZ = 50
    INP_SZ = 32          # inp_sz == hid_sz in the module; 4H = 128, 8H = 256
    BATCH = 2
    SEQ_HEAD = 8
    SEQ_BODY = 12

    root = jax.random.PRNGKey(0)
    k_par, k_head, k_body, k_feat = jax.random.split(root, 4)

    params = init_params(k_par, DICT_SZ, INP_SZ)

    head = jax.random.randint(k_head, (BATCH, SEQ_HEAD), 0, DICT_SZ, jnp.int32)
    body = jax.random.randint(k_body, (BATCH, SEQ_BODY), 0, DICT_SZ, jnp.int32)
    features = jax.random.normal(k_feat, (BATCH, 14), jnp.float32)

    fwd = jax.jit(functools.partial(siamese_forward, params))
    out = jax.block_until_ready(fwd(head, body, features))

    assert out.shape == (BATCH, 2)
    assert bool(jnp.all(jnp.isfinite(out)))
    # log_softmax rows should sum (in prob space) to ~1
    assert bool(jnp.allclose(jnp.sum(jnp.exp(out), axis=1), 1.0, atol=1e-4))

    # Validate against the pure-JAX reference of the PyTorch forward pass.
    ref = reference_forward(params, head, body, features)
    assert bool(jnp.allclose(out, ref, atol=2e-3, rtol=2e-3)), (out, ref)

    print("KERNEL_OK")
</pallas_src>

<mosaic_0001>
module attributes {stable_mosaic.version = 11 : i64} {
  func.func @kernel(%arg0: memref<48x1xi32, #tpu.memory_space<vmem>>, %arg1: memref<2x14xf32, #tpu.memory_space<vmem>>, %arg2: memref<56x32xf32, #tpu.memory_space<vmem>>, %arg3: memref<32x256xf32, #tpu.memory_space<vmem>>, %arg4: memref<64x128xf32, #tpu.memory_space<vmem>>, %arg5: memref<1x256xf32, #tpu.memory_space<vmem>>, %arg6: memref<64x256xf32, #tpu.memory_space<vmem>>, %arg7: memref<64x128xf32, #tpu.memory_space<vmem>>, %arg8: memref<1x256xf32, #tpu.memory_space<vmem>>, %arg9: memref<64x32xf32, #tpu.memory_space<vmem>>, %arg10: memref<1x32xf32, #tpu.memory_space<vmem>>, %arg11: memref<14x28xf32, #tpu.memory_space<vmem>>, %arg12: memref<1x28xf32, #tpu.memory_space<vmem>>, %arg13: memref<256x32xf32, #tpu.memory_space<vmem>>, %arg14: memref<1x32xf32, #tpu.memory_space<vmem>>, %arg15: memref<60x32xf32, #tpu.memory_space<vmem>>, %arg16: memref<1x32xf32, #tpu.memory_space<vmem>>, %arg17: memref<32x2xf32, #tpu.memory_space<vmem>>, %arg18: memref<1x2xf32, #tpu.memory_space<vmem>>, %arg19: memref<2x2xf32, #tpu.memory_space<vmem>>) attributes {dimension_semantics = [], scalar_prefetch = 0 : i64, scratch_operands = 0 : i64, tpu.core_type = #tpu.core_type<tc>} {
    %0 = tpu.iota {dimensions = array<i32: 0>} : vector<8x1xi32>
    %1 = tpu.iota {dimensions = array<i32: 0>} : vector<4x1xi32>
    %2 = tpu.iota {dimensions = array<i32: 0>} : vector<8x64xi32>
    %3 = tpu.iota {dimensions = array<i32: 1>} : vector<8x64xi32>
    %c4_i32 = arith.constant 4 : i32
    %4 = vector.broadcast %c4_i32 : i32 to vector<8x64xi32>
    %5 = arith.cmpi slt, %2, %4 : vector<8x64xi32>
    %c32_i32 = arith.constant 32 : i32
    %6 = vector.broadcast %c32_i32 : i32 to vector<8x64xi32>
    %7 = arith.cmpi slt, %3, %6 : vector<8x64xi32>
    %8 = arith.xori %5, %7 : vector<8x64xi1>
    %cst = arith.constant dense<true> : vector<8x64xi1>
    %9 = arith.xori %8, %cst : vector<8x64xi1>
    %10 = arith.extui %9 : vector<8x64xi1> to vector<8x64xi32>
    %11 = arith.sitofp %10 : vector<8x64xi32> to vector<8x64xf32>
    %c0 = arith.constant 0 : index
    %c0_0 = arith.constant 0 : index
    %12 = vector.load %arg0[%c0, %c0_0] : memref<48x1xi32, #tpu.memory_space<vmem>>, vector<48x1xi32>
    %13 = tpu.iota {dimensions = array<i32: 1>} : vector<48x56xi32>
    %14 = vector.broadcast %12 : vector<48x1xi32> to vector<48x56xi32>
    %15 = arith.cmpi eq, %14, %13 : vector<48x56xi32>
    %16 = arith.extui %15 : vector<48x56xi1> to vector<48x56xi32>
    %17 = arith.sitofp %16 : vector<48x56xi32> to vector<48x56xf32>
    %c0_1 = arith.constant 0 : index
    %c0_2 = arith.constant 0 : index
    %18 = vector.load %arg2[%c0_1, %c0_2] : memref<56x32xf32, #tpu.memory_space<vmem>>, vector<56x32xf32>
    %cst_3 = arith.constant dense<0.000000e+00> : vector<48x32xf32>
    %19 = tpu.matmul %17, %18, %cst_3 {dimension_numbers = #tpu.dot_dimension_numbers<[1], [0], [0], [1], [0, 0, 1, 1], [], []>} : vector<48x56xf32>, vector<56x32xf32>, vector<48x32xf32> -> vector<48x32xf32>
    %c0_4 = arith.constant 0 : index
    %c0_5 = arith.constant 0 : index
    %20 = vector.load %arg3[%c0_4, %c0_5] : memref<32x256xf32, #tpu.memory_space<vmem>>, vector<32x256xf32>
    %cst_6 = arith.constant dense<0.000000e+00> : vector<48x256xf32>
    %21 = tpu.matmul %19, %20, %cst_6 {dimension_numbers = #tpu.dot_dimension_numbers<[1], [0], [0], [1], [0, 0, 1, 1], [], []>} : vector<48x32xf32>, vector<32x256xf32>, vector<48x256xf32> -> vector<48x256xf32>
    %c0_7 = arith.constant 0 : index
    %c0_8 = arith.constant 0 : index
    %22 = vector.load %arg5[%c0_7, %c0_8] : memref<1x256xf32, #tpu.memory_space<vmem>>, vector<1x256xf32>
    %23 = vector.broadcast %22 : vector<1x256xf32> to vector<48x256xf32>
    %24 = arith.addf %21, %23 : vector<48x256xf32>
    %c0_9 = arith.constant 0 : index
    %c0_10 = arith.constant 0 : index
    %25 = vector.load %arg4[%c0_9, %c0_10] : memref<64x128xf32, #tpu.memory_space<vmem>>, vector<64x128xf32>
    %cst_11 = arith.constant 0.000000e+00 : f32
    %26 = vector.broadcast %cst_11 : f32 to vector<8x64xf32>
    %cst_12 = arith.constant 0.000000e+00 : f32
    %27 = vector.broadcast %cst_12 : f32 to vector<8x32xf32>
    %28 = vector.extract_strided_slice %24 {offsets = [0, 0], sizes = [4, 128], strides = [1, 1]} : vector<48x256xf32> to vector<4x128xf32>
    %29 = vector.extract_strided_slice %24 {offsets = [44, 128], sizes = [4, 128], strides = [1, 1]} : vector<48x256xf32> to vector<4x128xf32>
    %30 = tpu.concatenate %28, %29 in 0 : vector<4x128xf32>, vector<4x128xf32> -> vector<8x128xf32>
    %cst_13 = arith.constant dense<0.000000e+00> : vector<8x128xf32>
    %31 = tpu.matmul %26, %25, %cst_13 {dimension_numbers = #tpu.dot_dimension_numbers<[1], [0], [0], [1], [0, 0, 1, 1], [], []>} : vector<8x64xf32>, vector<64x128xf32>, vector<8x128xf32> -> vector<8x128xf32>
    %32 = arith.addf %30, %31 : vector<8x128xf32>
    %33 = vector.extract_strided_slice %32 {offsets = [0, 0], sizes = [8, 32], strides = [1, 1]} : vector<8x128xf32> to vector<8x32xf32>
    %34 = arith.negf %33 : vector<8x32xf32>
    %35 = math.exp %34 : vector<8x32xf32>
    %cst_14 = arith.constant 1.000000e+00 : f32
    %36 = vector.broadcast %cst_14 : f32 to vector<8x32xf32>
    %37 = arith.addf %36, %35 : vector<8x32xf32>
    %38 = arith.divf %36, %37 : vector<8x32xf32>
    %39 = vector.extract_strided_slice %32 {offsets = [0, 32], sizes = [8, 32], strides = [1, 1]} : vector<8x128xf32> to vector<8x32xf32>
    %40 = arith.negf %39 : vector<8x32xf32>
    %41 = math.exp %40 : vector<8x32xf32>
    %cst_15 = arith.constant 1.000000e+00 : f32
    %42 = vector.broadcast %cst_15 : f32 to vector<8x32xf32>
    %43 = arith.addf %42, %41 : vector<8x32xf32>
    %44 = arith.divf %42, %43 : vector<8x32xf32>
    %45 = vector.extract_strided_slice %32 {offsets = [0, 64], sizes = [8, 32], strides = [1, 1]} : vector<8x128xf32> to vector<8x32xf32>
    %46 = math.tanh %45 : vector<8x32xf32>
    %47 = vector.extract_strided_slice %32 {offsets = [0, 96], sizes = [8, 32], strides = [1, 1]} : vector<8x128xf32> to vector<8x32xf32>
    %48 = arith.negf %47 : vector<8x32xf32>
    %49 = math.exp %48 : vector<8x32xf32>
    %cst_16 = arith.constant 1.000000e+00 : f32
    %50 = vector.broadcast %cst_16 : f32 to vector<8x32xf32>
    %51 = arith.addf %50, %49 : vector<8x32xf32>
    %52 = arith.divf %50, %51 : vector<8x32xf32>
    %53 = arith.mulf %44, %27 : vector<8x32xf32>
    %54 = arith.mulf %38, %46 : vector<8x32xf32>
    %55 = arith.addf %53, %54 : vector<8x32xf32>
    %56 = math.tanh %55 : vector<8x32xf32>
    %57 = arith.mulf %52, %56 : vector<8x32xf32>
    %c4_i32_17 = arith.constant 4 : i32
    %58 = vector.broadcast %c4_i32_17 : i32 to vector<8x1xi32>
    %59 = arith.cmpi slt, %0, %58 : vector<8x1xi32>
    %c6_i32 = arith.constant 6 : i32
    %60 = vector.broadcast %c6_i32 : i32 to vector<8x1xi32>
    %61 = arith.cmpi sge, %0, %60 : vector<8x1xi32>
    %62 = arith.ori %59, %61 : vector<8x1xi1>
    %63 = arith.extui %62 : vector<8x1xi1> to vector<8x1xi32>
    %64 = arith.sitofp %63 : vector<8x1xi32> to vector<8x1xf32>
    %65 = vector.broadcast %64 : vector<8x1xf32> to vector<8x32xf32>
    %66 = arith.mulf %57, %65 : vector<8x32xf32>
    %67 = vector.broadcast %64 : vector<8x1xf32> to vector<8x32xf32>
    %68 = arith.mulf %55, %67 : vector<8x32xf32>
    %69 = vector.extract_strided_slice %66 {offsets = [0, 0], sizes = [4, 32], strides = [1, 1]} : vector<8x32xf32> to vector<4x32xf32>
    %70 = vector.extract_strided_slice %66 {offsets = [4, 0], sizes = [4, 32], strides = [1, 1]} : vector<8x32xf32> to vector<4x32xf32>
    %71 = tpu.concatenate %66, %66 in 1 : vector<8x32xf32>, vector<8x32xf32> -> vector<8x64xf32>
    %72 = arith.mulf %71, %11 : vector<8x64xf32>
    %73 = vector.extract_strided_slice %24 {offsets = [4, 0], sizes = [4, 128], strides = [1, 1]} : vector<48x256xf32> to vector<4x128xf32>
    %74 = vector.extract_strided_slice %24 {offsets = [40, 128], sizes = [4, 128], strides = [1, 1]} : vector<48x256xf32> to vector<4x128xf32>
    %75 = tpu.concatenate %73, %74 in 0 : vector<4x128xf32>, vector<4x128xf32> -> vector<8x128xf32>
    %cst_18 = arith.constant dense<0.000000e+00> : vector<8x128xf32>
    %76 = tpu.matmul %72, %25, %cst_18 {dimension_numbers = #tpu.dot_dimension_numbers<[1], [0], [0], [1], [0, 0, 1, 1], [], []>} : vector<8x64xf32>, vector<64x128xf32>, vector<8x128xf32> -> vector<8x128xf32>
    %77 = arith.addf %75, %76 : vector<8x128xf32>
    %78 = vector.extract_strided_slice %77 {offsets = [0, 0], sizes = [8, 32], strides = [1, 1]} : vector<8x128xf32> to vector<8x32xf32>
    %79 = arith.negf %78 : vector<8x32xf32>
    %80 = math.exp %79 : vector<8x32xf32>
    %cst_19 = arith.constant 1.000000e+00 : f32
    %81 = vector.broadcast %cst_19 : f32 to vector<8x32xf32>
    %82 = arith.addf %81, %80 : vector<8x32xf32>
    %83 = arith.divf %81, %82 : vector<8x32xf32>
    %84 = vector.extract_strided_slice %77 {offsets = [0, 32], sizes = [8, 32], strides = [1, 1]} : vector<8x128xf32> to vector<8x32xf32>
    %85 = arith.negf %84 : vector<8x32xf32>
    %86 = math.exp %85 : vector<8x32xf32>
    %cst_20 = arith.constant 1.000000e+00 : f32
    %87 = vector.broadcast %cst_20 : f32 to vector<8x32xf32>
    %88 = arith.addf %87, %86 : vector<8x32xf32>
    %89 = arith.divf %87, %88 : vector<8x32xf32>
    %90 = vector.extract_strided_slice %77 {offsets = [0, 64], sizes = [8, 32], strides = [1, 1]} : vector<8x128xf32> to vector<8x32xf32>
    %91 = math.tanh %90 : vector<8x32xf32>
    %92 = vector.extract_strided_slice %77 {offsets = [0, 96], sizes = [8, 32], strides = [1, 1]} : vector<8x128xf32> to vector<8x32xf32>
    %93 = arith.negf %92 : vector<8x32xf32>
    %94 = math.exp %93 : vector<8x32xf32>
    %cst_21 = arith.constant 1.000000e+00 : f32
    %95 = vector.broadcast %cst_21 : f32 to vector<8x32xf32>
    %96 = arith.addf %95, %94 : vector<8x32xf32>
    %97 = arith.divf %95, %96 : vector<8x32xf32>
    %98 = arith.mulf %89, %68 : vector<8x32xf32>
    %99 = arith.mulf %83, %91 : vector<8x32xf32>
    %100 = arith.addf %98, %99 : vector<8x32xf32>
    %101 = math.tanh %100 : vector<8x32xf32>
    %102 = arith.mulf %97, %101 : vector<8x32xf32>
    %c4_i32_22 = arith.constant 4 : i32
    %103 = vector.broadcast %c4_i32_22 : i32 to vector<8x1xi32>
    %104 = arith.cmpi slt, %0, %103 : vector<8x1xi32>
    %c6_i32_23 = arith.constant 6 : i32
    %105 = vector.broadcast %c6_i32_23 : i32 to vector<8x1xi32>
    %106 = arith.cmpi sge, %0, %105 : vector<8x1xi32>
    %107 = arith.ori %104, %106 : vector<8x1xi1>
    %108 = arith.extui %107 : vector<8x1xi1> to vector<8x1xi32>
    %109 = arith.sitofp %108 : vector<8x1xi32> to vector<8x1xf32>
    %110 = vector.broadcast %109 : vector<8x1xf32> to vector<8x32xf32>
    %111 = arith.mulf %102, %110 : vector<8x32xf32>
    %112 = vector.broadcast %109 : vector<8x1xf32> to vector<8x32xf32>
    %113 = arith.mulf %100, %112 : vector<8x32xf32>
    %114 = vector.extract_strided_slice %111 {offsets = [0, 0], sizes = [4, 32], strides = [1, 1]} : vector<8x32xf32> to vector<4x32xf32>
    %115 = vector.extract_strided_slice %111 {offsets = [4, 0], sizes = [4, 32], strides = [1, 1]} : vector<8x32xf32> to vector<4x32xf32>
    %116 = tpu.concatenate %111, %111 in 1 : vector<8x32xf32>, vector<8x32xf32> -> vector<8x64xf32>
    %117 = arith.mulf %116, %11 : vector<8x64xf32>
    %118 = vector.extract_strided_slice %24 {offsets = [8, 0], sizes = [4, 128], strides = [1, 1]} : vector<48x256xf32> to vector<4x128xf32>
    %119 = vector.extract_strided_slice %24 {offsets = [36, 128], sizes = [4, 128], strides = [1, 1]} : vector<48x256xf32> to vector<4x128xf32>
    %120 = tpu.concatenate %118, %119 in 0 : vector<4x128xf32>, vector<4x128xf32> -> vector<8x128xf32>
    %cst_24 = arith.constant dense<0.000000e+00> : vector<8x128xf32>
    %121 = tpu.matmul %117, %25, %cst_24 {dimension_numbers = #tpu.dot_dimension_numbers<[1], [0], [0], [1], [0, 0, 1, 1], [], []>} : vector<8x64xf32>, vector<64x128xf32>, vector<8x128xf32> -> vector<8x128xf32>
    %122 = arith.addf %120, %121 : vector<8x128xf32>
    %123 = vector.extract_strided_slice %122 {offsets = [0, 0], sizes = [8, 32], strides = [1, 1]} : vector<8x128xf32> to vector<8x32xf32>
    %124 = arith.negf %123 : vector<8x32xf32>
    %125 = math.exp %124 : vector<8x32xf32>
    %cst_25 = arith.constant 1.000000e+00 : f32
    %126 = vector.broadcast %cst_25 : f32 to vector<8x32xf32>
    %127 = arith.addf %126, %125 : vector<8x32xf32>
    %128 = arith.divf %126, %127 : vector<8x32xf32>
    %129 = vector.extract_strided_slice %122 {offsets = [0, 32], sizes = [8, 32], strides = [1, 1]} : vector<8x128xf32> to vector<8x32xf32>
    %130 = arith.negf %129 : vector<8x32xf32>
    %131 = math.exp %130 : vector<8x32xf32>
    %cst_26 = arith.constant 1.000000e+00 : f32
    %132 = vector.broadcast %cst_26 : f32 to vector<8x32xf32>
    %133 = arith.addf %132, %131 : vector<8x32xf32>
    %134 = arith.divf %132, %133 : vector<8x32xf32>
    %135 = vector.extract_strided_slice %122 {offsets = [0, 64], sizes = [8, 32], strides = [1, 1]} : vector<8x128xf32> to vector<8x32xf32>
    %136 = math.tanh %135 : vector<8x32xf32>
    %137 = vector.extract_strided_slice %122 {offsets = [0, 96], sizes = [8, 32], strides = [1, 1]} : vector<8x128xf32> to vector<8x32xf32>
    %138 = arith.negf %137 : vector<8x32xf32>
    %139 = math.exp %138 : vector<8x32xf32>
    %cst_27 = arith.constant 1.000000e+00 : f32
    %140 = vector.broadcast %cst_27 : f32 to vector<8x32xf32>
    %141 = arith.addf %140, %139 : vector<8x32xf32>
    %142 = arith.divf %140, %141 : vector<8x32xf32>
    %143 = arith.mulf %134, %113 : vector<8x32xf32>
    %144 = arith.mulf %128, %136 : vector<8x32xf32>
    %145 = arith.addf %143, %144 : vector<8x32xf32>
    %146 = math.tanh %145 : vector<8x32xf32>
    %147 = arith.mulf %142, %146 : vector<8x32xf32>
    %c4_i32_28 = arith.constant 4 : i32
    %148 = vector.broadcast %c4_i32_28 : i32 to vector<8x1xi32>
    %149 = arith.cmpi slt, %0, %148 : vector<8x1xi32>
    %c6_i32_29 = arith.constant 6 : i32
    %150 = vector.broadcast %c6_i32_29 : i32 to vector<8x1xi32>
    %151 = arith.cmpi sge, %0, %150 : vector<8x1xi32>
    %152 = arith.ori %149, %151 : vector<8x1xi1>
    %153 = arith.extui %152 : vector<8x1xi1> to vector<8x1xi32>
    %154 = arith.sitofp %153 : vector<8x1xi32> to vector<8x1xf32>
    %155 = vector.broadcast %154 : vector<8x1xf32> to vector<8x32xf32>
    %156 = arith.mulf %147, %155 : vector<8x32xf32>
    %157 = vector.broadcast %154 : vector<8x1xf32> to vector<8x32xf32>
    %158 = arith.mulf %145, %157 : vector<8x32xf32>
    %159 = vector.extract_strided_slice %156 {offsets = [0, 0], sizes = [4, 32], strides = [1, 1]} : vector<8x32xf32> to vector<4x32xf32>
    %160 = vector.extract_strided_slice %156 {offsets = [4, 0], sizes = [4, 32], strides = [1, 1]} : vector<8x32xf32> to vector<4x32xf32>
    %161 = tpu.concatenate %156, %156 in 1 : vector<8x32xf32>, vector<8x32xf32> -> vector<8x64xf32>
    %162 = arith.mulf %161, %11 : vector<8x64xf32>
    %163 = vector.extract_strided_slice %24 {offsets = [12, 0], sizes = [4, 128], strides = [1, 1]} : vector<48x256xf32> to vector<4x128xf32>
    %164 = vector.extract_strided_slice %24 {offsets = [32, 128], sizes = [4, 128], strides = [1, 1]} : vector<48x256xf32> to vector<4x128xf32>
    %165 = tpu.concatenate %163, %164 in 0 : vector<4x128xf32>, vector<4x128xf32> -> vector<8x128xf32>
    %cst_30 = arith.constant dense<0.000000e+00> : vector<8x128xf32>
    %166 = tpu.matmul %162, %25, %cst_30 {dimension_numbers = #tpu.dot_dimension_numbers<[1], [0], [0], [1], [0, 0, 1, 1], [], []>} : vector<8x64xf32>, vector<64x128xf32>, vector<8x128xf32> -> vector<8x128xf32>
    %167 = arith.addf %165, %166 : vector<8x128xf32>
    %168 = vector.extract_strided_slice %167 {offsets = [0, 0], sizes = [8, 32], strides = [1, 1]} : vector<8x128xf32> to vector<8x32xf32>
    %169 = arith.negf %168 : vector<8x32xf32>
    %170 = math.exp %169 : vector<8x32xf32>
    %cst_31 = arith.constant 1.000000e+00 : f32
    %171 = vector.broadcast %cst_31 : f32 to vector<8x32xf32>
    %172 = arith.addf %171, %170 : vector<8x32xf32>
    %173 = arith.divf %171, %172 : vector<8x32xf32>
    %174 = vector.extract_strided_slice %167 {offsets = [0, 32], sizes = [8, 32], strides = [1, 1]} : vector<8x128xf32> to vector<8x32xf32>
    %175 = arith.negf %174 : vector<8x32xf32>
    %176 = math.exp %175 : vector<8x32xf32>
    %cst_32 = arith.constant 1.000000e+00 : f32
    %177 = vector.broadcast %cst_32 : f32 to vector<8x32xf32>
    %178 = arith.addf %177, %176 : vector<8x32xf32>
    %179 = arith.divf %177, %178 : vector<8x32xf32>
    %180 = vector.extract_strided_slice %167 {offsets = [0, 64], sizes = [8, 32], strides = [1, 1]} : vector<8x128xf32> to vector<8x32xf32>
    %181 = math.tanh %180 : vector<8x32xf32>
    %182 = vector.extract_strided_slice %167 {offsets = [0, 96], sizes = [8, 32], strides = [1, 1]} : vector<8x128xf32> to vector<8x32xf32>
    %183 = arith.negf %182 : vector<8x32xf32>
    %184 = math.exp %183 : vector<8x32xf32>
    %cst_33 = arith.constant 1.000000e+00 : f32
    %185 = vector.broadcast %cst_33 : f32 to vector<8x32xf32>
    %186 = arith.addf %185, %184 : vector<8x32xf32>
    %187 = arith.divf %185, %186 : vector<8x32xf32>
    %188 = arith.mulf %179, %158 : vector<8x32xf32>
    %189 = arith.mulf %173, %181 : vector<8x32xf32>
    %190 = arith.addf %188, %189 : vector<8x32xf32>
    %191 = math.tanh %190 : vector<8x32xf32>
    %192 = arith.mulf %187, %191 : vector<8x32xf32>
    %c4_i32_34 = arith.constant 4 : i32
    %193 = vector.broadcast %c4_i32_34 : i32 to vector<8x1xi32>
    %194 = arith.cmpi slt, %0, %193 : vector<8x1xi32>
    %c6_i32_35 = arith.constant 6 : i32
    %195 = vector.broadcast %c6_i32_35 : i32 to vector<8x1xi32>
    %196 = arith.cmpi sge, %0, %195 : vector<8x1xi32>
    %197 = arith.ori %194, %196 : vector<8x1xi1>
    %198 = arith.extui %197 : vector<8x1xi1> to vector<8x1xi32>
    %199 = arith.sitofp %198 : vector<8x1xi32> to vector<8x1xf32>
    %200 = vector.broadcast %199 : vector<8x1xf32> to vector<8x32xf32>
    %201 = arith.mulf %192, %200 : vector<8x32xf32>
    %202 = vector.broadcast %199 : vector<8x1xf32> to vector<8x32xf32>
    %203 = arith.mulf %190, %202 : vector<8x32xf32>
    %204 = vector.extract_strided_slice %201 {offsets = [0, 0], sizes = [4, 32], strides = [1, 1]} : vector<8x32xf32> to vector<4x32xf32>
    %205 = vector.extract_strided_slice %201 {offsets = [4, 0], sizes = [4, 32], strides = [1, 1]} : vector<8x32xf32> to vector<4x32xf32>
    %206 = tpu.concatenate %201, %201 in 1 : vector<8x32xf32>, vector<8x32xf32> -> vector<8x64xf32>
    %207 = arith.mulf %206, %11 : vector<8x64xf32>
    %208 = vector.extract_strided_slice %24 {offsets = [16, 0], sizes = [4, 128], strides = [1, 1]} : vector<48x256xf32> to vector<4x128xf32>
    %209 = vector.extract_strided_slice %24 {offsets = [28, 128], sizes = [4, 128], strides = [1, 1]} : vector<48x256xf32> to vector<4x128xf32>
    %210 = tpu.concatenate %208, %209 in 0 : vector<4x128xf32>, vector<4x128xf32> -> vector<8x128xf32>
    %cst_36 = arith.constant dense<0.000000e+00> : vector<8x128xf32>
    %211 = tpu.matmul %207, %25, %cst_36 {dimension_numbers = #tpu.dot_dimension_numbers<[1], [0], [0], [1], [0, 0, 1, 1], [], []>} : vector<8x64xf32>, vector<64x128xf32>, vector<8x128xf32> -> vector<8x128xf32>
    %212 = arith.addf %210, %211 : vector<8x128xf32>
    %213 = vector.extract_strided_slice %212 {offsets = [0, 0], sizes = [8, 32], strides = [1, 1]} : vector<8x128xf32> to vector<8x32xf32>
    %214 = arith.negf %213 : vector<8x32xf32>
    %215 = math.exp %214 : vector<8x32xf32>
    %cst_37 = arith.constant 1.000000e+00 : f32
    %216 = vector.broadcast %cst_37 : f32 to vector<8x32xf32>
    %217 = arith.addf %216, %215 : vector<8x32xf32>
    %218 = arith.divf %216, %217 : vector<8x32xf32>
    %219 = vector.extract_strided_slice %212 {offsets = [0, 32], sizes = [8, 32], strides = [1, 1]} : vector<8x128xf32> to vector<8x32xf32>
    %220 = arith.negf %219 : vector<8x32xf32>
    %221 = math.exp %220 : vector<8x32xf32>
    %cst_38 = arith.constant 1.000000e+00 : f32
    %222 = vector.broadcast %cst_38 : f32 to vector<8x32xf32>
    %223 = arith.addf %222, %221 : vector<8x32xf32>
    %224 = arith.divf %222, %223 : vector<8x32xf32>
    %225 = vector.extract_strided_slice %212 {offsets = [0, 64], sizes = [8, 32], strides = [1, 1]} : vector<8x128xf32> to vector<8x32xf32>
    %226 = math.tanh %225 : vector<8x32xf32>
    %227 = vector.extract_strided_slice %212 {offsets = [0, 96], sizes = [8, 32], strides = [1, 1]} : vector<8x128xf32> to vector<8x32xf32>
    %228 = arith.negf %227 : vector<8x32xf32>
    %229 = math.exp %228 : vector<8x32xf32>
    %cst_39 = arith.constant 1.000000e+00 : f32
    %230 = vector.broadcast %cst_39 : f32 to vector<8x32xf32>
    %231 = arith.addf %230, %229 : vector<8x32xf32>
    %232 = arith.divf %230, %231 : vector<8x32xf32>
    %233 = arith.mulf %224, %203 : vector<8x32xf32>
    %234 = arith.mulf %218, %226 : vector<8x32xf32>
    %235 = arith.addf %233, %234 : vector<8x32xf32>
    %236 = math.tanh %235 : vector<8x32xf32>
    %237 = arith.mulf %232, %236 : vector<8x32xf32>
    %238 = vector.extract_strided_slice %237 {offsets = [0, 0], sizes = [4, 32], strides = [1, 1]} : vector<8x32xf32> to vector<4x32xf32>
    %239 = vector.extract_strided_slice %237 {offsets = [4, 0], sizes = [4, 32], strides = [1, 1]} : vector<8x32xf32> to vector<4x32xf32>
    %240 = tpu.concatenate %237, %237 in 1 : vector<8x32xf32>, vector<8x32xf32> -> vector<8x64xf32>
    %241 = arith.mulf %240, %11 : vector<8x64xf32>
    %242 = vector.extract_strided_slice %24 {offsets = [20, 0], sizes = [4, 128], strides = [1, 1]} : vector<48x256xf32> to vector<4x128xf32>
    %243 = vector.extract_strided_slice %24 {offsets = [24, 128], sizes = [4, 128], strides = [1, 1]} : vector<48x256xf32> to vector<4x128xf32>
    %244 = tpu.concatenate %242, %243 in 0 : vector<4x128xf32>, vector<4x128xf32> -> vector<8x128xf32>
    %cst_40 = arith.constant dense<0.000000e+00> : vector<8x128xf32>
    %245 = tpu.matmul %241, %25, %cst_40 {dimension_numbers = #tpu.dot_dimension_numbers<[1], [0], [0], [1], [0, 0, 1, 1], [], []>} : vector<8x64xf32>, vector<64x128xf32>, vector<8x128xf32> -> vector<8x128xf32>
    %246 = arith.addf %244, %245 : vector<8x128xf32>
    %247 = vector.extract_strided_slice %246 {offsets = [0, 0], sizes = [8, 32], strides = [1, 1]} : vector<8x128xf32> to vector<8x32xf32>
    %248 = arith.negf %247 : vector<8x32xf32>
    %249 = math.exp %248 : vector<8x32xf32>
    %cst_41 = arith.constant 1.000000e+00 : f32
    %250 = vector.broadcast %cst_41 : f32 to vector<8x32xf32>
    %251 = arith.addf %250, %249 : vector<8x32xf32>
    %252 = arith.divf %250, %251 : vector<8x32xf32>
    %253 = vector.extract_strided_slice %246 {offsets = [0, 32], sizes = [8, 32], strides = [1, 1]} : vector<8x128xf32> to vector<8x32xf32>
    %254 = arith.negf %253 : vector<8x32xf32>
    %255 = math.exp %254 : vector<8x32xf32>
    %cst_42 = arith.constant 1.000000e+00 : f32
    %256 = vector.broadcast %cst_42 : f32 to vector<8x32xf32>
    %257 = arith.addf %256, %255 : vector<8x32xf32>
    %258 = arith.divf %256, %257 : vector<8x32xf32>
    %259 = vector.extract_strided_slice %246 {offsets = [0, 64], sizes = [8, 32], strides = [1, 1]} : vector<8x128xf32> to vector<8x32xf32>
    %260 = math.tanh %259 : vector<8x32xf32>
    %261 = vector.extract_strided_slice %246 {offsets = [0, 96], sizes = [8, 32], strides = [1, 1]} : vector<8x128xf32> to vector<8x32xf32>
    %262 = arith.negf %261 : vector<8x32xf32>
    %263 = math.exp %262 : vector<8x32xf32>
    %cst_43 = arith.constant 1.000000e+00 : f32
    %264 = vector.broadcast %cst_43 : f32 to vector<8x32xf32>
    %265 = arith.addf %264, %263 : vector<8x32xf32>
    %266 = arith.divf %264, %265 : vector<8x32xf32>
    %267 = arith.mulf %258, %235 : vector<8x32xf32>
    %268 = arith.mulf %252, %260 : vector<8x32xf32>
    %269 = arith.addf %267, %268 : vector<8x32xf32>
    %270 = math.tanh %269 : vector<8x32xf32>
    %271 = arith.mulf %266, %270 : vector<8x32xf32>
    %272 = vector.extract_strided_slice %271 {offsets = [0, 0], sizes = [4, 32], strides = [1, 1]} : vector<8x32xf32> to vector<4x32xf32>
    %273 = vector.extract_strided_slice %271 {offsets = [4, 0], sizes = [4, 32], strides = [1, 1]} : vector<8x32xf32> to vector<4x32xf32>
    %274 = tpu.concatenate %271, %271 in 1 : vector<8x32xf32>, vector<8x32xf32> -> vector<8x64xf32>
    %275 = arith.mulf %274, %11 : vector<8x64xf32>
    %276 = vector.extract_strided_slice %24 {offsets = [24, 0], sizes = [4, 128], strides = [1, 1]} : vector<48x256xf32> to vector<4x128xf32>
    %277 = vector.extract_strided_slice %24 {offsets = [20, 128], sizes = [4, 128], strides = [1, 1]} : vector<48x256xf32> to vector<4x128xf32>
    %278 = tpu.concatenate %276, %277 in 0 : vector<4x128xf32>, vector<4x128xf32> -> vector<8x128xf32>
    %cst_44 = arith.constant dense<0.000000e+00> : vector<8x128xf32>
    %279 = tpu.matmul %275, %25, %cst_44 {dimension_numbers = #tpu.dot_dimension_numbers<[1], [0], [0], [1], [0, 0, 1, 1], [], []>} : vector<8x64xf32>, vector<64x128xf32>, vector<8x128xf32> -> vector<8x128xf32>
    %280 = arith.addf %278, %279 : vector<8x128xf32>
    %281 = vector.extract_strided_slice %280 {offsets = [0, 0], sizes = [8, 32], strides = [1, 1]} : vector<8x128xf32> to vector<8x32xf32>
    %282 = arith.negf %281 : vector<8x32xf32>
    %283 = math.exp %282 : vector<8x32xf32>
    %cst_45 = arith.constant 1.000000e+00 : f32
    %284 = vector.broadcast %cst_45 : f32 to vector<8x32xf32>
    %285 = arith.addf %284, %283 : vector<8x32xf32>
    %286 = arith.divf %284, %285 : vector<8x32xf32>
    %287 = vector.extract_strided_slice %280 {offsets = [0, 32], sizes = [8, 32], strides = [1, 1]} : vector<8x128xf32> to vector<8x32xf32>
    %288 = arith.negf %287 : vector<8x32xf32>
    %289 = math.exp %288 : vector<8x32xf32>
    %cst_46 = arith.constant 1.000000e+00 : f32
    %290 = vector.broadcast %cst_46 : f32 to vector<8x32xf32>
    %291 = arith.addf %290, %289 : vector<8x32xf32>
    %292 = arith.divf %290, %291 : vector<8x32xf32>
    %293 = vector.extract_strided_slice %280 {offsets = [0, 64], sizes = [8, 32], strides = [1, 1]} : vector<8x128xf32> to vector<8x32xf32>
    %294 = math.tanh %293 : vector<8x32xf32>
    %295 = vector.extract_strided_slice %280 {offsets = [0, 96], sizes = [8, 32], strides = [1, 1]} : vector<8x128xf32> to vector<8x32xf32>
    %296 = arith.negf %295 : vector<8x32xf32>
    %297 = math.exp %296 : vector<8x32xf32>
    %cst_47 = arith.constant 1.000000e+00 : f32
    %298 = vector.broadcast %cst_47 : f32 to vector<8x32xf32>
    %299 = arith.addf %298, %297 : vector<8x32xf32>
    %300 = arith.divf %298, %299 : vector<8x32xf32>
    %301 = arith.mulf %292, %269 : vector<8x32xf32>
    %302 = arith.mulf %286, %294 : vector<8x32xf32>
    %303 = arith.addf %301, %302 : vector<8x32xf32>
    %304 = math.tanh %303 : vector<8x32xf32>
    %305 = arith.mulf %300, %304 : vector<8x32xf32>
    %306 = vector.extract_strided_slice %305 {offsets = [0, 0], sizes = [4, 32], strides = [1, 1]} : vector<8x32xf32> to vector<4x32xf32>
    %307 = vector.extract_strided_slice %305 {offsets = [4, 0], sizes = [4, 32], strides = [1, 1]} : vector<8x32xf32> to vector<4x32xf32>
    %308 = tpu.concatenate %305, %305 in 1 : vector<8x32xf32>, vector<8x32xf32> -> vector<8x64xf32>
    %309 = arith.mulf %308, %11 : vector<8x64xf32>
    %310 = vector.extract_strided_slice %24 {offsets = [28, 0], sizes = [4, 128], strides = [1, 1]} : vector<48x256xf32> to vector<4x128xf32>
    %311 = vector.extract_strided_slice %24 {offsets = [16, 128], sizes = [4, 128], strides = [1, 1]} : vector<48x256xf32> to vector<4x128xf32>
    %312 = tpu.concatenate %310, %311 in 0 : vector<4x128xf32>, vector<4x128xf32> -> vector<8x128xf32>
    %cst_48 = arith.constant dense<0.000000e+00> : vector<8x128xf32>
    %313 = tpu.matmul %309, %25, %cst_48 {dimension_numbers = #tpu.dot_dimension_numbers<[1], [0], [0], [1], [0, 0, 1, 1], [], []>} : vector<8x64xf32>, vector<64x128xf32>, vector<8x128xf32> -> vector<8x128xf32>
    %314 = arith.addf %312, %313 : vector<8x128xf32>
    %315 = vector.extract_strided_slice %314 {offsets = [0, 0], sizes = [8, 32], strides = [1, 1]} : vector<8x128xf32> to vector<8x32xf32>
    %316 = arith.negf %315 : vector<8x32xf32>
    %317 = math.exp %316 : vector<8x32xf32>
    %cst_49 = arith.constant 1.000000e+00 : f32
    %318 = vector.broadcast %cst_49 : f32 to vector<8x32xf32>
    %319 = arith.addf %318, %317 : vector<8x32xf32>
    %320 = arith.divf %318, %319 : vector<8x32xf32>
    %321 = vector.extract_strided_slice %314 {offsets = [0, 32], sizes = [8, 32], strides = [1, 1]} : vector<8x128xf32> to vector<8x32xf32>
    %322 = arith.negf %321 : vector<8x32xf32>
    %323 = math.exp %322 : vector<8x32xf32>
    %cst_50 = arith.constant 1.000000e+00 : f32
    %324 = vector.broadcast %cst_50 : f32 to vector<8x32xf32>
    %325 = arith.addf %324, %323 : vector<8x32xf32>
    %326 = arith.divf %324, %325 : vector<8x32xf32>
    %327 = vector.extract_strided_slice %314 {offsets = [0, 64], sizes = [8, 32], strides = [1, 1]} : vector<8x128xf32> to vector<8x32xf32>
    %328 = math.tanh %327 : vector<8x32xf32>
    %329 = vector.extract_strided_slice %314 {offsets = [0, 96], sizes = [8, 32], strides = [1, 1]} : vector<8x128xf32> to vector<8x32xf32>
    %330 = arith.negf %329 : vector<8x32xf32>
    %331 = math.exp %330 : vector<8x32xf32>
    %cst_51 = arith.constant 1.000000e+00 : f32
    %332 = vector.broadcast %cst_51 : f32 to vector<8x32xf32>
    %333 = arith.addf %332, %331 : vector<8x32xf32>
    %334 = arith.divf %332, %333 : vector<8x32xf32>
    %335 = arith.mulf %326, %303 : vector<8x32xf32>
    %336 = arith.mulf %320, %328 : vector<8x32xf32>
    %337 = arith.addf %335, %336 : vector<8x32xf32>
    %338 = math.tanh %337 : vector<8x32xf32>
    %339 = arith.mulf %334, %338 : vector<8x32xf32>
    %340 = vector.extract_strided_slice %339 {offsets = [0, 0], sizes = [4, 32], strides = [1, 1]} : vector<8x32xf32> to vector<4x32xf32>
    %341 = vector.extract_strided_slice %339 {offsets = [4, 0], sizes = [4, 32], strides = [1, 1]} : vector<8x32xf32> to vector<4x32xf32>
    %342 = tpu.concatenate %339, %339 in 1 : vector<8x32xf32>, vector<8x32xf32> -> vector<8x64xf32>
    %343 = arith.mulf %342, %11 : vector<8x64xf32>
    %344 = vector.extract_strided_slice %24 {offsets = [32, 0], sizes = [4, 128], strides = [1, 1]} : vector<48x256xf32> to vector<4x128xf32>
    %345 = vector.extract_strided_slice %24 {offsets = [12, 128], sizes = [4, 128], strides = [1, 1]} : vector<48x256xf32> to vector<4x128xf32>
    %346 = tpu.concatenate %344, %345 in 0 : vector<4x128xf32>, vector<4x128xf32> -> vector<8x128xf32>
    %cst_52 = arith.constant dense<0.000000e+00> : vector<8x128xf32>
    %347 = tpu.matmul %343, %25, %cst_52 {dimension_numbers = #tpu.dot_dimension_numbers<[1], [0], [0], [1], [0, 0, 1, 1], [], []>} : vector<8x64xf32>, vector<64x128xf32>, vector<8x128xf32> -> vector<8x128xf32>
    %348 = arith.addf %346, %347 : vector<8x128xf32>
    %349 = vector.extract_strided_slice %348 {offsets = [0, 0], sizes = [8, 32], strides = [1, 1]} : vector<8x128xf32> to vector<8x32xf32>
    %350 = arith.negf %349 : vector<8x32xf32>
    %351 = math.exp %350 : vector<8x32xf32>
    %cst_53 = arith.constant 1.000000e+00 : f32
    %352 = vector.broadcast %cst_53 : f32 to vector<8x32xf32>
    %353 = arith.addf %352, %351 : vector<8x32xf32>
    %354 = arith.divf %352, %353 : vector<8x32xf32>
    %355 = vector.extract_strided_slice %348 {offsets = [0, 32], sizes = [8, 32], strides = [1, 1]} : vector<8x128xf32> to vector<8x32xf32>
    %356 = arith.negf %355 : vector<8x32xf32>
    %357 = math.exp %356 : vector<8x32xf32>
    %cst_54 = arith.constant 1.000000e+00 : f32
    %358 = vector.broadcast %cst_54 : f32 to vector<8x32xf32>
    %359 = arith.addf %358, %357 : vector<8x32xf32>
    %360 = arith.divf %358, %359 : vector<8x32xf32>
    %361 = vector.extract_strided_slice %348 {offsets = [0, 64], sizes = [8, 32], strides = [1, 1]} : vector<8x128xf32> to vector<8x32xf32>
    %362 = math.tanh %361 : vector<8x32xf32>
    %363 = vector.extract_strided_slice %348 {offsets = [0, 96], sizes = [8, 32], strides = [1, 1]} : vector<8x128xf32> to vector<8x32xf32>
    %364 = arith.negf %363 : vector<8x32xf32>
    %365 = math.exp %364 : vector<8x32xf32>
    %cst_55 = arith.constant 1.000000e+00 : f32
    %366 = vector.broadcast %cst_55 : f32 to vector<8x32xf32>
    %367 = arith.addf %366, %365 : vector<8x32xf32>
    %368 = arith.divf %366, %367 : vector<8x32xf32>
    %369 = arith.mulf %360, %337 : vector<8x32xf32>
    %370 = arith.mulf %354, %362 : vector<8x32xf32>
    %371 = arith.addf %369, %370 : vector<8x32xf32>
    %372 = math.tanh %371 : vector<8x32xf32>
    %373 = arith.mulf %368, %372 : vector<8x32xf32>
    %374 = vector.extract_strided_slice %373 {offsets = [0, 0], sizes = [4, 32], strides = [1, 1]} : vector<8x32xf32> to vector<4x32xf32>
    %375 = vector.extract_strided_slice %373 {offsets = [4, 0], sizes = [4, 32], strides = [1, 1]} : vector<8x32xf32> to vector<4x32xf32>
    %376 = tpu.concatenate %373, %373 in 1 : vector<8x32xf32>, vector<8x32xf32> -> vector<8x64xf32>
    %377 = arith.mulf %376, %11 : vector<8x64xf32>
    %378 = vector.extract_strided_slice %24 {offsets = [36, 0], sizes = [4, 128], strides = [1, 1]} : vector<48x256xf32> to vector<4x128xf32>
    %379 = vector.extract_strided_slice %24 {offsets = [8, 128], sizes = [4, 128], strides = [1, 1]} : vector<48x256xf32> to vector<4x128xf32>
    %380 = tpu.concatenate %378, %379 in 0 : vector<4x128xf32>, vector<4x128xf32> -> vector<8x128xf32>
    %cst_56 = arith.constant dense<0.000000e+00> : vector<8x128xf32>
    %381 = tpu.matmul %377, %25, %cst_56 {dimension_numbers = #tpu.dot_dimension_numbers<[1], [0], [0], [1], [0, 0, 1, 1], [], []>} : vector<8x64xf32>, vector<64x128xf32>, vector<8x128xf32> -> vector<8x128xf32>
    %382 = arith.addf %380, %381 : vector<8x128xf32>
    %383 = vector.extract_strided_slice %382 {offsets = [0, 0], sizes = [8, 32], strides = [1, 1]} : vector<8x128xf32> to vector<8x32xf32>
    %384 = arith.negf %383 : vector<8x32xf32>
    %385 = math.exp %384 : vector<8x32xf32>
    %cst_57 = arith.constant 1.000000e+00 : f32
    %386 = vector.broadcast %cst_57 : f32 to vector<8x32xf32>
    %387 = arith.addf %386, %385 : vector<8x32xf32>
    %388 = arith.divf %386, %387 : vector<8x32xf32>
    %389 = vector.extract_strided_slice %382 {offsets = [0, 32], sizes = [8, 32], strides = [1, 1]} : vector<8x128xf32> to vector<8x32xf32>
    %390 = arith.negf %389 : vector<8x32xf32>
    %391 = math.exp %390 : vector<8x32xf32>
    %cst_58 = arith.constant 1.000000e+00 : f32
    %392 = vector.broadcast %cst_58 : f32 to vector<8x32xf32>
    %393 = arith.addf %392, %391 : vector<8x32xf32>
    %394 = arith.divf %392, %393 : vector<8x32xf32>
    %395 = vector.extract_strided_slice %382 {offsets = [0, 64], sizes = [8, 32], strides = [1, 1]} : vector<8x128xf32> to vector<8x32xf32>
    %396 = math.tanh %395 : vector<8x32xf32>
    %397 = vector.extract_strided_slice %382 {offsets = [0, 96], sizes = [8, 32], strides = [1, 1]} : vector<8x128xf32> to vector<8x32xf32>
    %398 = arith.negf %397 : vector<8x32xf32>
    %399 = math.exp %398 : vector<8x32xf32>
    %cst_59 = arith.constant 1.000000e+00 : f32
    %400 = vector.broadcast %cst_59 : f32 to vector<8x32xf32>
    %401 = arith.addf %400, %399 : vector<8x32xf32>
    %402 = arith.divf %400, %401 : vector<8x32xf32>
    %403 = arith.mulf %394, %371 : vector<8x32xf32>
    %404 = arith.mulf %388, %396 : vector<8x32xf32>
    %405 = arith.addf %403, %404 : vector<8x32xf32>
    %406 = math.tanh %405 : vector<8x32xf32>
    %407 = arith.mulf %402, %406 : vector<8x32xf32>
    %408 = vector.extract_strided_slice %407 {offsets = [0, 0], sizes = [4, 32], strides = [1, 1]} : vector<8x32xf32> to vector<4x32xf32>
    %409 = vector.extract_strided_slice %407 {offsets = [4, 0], sizes = [4, 32], strides = [1, 1]} : vector<8x32xf32> to vector<4x32xf32>
    %410 = tpu.concatenate %407, %407 in 1 : vector<8x32xf32>, vector<8x32xf32> -> vector<8x64xf32>
    %411 = arith.mulf %410, %11 : vector<8x64xf32>
    %412 = vector.extract_strided_slice %24 {offsets = [40, 0], sizes = [4, 128], strides = [1, 1]} : vector<48x256xf32> to vector<4x128xf32>
    %413 = vector.extract_strided_slice %24 {offsets = [4, 128], sizes = [4, 128], strides = [1, 1]} : vector<48x256xf32> to vector<4x128xf32>
    %414 = tpu.concatenate %412, %413 in 0 : vector<4x128xf32>, vector<4x128xf32> -> vector<8x128xf32>
    %cst_60 = arith.constant dense<0.000000e+00> : vector<8x128xf32>
    %415 = tpu.matmul %411, %25, %cst_60 {dimension_numbers = #tpu.dot_dimension_numbers<[1], [0], [0], [1], [0, 0, 1, 1], [], []>} : vector<8x64xf32>, vector<64x128xf32>, vector<8x128xf32> -> vector<8x128xf32>
    %416 = arith.addf %414, %415 : vector<8x128xf32>
    %417 = vector.extract_strided_slice %416 {offsets = [0, 0], sizes = [8, 32], strides = [1, 1]} : vector<8x128xf32> to vector<8x32xf32>
    %418 = arith.negf %417 : vector<8x32xf32>
    %419 = math.exp %418 : vector<8x32xf32>
    %cst_61 = arith.constant 1.000000e+00 : f32
    %420 = vector.broadcast %cst_61 : f32 to vector<8x32xf32>
    %421 = arith.addf %420, %419 : vector<8x32xf32>
    %422 = arith.divf %420, %421 : vector<8x32xf32>
    %423 = vector.extract_strided_slice %416 {offsets = [0, 32], sizes = [8, 32], strides = [1, 1]} : vector<8x128xf32> to vector<8x32xf32>
    %424 = arith.negf %423 : vector<8x32xf32>
    %425 = math.exp %424 : vector<8x32xf32>
    %cst_62 = arith.constant 1.000000e+00 : f32
    %426 = vector.broadcast %cst_62 : f32 to vector<8x32xf32>
    %427 = arith.addf %426, %425 : vector<8x32xf32>
    %428 = arith.divf %426, %427 : vector<8x32xf32>
    %429 = vector.extract_strided_slice %416 {offsets = [0, 64], sizes = [8, 32], strides = [1, 1]} : vector<8x128xf32> to vector<8x32xf32>
    %430 = math.tanh %429 : vector<8x32xf32>
    %431 = vector.extract_strided_slice %416 {offsets = [0, 96], sizes = [8, 32], strides = [1, 1]} : vector<8x128xf32> to vector<8x32xf32>
    %432 = arith.negf %431 : vector<8x32xf32>
    %433 = math.exp %432 : vector<8x32xf32>
    %cst_63 = arith.constant 1.000000e+00 : f32
    %434 = vector.broadcast %cst_63 : f32 to vector<8x32xf32>
    %435 = arith.addf %434, %433 : vector<8x32xf32>
    %436 = arith.divf %434, %435 : vector<8x32xf32>
    %437 = arith.mulf %428, %405 : vector<8x32xf32>
    %438 = arith.mulf %422, %430 : vector<8x32xf32>
    %439 = arith.addf %437, %438 : vector<8x32xf32>
    %440 = math.tanh %439 : vector<8x32xf32>
    %441 = arith.mulf %436, %440 : vector<8x32xf32>
    %442 = vector.extract_strided_slice %441 {offsets = [0, 0], sizes = [4, 32], strides = [1, 1]} : vector<8x32xf32> to vector<4x32xf32>
    %443 = vector.extract_strided_slice %441 {offsets = [4, 0], sizes = [4, 32], strides = [1, 1]} : vector<8x32xf32> to vector<4x32xf32>
    %444 = tpu.concatenate %441, %441 in 1 : vector<8x32xf32>, vector<8x32xf32> -> vector<8x64xf32>
    %445 = arith.mulf %444, %11 : vector<8x64xf32>
    %446 = vector.extract_strided_slice %24 {offsets = [44, 0], sizes = [4, 128], strides = [1, 1]} : vector<48x256xf32> to vector<4x128xf32>
    %447 = vector.extract_strided_slice %24 {offsets = [0, 128], sizes = [4, 128], strides = [1, 1]} : vector<48x256xf32> to vector<4x128xf32>
    %448 = tpu.concatenate %446, %447 in 0 : vector<4x128xf32>, vector<4x128xf32> -> vector<8x128xf32>
    %cst_64 = arith.constant dense<0.000000e+00> : vector<8x128xf32>
    %449 = tpu.matmul %445, %25, %cst_64 {dimension_numbers = #tpu.dot_dimension_numbers<[1], [0], [0], [1], [0, 0, 1, 1], [], []>} : vector<8x64xf32>, vector<64x128xf32>, vector<8x128xf32> -> vector<8x128xf32>
    %450 = arith.addf %448, %449 : vector<8x128xf32>
    %451 = vector.extract_strided_slice %450 {offsets = [0, 0], sizes = [8, 32], strides = [1, 1]} : vector<8x128xf32> to vector<8x32xf32>
    %452 = arith.negf %451 : vector<8x32xf32>
    %453 = math.exp %452 : vector<8x32xf32>
    %cst_65 = arith.constant 1.000000e+00 : f32
    %454 = vector.broadcast %cst_65 : f32 to vector<8x32xf32>
    %455 = arith.addf %454, %453 : vector<8x32xf32>
    %456 = arith.divf %454, %455 : vector<8x32xf32>
    %457 = vector.extract_strided_slice %450 {offsets = [0, 32], sizes = [8, 32], strides = [1, 1]} : vector<8x128xf32> to vector<8x32xf32>
    %458 = arith.negf %457 : vector<8x32xf32>
    %459 = math.exp %458 : vector<8x32xf32>
    %cst_66 = arith.constant 1.000000e+00 : f32
    %460 = vector.broadcast %cst_66 : f32 to vector<8x32xf32>
    %461 = arith.addf %460, %459 : vector<8x32xf32>
    %462 = arith.divf %460, %461 : vector<8x32xf32>
    %463 = vector.extract_strided_slice %450 {offsets = [0, 64], sizes = [8, 32], strides = [1, 1]} : vector<8x128xf32> to vector<8x32xf32>
    %464 = math.tanh %463 : vector<8x32xf32>
    %465 = vector.extract_strided_slice %450 {offsets = [0, 96], sizes = [8, 32], strides = [1, 1]} : vector<8x128xf32> to vector<8x32xf32>
    %466 = arith.negf %465 : vector<8x32xf32>
    %467 = math.exp %466 : vector<8x32xf32>
    %cst_67 = arith.constant 1.000000e+00 : f32
    %468 = vector.broadcast %cst_67 : f32 to vector<8x32xf32>
    %469 = arith.addf %468, %467 : vector<8x32xf32>
    %470 = arith.divf %468, %469 : vector<8x32xf32>
    %471 = arith.mulf %462, %439 : vector<8x32xf32>
    %472 = arith.mulf %456, %464 : vector<8x32xf32>
    %473 = arith.addf %471, %472 : vector<8x32xf32>
    %474 = math.tanh %473 : vector<8x32xf32>
    %475 = arith.mulf %470, %474 : vector<8x32xf32>
    %476 = vector.extract_strided_slice %475 {offsets = [0, 0], sizes = [4, 32], strides = [1, 1]} : vector<8x32xf32> to vector<4x32xf32>
    %477 = vector.extract_strided_slice %475 {offsets = [4, 0], sizes = [4, 32], strides = [1, 1]} : vector<8x32xf32> to vector<4x32xf32>
    %478 = tpu.concatenate %69, %477 in 1 : vector<4x32xf32>, vector<4x32xf32> -> vector<4x64xf32>
    %479 = tpu.concatenate %114, %443 in 1 : vector<4x32xf32>, vector<4x32xf32> -> vector<4x64xf32>
    %480 = tpu.concatenate %159, %409 in 1 : vector<4x32xf32>, vector<4x32xf32> -> vector<4x64xf32>
    %481 = tpu.concatenate %204, %375 in 1 : vector<4x32xf32>, vector<4x32xf32> -> vector<4x64xf32>
    %482 = tpu.concatenate %238, %341 in 1 : vector<4x32xf32>, vector<4x32xf32> -> vector<4x64xf32>
    %483 = tpu.concatenate %272, %307 in 1 : vector<4x32xf32>, vector<4x32xf32> -> vector<4x64xf32>
    %484 = tpu.concatenate %306, %273 in 1 : vector<4x32xf32>, vector<4x32xf32> -> vector<4x64xf32>
    %485 = tpu.concatenate %340, %239 in 1 : vector<4x32xf32>, vector<4x32xf32> -> vector<4x64xf32>
    %486 = tpu.concatenate %374, %205 in 1 : vector<4x32xf32>, vector<4x32xf32> -> vector<4x64xf32>
    %487 = tpu.concatenate %408, %160 in 1 : vector<4x32xf32>, vector<4x32xf32> -> vector<4x64xf32>
    %488 = tpu.concatenate %442, %115 in 1 : vector<4x32xf32>, vector<4x32xf32> -> vector<4x64xf32>
    %489 = tpu.concatenate %476, %70 in 1 : vector<4x32xf32>, vector<4x32xf32> -> vector<4x64xf32>
    %490 = tpu.concatenate %478, %479, %480, %481, %482, %483, %484, %485, %486, %487, %488, %489 in 0 : vector<4x64xf32>, vector<4x64xf32>, vector<4x64xf32>, vector<4x64xf32>, vector<4x64xf32>, vector<4x64xf32>, vector<4x64xf32>, vector<4x64xf32>, vector<4x64xf32>, vector<4x64xf32>, vector<4x64xf32>, vector<4x64xf32> -> vector<48x64xf32>
    %c0_68 = arith.constant 0 : index
    %c0_69 = arith.constant 0 : index
    %491 = vector.load %arg6[%c0_68, %c0_69] : memref<64x256xf32, #tpu.memory_space<vmem>>, vector<64x256xf32>
    %cst_70 = arith.constant dense<0.000000e+00> : vector<48x256xf32>
    %492 = tpu.matmul %490, %491, %cst_70 {dimension_numbers = #tpu.dot_dimension_numbers<[1], [0], [0], [1], [0, 0, 1, 1], [], []>} : vector<48x64xf32>, vector<64x256xf32>, vector<48x256xf32> -> vector<48x256xf32>
    %c0_71 = arith.constant 0 : index
    %c0_72 = arith.constant 0 : index
    %493 = vector.load %arg8[%c0_71, %c0_72] : memref<1x256xf32, #tpu.memory_space<vmem>>, vector<1x256xf32>
    %494 = vector.broadcast %493 : vector<1x256xf32> to vector<48x256xf32>
    %495 = arith.addf %492, %494 : vector<48x256xf32>
    %c0_73 = arith.constant 0 : index
    %c0_74 = arith.constant 0 : index
    %496 = vector.load %arg7[%c0_73, %c0_74] : memref<64x128xf32, #tpu.memory_space<vmem>>, vector<64x128xf32>
    %cst_75 = arith.constant 0.000000e+00 : f32
    %497 = vector.broadcast %cst_75 : f32 to vector<8x64xf32>
    %cst_76 = arith.constant 0.000000e+00 : f32
    %498 = vector.broadcast %cst_76 : f32 to vector<8x32xf32>
    %499 = vector.extract_strided_slice %495 {offsets = [0, 0], sizes = [4, 128], strides = [1, 1]} : vector<48x256xf32> to vector<4x128xf32>
    %500 = vector.extract_strided_slice %495 {offsets = [44, 128], sizes = [4, 128], strides = [1, 1]} : vector<48x256xf32> to vector<4x128xf32>
    %501 = tpu.concatenate %499, %500 in 0 : vector<4x128xf32>, vector<4x128xf32> -> vector<8x128xf32>
    %cst_77 = arith.constant dense<0.000000e+00> : vector<8x128xf32>
    %502 = tpu.matmul %497, %496, %cst_77 {dimension_numbers = #tpu.dot_dimension_numbers<[1], [0], [0], [1], [0, 0, 1, 1], [], []>} : vector<8x64xf32>, vector<64x128xf32>, vector<8x128xf32> -> vector<8x128xf32>
    %503 = arith.addf %501, %502 : vector<8x128xf32>
    %504 = vector.extract_strided_slice %503 {offsets = [0, 0], sizes = [8, 32], strides = [1, 1]} : vector<8x128xf32> to vector<8x32xf32>
    %505 = arith.negf %504 : vector<8x32xf32>
    %506 = math.exp %505 : vector<8x32xf32>
    %cst_78 = arith.constant 1.000000e+00 : f32
    %507 = vector.broadcast %cst_78 : f32 to vector<8x32xf32>
    %508 = arith.addf %507, %506 : vector<8x32xf32>
    %509 = arith.divf %507, %508 : vector<8x32xf32>
    %510 = vector.extract_strided_slice %503 {offsets = [0, 32], sizes = [8, 32], strides = [1, 1]} : vector<8x128xf32> to vector<8x32xf32>
    %511 = arith.negf %510 : vector<8x32xf32>
    %512 = math.exp %511 : vector<8x32xf32>
    %cst_79 = arith.constant 1.000000e+00 : f32
    %513 = vector.broadcast %cst_79 : f32 to vector<8x32xf32>
    %514 = arith.addf %513, %512 : vector<8x32xf32>
    %515 = arith.divf %513, %514 : vector<8x32xf32>
    %516 = vector.extract_strided_slice %503 {offsets = [0, 64], sizes = [8, 32], strides = [1, 1]} : vector<8x128xf32> to vector<8x32xf32>
    %517 = math.tanh %516 : vector<8x32xf32>
    %518 = vector.extract_strided_slice %503 {offsets = [0, 96], sizes = [8, 32], strides = [1, 1]} : vector<8x128xf32> to vector<8x32xf32>
    %519 = arith.negf %518 : vector<8x32xf32>
    %520 = math.exp %519 : vector<8x32xf32>
    %cst_80 = arith.constant 1.000000e+00 : f32
    %521 = vector.broadcast %cst_80 : f32 to vector<8x32xf32>
    %522 = arith.addf %521, %520 : vector<8x32xf32>
    %523 = arith.divf %521, %522 : vector<8x32xf32>
    %524 = arith.mulf %515, %498 : vector<8x32xf32>
    %525 = arith.mulf %509, %517 : vector<8x32xf32>
    %526 = arith.addf %524, %525 : vector<8x32xf32>
    %527 = math.tanh %526 : vector<8x32xf32>
    %528 = arith.mulf %523, %527 : vector<8x32xf32>
    %c4_i32_81 = arith.constant 4 : i32
    %529 = vector.broadcast %c4_i32_81 : i32 to vector<8x1xi32>
    %530 = arith.cmpi slt, %0, %529 : vector<8x1xi32>
    %c6_i32_82 = arith.constant 6 : i32
    %531 = vector.broadcast %c6_i32_82 : i32 to vector<8x1xi32>
    %532 = arith.cmpi sge, %0, %531 : vector<8x1xi32>
    %533 = arith.ori %530, %532 : vector<8x1xi1>
    %534 = arith.extui %533 : vector<8x1xi1> to vector<8x1xi32>
    %535 = arith.sitofp %534 : vector<8x1xi32> to vector<8x1xf32>
    %536 = vector.broadcast %535 : vector<8x1xf32> to vector<8x32xf32>
    %537 = arith.mulf %528, %536 : vector<8x32xf32>
    %538 = vector.broadcast %535 : vector<8x1xf32> to vector<8x32xf32>
    %539 = arith.mulf %526, %538 : vector<8x32xf32>
    %540 = vector.extract_strided_slice %537 {offsets = [0, 0], sizes = [4, 32], strides = [1, 1]} : vector<8x32xf32> to vector<4x32xf32>
    %541 = vector.extract_strided_slice %537 {offsets = [4, 0], sizes = [4, 32], strides = [1, 1]} : vector<8x32xf32> to vector<4x32xf32>
    %542 = tpu.concatenate %537, %537 in 1 : vector<8x32xf32>, vector<8x32xf32> -> vector<8x64xf32>
    %543 = arith.mulf %542, %11 : vector<8x64xf32>
    %544 = vector.extract_strided_slice %495 {offsets = [4, 0], sizes = [4, 128], strides = [1, 1]} : vector<48x256xf32> to vector<4x128xf32>
    %545 = vector.extract_strided_slice %495 {offsets = [40, 128], sizes = [4, 128], strides = [1, 1]} : vector<48x256xf32> to vector<4x128xf32>
    %546 = tpu.concatenate %544, %545 in 0 : vector<4x128xf32>, vector<4x128xf32> -> vector<8x128xf32>
    %cst_83 = arith.constant dense<0.000000e+00> : vector<8x128xf32>
    %547 = tpu.matmul %543, %496, %cst_83 {dimension_numbers = #tpu.dot_dimension_numbers<[1], [0], [0], [1], [0, 0, 1, 1], [], []>} : vector<8x64xf32>, vector<64x128xf32>, vector<8x128xf32> -> vector<8x128xf32>
    %548 = arith.addf %546, %547 : vector<8x128xf32>
    %549 = vector.extract_strided_slice %548 {offsets = [0, 0], sizes = [8, 32], strides = [1, 1]} : vector<8x128xf32> to vector<8x32xf32>
    %550 = arith.negf %549 : vector<8x32xf32>
    %551 = math.exp %550 : vector<8x32xf32>
    %cst_84 = arith.constant 1.000000e+00 : f32
    %552 = vector.broadcast %cst_84 : f32 to vector<8x32xf32>
    %553 = arith.addf %552, %551 : vector<8x32xf32>
    %554 = arith.divf %552, %553 : vector<8x32xf32>
    %555 = vector.extract_strided_slice %548 {offsets = [0, 32], sizes = [8, 32], strides = [1, 1]} : vector<8x128xf32> to vector<8x32xf32>
    %556 = arith.negf %555 : vector<8x32xf32>
    %557 = math.exp %556 : vector<8x32xf32>
    %cst_85 = arith.constant 1.000000e+00 : f32
    %558 = vector.broadcast %cst_85 : f32 to vector<8x32xf32>
    %559 = arith.addf %558, %557 : vector<8x32xf32>
    %560 = arith.divf %558, %559 : vector<8x32xf32>
    %561 = vector.extract_strided_slice %548 {offsets = [0, 64], sizes = [8, 32], strides = [1, 1]} : vector<8x128xf32> to vector<8x32xf32>
    %562 = math.tanh %561 : vector<8x32xf32>
    %563 = vector.extract_strided_slice %548 {offsets = [0, 96], sizes = [8, 32], strides = [1, 1]} : vector<8x128xf32> to vector<8x32xf32>
    %564 = arith.negf %563 : vector<8x32xf32>
    %565 = math.exp %564 : vector<8x32xf32>
    %cst_86 = arith.constant 1.000000e+00 : f32
    %566 = vector.broadcast %cst_86 : f32 to vector<8x32xf32>
    %567 = arith.addf %566, %565 : vector<8x32xf32>
    %568 = arith.divf %566, %567 : vector<8x32xf32>
    %569 = arith.mulf %560, %539 : vector<8x32xf32>
    %570 = arith.mulf %554, %562 : vector<8x32xf32>
    %571 = arith.addf %569, %570 : vector<8x32xf32>
    %572 = math.tanh %571 : vector<8x32xf32>
    %573 = arith.mulf %568, %572 : vector<8x32xf32>
    %c4_i32_87 = arith.constant 4 : i32
    %574 = vector.broadcast %c4_i32_87 : i32 to vector<8x1xi32>
    %575 = arith.cmpi slt, %0, %574 : vector<8x1xi32>
    %c6_i32_88 = arith.constant 6 : i32
    %576 = vector.broadcast %c6_i32_88 : i32 to vector<8x1xi32>
    %577 = arith.cmpi sge, %0, %576 : vector<8x1xi32>
    %578 = arith.ori %575, %577 : vector<8x1xi1>
    %579 = arith.extui %578 : vector<8x1xi1> to vector<8x1xi32>
    %580 = arith.sitofp %579 : vector<8x1xi32> to vector<8x1xf32>
    %581 = vector.broadcast %580 : vector<8x1xf32> to vector<8x32xf32>
    %582 = arith.mulf %573, %581 : vector<8x32xf32>
    %583 = vector.broadcast %580 : vector<8x1xf32> to vector<8x32xf32>
    %584 = arith.mulf %571, %583 : vector<8x32xf32>
    %585 = vector.extract_strided_slice %582 {offsets = [0, 0], sizes = [4, 32], strides = [1, 1]} : vector<8x32xf32> to vector<4x32xf32>
    %586 = vector.extract_strided_slice %582 {offsets = [4, 0], sizes = [4, 32], strides = [1, 1]} : vector<8x32xf32> to vector<4x32xf32>
    %587 = tpu.concatenate %582, %582 in 1 : vector<8x32xf32>, vector<8x32xf32> -> vector<8x64xf32>
    %588 = arith.mulf %587, %11 : vector<8x64xf32>
    %589 = vector.extract_strided_slice %495 {offsets = [8, 0], sizes = [4, 128], strides = [1, 1]} : vector<48x256xf32> to vector<4x128xf32>
    %590 = vector.extract_strided_slice %495 {offsets = [36, 128], sizes = [4, 128], strides = [1, 1]} : vector<48x256xf32> to vector<4x128xf32>
    %591 = tpu.concatenate %589, %590 in 0 : vector<4x128xf32>, vector<4x128xf32> -> vector<8x128xf32>
    %cst_89 = arith.constant dense<0.000000e+00> : vector<8x128xf32>
    %592 = tpu.matmul %588, %496, %cst_89 {dimension_numbers = #tpu.dot_dimension_numbers<[1], [0], [0], [1], [0, 0, 1, 1], [], []>} : vector<8x64xf32>, vector<64x128xf32>, vector<8x128xf32> -> vector<8x128xf32>
    %593 = arith.addf %591, %592 : vector<8x128xf32>
    %594 = vector.extract_strided_slice %593 {offsets = [0, 0], sizes = [8, 32], strides = [1, 1]} : vector<8x128xf32> to vector<8x32xf32>
    %595 = arith.negf %594 : vector<8x32xf32>
    %596 = math.exp %595 : vector<8x32xf32>
    %cst_90 = arith.constant 1.000000e+00 : f32
    %597 = vector.broadcast %cst_90 : f32 to vector<8x32xf32>
    %598 = arith.addf %597, %596 : vector<8x32xf32>
    %599 = arith.divf %597, %598 : vector<8x32xf32>
    %600 = vector.extract_strided_slice %593 {offsets = [0, 32], sizes = [8, 32], strides = [1, 1]} : vector<8x128xf32> to vector<8x32xf32>
    %601 = arith.negf %600 : vector<8x32xf32>
    %602 = math.exp %601 : vector<8x32xf32>
    %cst_91 = arith.constant 1.000000e+00 : f32
    %603 = vector.broadcast %cst_91 : f32 to vector<8x32xf32>
    %604 = arith.addf %603, %602 : vector<8x32xf32>
    %605 = arith.divf %603, %604 : vector<8x32xf32>
    %606 = vector.extract_strided_slice %593 {offsets = [0, 64], sizes = [8, 32], strides = [1, 1]} : vector<8x128xf32> to vector<8x32xf32>
    %607 = math.tanh %606 : vector<8x32xf32>
    %608 = vector.extract_strided_slice %593 {offsets = [0, 96], sizes = [8, 32], strides = [1, 1]} : vector<8x128xf32> to vector<8x32xf32>
    %609 = arith.negf %608 : vector<8x32xf32>
    %610 = math.exp %609 : vector<8x32xf32>
    %cst_92 = arith.constant 1.000000e+00 : f32
    %611 = vector.broadcast %cst_92 : f32 to vector<8x32xf32>
    %612 = arith.addf %611, %610 : vector<8x32xf32>
    %613 = arith.divf %611, %612 : vector<8x32xf32>
    %614 = arith.mulf %605, %584 : vector<8x32xf32>
    %615 = arith.mulf %599, %607 : vector<8x32xf32>
    %616 = arith.addf %614, %615 : vector<8x32xf32>
    %617 = math.tanh %616 : vector<8x32xf32>
    %618 = arith.mulf %613, %617 : vector<8x32xf32>
    %c4_i32_93 = arith.constant 4 : i32
    %619 = vector.broadcast %c4_i32_93 : i32 to vector<8x1xi32>
    %620 = arith.cmpi slt, %0, %619 : vector<8x1xi32>
    %c6_i32_94 = arith.constant 6 : i32
    %621 = vector.broadcast %c6_i32_94 : i32 to vector<8x1xi32>
    %622 = arith.cmpi sge, %0, %621 : vector<8x1xi32>
    %623 = arith.ori %620, %622 : vector<8x1xi1>
    %624 = arith.extui %623 : vector<8x1xi1> to vector<8x1xi32>
    %625 = arith.sitofp %624 : vector<8x1xi32> to vector<8x1xf32>
    %626 = vector.broadcast %625 : vector<8x1xf32> to vector<8x32xf32>
    %627 = arith.mulf %618, %626 : vector<8x32xf32>
    %628 = vector.broadcast %625 : vector<8x1xf32> to vector<8x32xf32>
    %629 = arith.mulf %616, %628 : vector<8x32xf32>
    %630 = vector.extract_strided_slice %627 {offsets = [0, 0], sizes = [4, 32], strides = [1, 1]} : vector<8x32xf32> to vector<4x32xf32>
    %631 = vector.extract_strided_slice %627 {offsets = [4, 0], sizes = [4, 32], strides = [1, 1]} : vector<8x32xf32> to vector<4x32xf32>
    %632 = tpu.concatenate %627, %627 in 1 : vector<8x32xf32>, vector<8x32xf32> -> vector<8x64xf32>
    %633 = arith.mulf %632, %11 : vector<8x64xf32>
    %634 = vector.extract_strided_slice %495 {offsets = [12, 0], sizes = [4, 128], strides = [1, 1]} : vector<48x256xf32> to vector<4x128xf32>
    %635 = vector.extract_strided_slice %495 {offsets = [32, 128], sizes = [4, 128], strides = [1, 1]} : vector<48x256xf32> to vector<4x128xf32>
    %636 = tpu.concatenate %634, %635 in 0 : vector<4x128xf32>, vector<4x128xf32> -> vector<8x128xf32>
    %cst_95 = arith.constant dense<0.000000e+00> : vector<8x128xf32>
    %637 = tpu.matmul %633, %496, %cst_95 {dimension_numbers = #tpu.dot_dimension_numbers<[1], [0], [0], [1], [0, 0, 1, 1], [], []>} : vector<8x64xf32>, vector<64x128xf32>, vector<8x128xf32> -> vector<8x128xf32>
    %638 = arith.addf %636, %637 : vector<8x128xf32>
    %639 = vector.extract_strided_slice %638 {offsets = [0, 0], sizes = [8, 32], strides = [1, 1]} : vector<8x128xf32> to vector<8x32xf32>
    %640 = arith.negf %639 : vector<8x32xf32>
    %641 = math.exp %640 : vector<8x32xf32>
    %cst_96 = arith.constant 1.000000e+00 : f32
    %642 = vector.broadcast %cst_96 : f32 to vector<8x32xf32>
    %643 = arith.addf %642, %641 : vector<8x32xf32>
    %644 = arith.divf %642, %643 : vector<8x32xf32>
    %645 = vector.extract_strided_slice %638 {offsets = [0, 32], sizes = [8, 32], strides = [1, 1]} : vector<8x128xf32> to vector<8x32xf32>
    %646 = arith.negf %645 : vector<8x32xf32>
    %647 = math.exp %646 : vector<8x32xf32>
    %cst_97 = arith.constant 1.000000e+00 : f32
    %648 = vector.broadcast %cst_97 : f32 to vector<8x32xf32>
    %649 = arith.addf %648, %647 : vector<8x32xf32>
    %650 = arith.divf %648, %649 : vector<8x32xf32>
    %651 = vector.extract_strided_slice %638 {offsets = [0, 64], sizes = [8, 32], strides = [1, 1]} : vector<8x128xf32> to vector<8x32xf32>
    %652 = math.tanh %651 : vector<8x32xf32>
    %653 = vector.extract_strided_slice %638 {offsets = [0, 96], sizes = [8, 32], strides = [1, 1]} : vector<8x128xf32> to vector<8x32xf32>
    %654 = arith.negf %653 : vector<8x32xf32>
    %655 = math.exp %654 : vector<8x32xf32>
    %cst_98 = arith.constant 1.000000e+00 : f32
    %656 = vector.broadcast %cst_98 : f32 to vector<8x32xf32>
    %657 = arith.addf %656, %655 : vector<8x32xf32>
    %658 = arith.divf %656, %657 : vector<8x32xf32>
    %659 = arith.mulf %650, %629 : vector<8x32xf32>
    %660 = arith.mulf %644, %652 : vector<8x32xf32>
    %661 = arith.addf %659, %660 : vector<8x32xf32>
    %662 = math.tanh %661 : vector<8x32xf32>
    %663 = arith.mulf %658, %662 : vector<8x32xf32>
    %c4_i32_99 = arith.constant 4 : i32
    %664 = vector.broadcast %c4_i32_99 : i32 to vector<8x1xi32>
    %665 = arith.cmpi slt, %0, %664 : vector<8x1xi32>
    %c6_i32_100 = arith.constant 6 : i32
    %666 = vector.broadcast %c6_i32_100 : i32 to vector<8x1xi32>
    %667 = arith.cmpi sge, %0, %666 : vector<8x1xi32>
    %668 = arith.ori %665, %667 : vector<8x1xi1>
    %669 = arith.extui %668 : vector<8x1xi1> to vector<8x1xi32>
    %670 = arith.sitofp %669 : vector<8x1xi32> to vector<8x1xf32>
    %671 = vector.broadcast %670 : vector<8x1xf32> to vector<8x32xf32>
    %672 = arith.mulf %663, %671 : vector<8x32xf32>
    %673 = vector.broadcast %670 : vector<8x1xf32> to vector<8x32xf32>
    %674 = arith.mulf %661, %673 : vector<8x32xf32>
    %675 = vector.extract_strided_slice %672 {offsets = [0, 0], sizes = [4, 32], strides = [1, 1]} : vector<8x32xf32> to vector<4x32xf32>
    %676 = vector.extract_strided_slice %672 {offsets = [4, 0], sizes = [4, 32], strides = [1, 1]} : vector<8x32xf32> to vector<4x32xf32>
    %677 = tpu.concatenate %672, %672 in 1 : vector<8x32xf32>, vector<8x32xf32> -> vector<8x64xf32>
    %678 = arith.mulf %677, %11 : vector<8x64xf32>
    %679 = vector.extract_strided_slice %495 {offsets = [16, 0], sizes = [4, 128], strides = [1, 1]} : vector<48x256xf32> to vector<4x128xf32>
    %680 = vector.extract_strided_slice %495 {offsets = [28, 128], sizes = [4, 128], strides = [1, 1]} : vector<48x256xf32> to vector<4x128xf32>
    %681 = tpu.concatenate %679, %680 in 0 : vector<4x128xf32>, vector<4x128xf32> -> vector<8x128xf32>
    %cst_101 = arith.constant dense<0.000000e+00> : vector<8x128xf32>
    %682 = tpu.matmul %678, %496, %cst_101 {dimension_numbers = #tpu.dot_dimension_numbers<[1], [0], [0], [1], [0, 0, 1, 1], [], []>} : vector<8x64xf32>, vector<64x128xf32>, vector<8x128xf32> -> vector<8x128xf32>
    %683 = arith.addf %681, %682 : vector<8x128xf32>
    %684 = vector.extract_strided_slice %683 {offsets = [0, 0], sizes = [8, 32], strides = [1, 1]} : vector<8x128xf32> to vector<8x32xf32>
    %685 = arith.negf %684 : vector<8x32xf32>
    %686 = math.exp %685 : vector<8x32xf32>
    %cst_102 = arith.constant 1.000000e+00 : f32
    %687 = vector.broadcast %cst_102 : f32 to vector<8x32xf32>
    %688 = arith.addf %687, %686 : vector<8x32xf32>
    %689 = arith.divf %687, %688 : vector<8x32xf32>
    %690 = vector.extract_strided_slice %683 {offsets = [0, 32], sizes = [8, 32], strides = [1, 1]} : vector<8x128xf32> to vector<8x32xf32>
    %691 = arith.negf %690 : vector<8x32xf32>
    %692 = math.exp %691 : vector<8x32xf32>
    %cst_103 = arith.constant 1.000000e+00 : f32
    %693 = vector.broadcast %cst_103 : f32 to vector<8x32xf32>
    %694 = arith.addf %693, %692 : vector<8x32xf32>
    %695 = arith.divf %693, %694 : vector<8x32xf32>
    %696 = vector.extract_strided_slice %683 {offsets = [0, 64], sizes = [8, 32], strides = [1, 1]} : vector<8x128xf32> to vector<8x32xf32>
    %697 = math.tanh %696 : vector<8x32xf32>
    %698 = vector.extract_strided_slice %683 {offsets = [0, 96], sizes = [8, 32], strides = [1, 1]} : vector<8x128xf32> to vector<8x32xf32>
    %699 = arith.negf %698 : vector<8x32xf32>
    %700 = math.exp %699 : vector<8x32xf32>
    %cst_104 = arith.constant 1.000000e+00 : f32
    %701 = vector.broadcast %cst_104 : f32 to vector<8x32xf32>
    %702 = arith.addf %701, %700 : vector<8x32xf32>
    %703 = arith.divf %701, %702 : vector<8x32xf32>
    %704 = arith.mulf %695, %674 : vector<8x32xf32>
    %705 = arith.mulf %689, %697 : vector<8x32xf32>
    %706 = arith.addf %704, %705 : vector<8x32xf32>
    %707 = math.tanh %706 : vector<8x32xf32>
    %708 = arith.mulf %703, %707 : vector<8x32xf32>
    %709 = vector.extract_strided_slice %708 {offsets = [0, 0], sizes = [4, 32], strides = [1, 1]} : vector<8x32xf32> to vector<4x32xf32>
    %710 = vector.extract_strided_slice %708 {offsets = [4, 0], sizes = [4, 32], strides = [1, 1]} : vector<8x32xf32> to vector<4x32xf32>
    %711 = tpu.concatenate %708, %708 in 1 : vector<8x32xf32>, vector<8x32xf32> -> vector<8x64xf32>
    %712 = arith.mulf %711, %11 : vector<8x64xf32>
    %713 = vector.extract_strided_slice %495 {offsets = [20, 0], sizes = [4, 128], strides = [1, 1]} : vector<48x256xf32> to vector<4x128xf32>
    %714 = vector.extract_strided_slice %495 {offsets = [24, 128], sizes = [4, 128], strides = [1, 1]} : vector<48x256xf32> to vector<4x128xf32>
    %715 = tpu.concatenate %713, %714 in 0 : vector<4x128xf32>, vector<4x128xf32> -> vector<8x128xf32>
    %cst_105 = arith.constant dense<0.000000e+00> : vector<8x128xf32>
    %716 = tpu.matmul %712, %496, %cst_105 {dimension_numbers = #tpu.dot_dimension_numbers<[1], [0], [0], [1], [0, 0, 1, 1], [], []>} : vector<8x64xf32>, vector<64x128xf32>, vector<8x128xf32> -> vector<8x128xf32>
    %717 = arith.addf %715, %716 : vector<8x128xf32>
    %718 = vector.extract_strided_slice %717 {offsets = [0, 0], sizes = [8, 32], strides = [1, 1]} : vector<8x128xf32> to vector<8x32xf32>
    %719 = arith.negf %718 : vector<8x32xf32>
    %720 = math.exp %719 : vector<8x32xf32>
    %cst_106 = arith.constant 1.000000e+00 : f32
    %721 = vector.broadcast %cst_106 : f32 to vector<8x32xf32>
    %722 = arith.addf %721, %720 : vector<8x32xf32>
    %723 = arith.divf %721, %722 : vector<8x32xf32>
    %724 = vector.extract_strided_slice %717 {offsets = [0, 32], sizes = [8, 32], strides = [1, 1]} : vector<8x128xf32> to vector<8x32xf32>
    %725 = arith.negf %724 : vector<8x32xf32>
    %726 = math.exp %725 : vector<8x32xf32>
    %cst_107 = arith.constant 1.000000e+00 : f32
    %727 = vector.broadcast %cst_107 : f32 to vector<8x32xf32>
    %728 = arith.addf %727, %726 : vector<8x32xf32>
    %729 = arith.divf %727, %728 : vector<8x32xf32>
    %730 = vector.extract_strided_slice %717 {offsets = [0, 64], sizes = [8, 32], strides = [1, 1]} : vector<8x128xf32> to vector<8x32xf32>
    %731 = math.tanh %730 : vector<8x32xf32>
    %732 = vector.extract_strided_slice %717 {offsets = [0, 96], sizes = [8, 32], strides = [1, 1]} : vector<8x128xf32> to vector<8x32xf32>
    %733 = arith.negf %732 : vector<8x32xf32>
    %734 = math.exp %733 : vector<8x32xf32>
    %cst_108 = arith.constant 1.000000e+00 : f32
    %735 = vector.broadcast %cst_108 : f32 to vector<8x32xf32>
    %736 = arith.addf %735, %734 : vector<8x32xf32>
    %737 = arith.divf %735, %736 : vector<8x32xf32>
    %738 = arith.mulf %729, %706 : vector<8x32xf32>
    %739 = arith.mulf %723, %731 : vector<8x32xf32>
    %740 = arith.addf %738, %739 : vector<8x32xf32>
    %741 = math.tanh %740 : vector<8x32xf32>
    %742 = arith.mulf %737, %741 : vector<8x32xf32>
    %743 = vector.extract_strided_slice %742 {offsets = [0, 0], sizes = [4, 32], strides = [1, 1]} : vector<8x32xf32> to vector<4x32xf32>
    %744 = vector.extract_strided_slice %742 {offsets = [4, 0], sizes = [4, 32], strides = [1, 1]} : vector<8x32xf32> to vector<4x32xf32>
    %745 = tpu.concatenate %742, %742 in 1 : vector<8x32xf32>, vector<8x32xf32> -> vector<8x64xf32>
    %746 = arith.mulf %745, %11 : vector<8x64xf32>
    %747 = vector.extract_strided_slice %495 {offsets = [24, 0], sizes = [4, 128], strides = [1, 1]} : vector<48x256xf32> to vector<4x128xf32>
    %748 = vector.extract_strided_slice %495 {offsets = [20, 128], sizes = [4, 128], strides = [1, 1]} : vector<48x256xf32> to vector<4x128xf32>
    %749 = tpu.concatenate %747, %748 in 0 : vector<4x128xf32>, vector<4x128xf32> -> vector<8x128xf32>
    %cst_109 = arith.constant dense<0.000000e+00> : vector<8x128xf32>
    %750 = tpu.matmul %746, %496, %cst_109 {dimension_numbers = #tpu.dot_dimension_numbers<[1], [0], [0], [1], [0, 0, 1, 1], [], []>} : vector<8x64xf32>, vector<64x128xf32>, vector<8x128xf32> -> vector<8x128xf32>
    %751 = arith.addf %749, %750 : vector<8x128xf32>
    %752 = vector.extract_strided_slice %751 {offsets = [0, 0], sizes = [8, 32], strides = [1, 1]} : vector<8x128xf32> to vector<8x32xf32>
    %753 = arith.negf %752 : vector<8x32xf32>
    %754 = math.exp %753 : vector<8x32xf32>
    %cst_110 = arith.constant 1.000000e+00 : f32
    %755 = vector.broadcast %cst_110 : f32 to vector<8x32xf32>
    %756 = arith.addf %755, %754 : vector<8x32xf32>
    %757 = arith.divf %755, %756 : vector<8x32xf32>
    %758 = vector.extract_strided_slice %751 {offsets = [0, 32], sizes = [8, 32], strides = [1, 1]} : vector<8x128xf32> to vector<8x32xf32>
    %759 = arith.negf %758 : vector<8x32xf32>
    %760 = math.exp %759 : vector<8x32xf32>
    %cst_111 = arith.constant 1.000000e+00 : f32
    %761 = vector.broadcast %cst_111 : f32 to vector<8x32xf32>
    %762 = arith.addf %761, %760 : vector<8x32xf32>
    %763 = arith.divf %761, %762 : vector<8x32xf32>
    %764 = vector.extract_strided_slice %751 {offsets = [0, 64], sizes = [8, 32], strides = [1, 1]} : vector<8x128xf32> to vector<8x32xf32>
    %765 = math.tanh %764 : vector<8x32xf32>
    %766 = vector.extract_strided_slice %751 {offsets = [0, 96], sizes = [8, 32], strides = [1, 1]} : vector<8x128xf32> to vector<8x32xf32>
    %767 = arith.negf %766 : vector<8x32xf32>
    %768 = math.exp %767 : vector<8x32xf32>
    %cst_112 = arith.constant 1.000000e+00 : f32
    %769 = vector.broadcast %cst_112 : f32 to vector<8x32xf32>
    %770 = arith.addf %769, %768 : vector<8x32xf32>
    %771 = arith.divf %769, %770 : vector<8x32xf32>
    %772 = arith.mulf %763, %740 : vector<8x32xf32>
    %773 = arith.mulf %757, %765 : vector<8x32xf32>
    %774 = arith.addf %772, %773 : vector<8x32xf32>
    %775 = math.tanh %774 : vector<8x32xf32>
    %776 = arith.mulf %771, %775 : vector<8x32xf32>
    %777 = vector.extract_strided_slice %776 {offsets = [0, 0], sizes = [4, 32], strides = [1, 1]} : vector<8x32xf32> to vector<4x32xf32>
    %778 = vector.extract_strided_slice %776 {offsets = [4, 0], sizes = [4, 32], strides = [1, 1]} : vector<8x32xf32> to vector<4x32xf32>
    %779 = tpu.concatenate %776, %776 in 1 : vector<8x32xf32>, vector<8x32xf32> -> vector<8x64xf32>
    %780 = arith.mulf %779, %11 : vector<8x64xf32>
    %781 = vector.extract_strided_slice %495 {offsets = [28, 0], sizes = [4, 128], strides = [1, 1]} : vector<48x256xf32> to vector<4x128xf32>
    %782 = vector.extract_strided_slice %495 {offsets = [16, 128], sizes = [4, 128], strides = [1, 1]} : vector<48x256xf32> to vector<4x128xf32>
    %783 = tpu.concatenate %781, %782 in 0 : vector<4x128xf32>, vector<4x128xf32> -> vector<8x128xf32>
    %cst_113 = arith.constant dense<0.000000e+00> : vector<8x128xf32>
    %784 = tpu.matmul %780, %496, %cst_113 {dimension_numbers = #tpu.dot_dimension_numbers<[1], [0], [0], [1], [0, 0, 1, 1], [], []>} : vector<8x64xf32>, vector<64x128xf32>, vector<8x128xf32> -> vector<8x128xf32>
    %785 = arith.addf %783, %784 : vector<8x128xf32>
    %786 = vector.extract_strided_slice %785 {offsets = [0, 0], sizes = [8, 32], strides = [1, 1]} : vector<8x128xf32> to vector<8x32xf32>
    %787 = arith.negf %786 : vector<8x32xf32>
    %788 = math.exp %787 : vector<8x32xf32>
    %cst_114 = arith.constant 1.000000e+00 : f32
    %789 = vector.broadcast %cst_114 : f32 to vector<8x32xf32>
    %790 = arith.addf %789, %788 : vector<8x32xf32>
    %791 = arith.divf %789, %790 : vector<8x32xf32>
    %792 = vector.extract_strided_slice %785 {offsets = [0, 32], sizes = [8, 32], strides = [1, 1]} : vector<8x128xf32> to vector<8x32xf32>
    %793 = arith.negf %792 : vector<8x32xf32>
    %794 = math.exp %793 : vector<8x32xf32>
    %cst_115 = arith.constant 1.000000e+00 : f32
    %795 = vector.broadcast %cst_115 : f32 to vector<8x32xf32>
    %796 = arith.addf %795, %794 : vector<8x32xf32>
    %797 = arith.divf %795, %796 : vector<8x32xf32>
    %798 = vector.extract_strided_slice %785 {offsets = [0, 64], sizes = [8, 32], strides = [1, 1]} : vector<8x128xf32> to vector<8x32xf32>
    %799 = math.tanh %798 : vector<8x32xf32>
    %800 = vector.extract_strided_slice %785 {offsets = [0, 96], sizes = [8, 32], strides = [1, 1]} : vector<8x128xf32> to vector<8x32xf32>
    %801 = arith.negf %800 : vector<8x32xf32>
    %802 = math.exp %801 : vector<8x32xf32>
    %cst_116 = arith.constant 1.000000e+00 : f32
    %803 = vector.broadcast %cst_116 : f32 to vector<8x32xf32>
    %804 = arith.addf %803, %802 : vector<8x32xf32>
    %805 = arith.divf %803, %804 : vector<8x32xf32>
    %806 = arith.mulf %797, %774 : vector<8x32xf32>
    %807 = arith.mulf %791, %799 : vector<8x32xf32>
    %808 = arith.addf %806, %807 : vector<8x32xf32>
    %809 = math.tanh %808 : vector<8x32xf32>
    %810 = arith.mulf %805, %809 : vector<8x32xf32>
    %811 = vector.extract_strided_slice %810 {offsets = [0, 0], sizes = [4, 32], strides = [1, 1]} : vector<8x32xf32> to vector<4x32xf32>
    %812 = vector.extract_strided_slice %810 {offsets = [4, 0], sizes = [4, 32], strides = [1, 1]} : vector<8x32xf32> to vector<4x32xf32>
    %813 = tpu.concatenate %810, %810 in 1 : vector<8x32xf32>, vector<8x32xf32> -> vector<8x64xf32>
    %814 = arith.mulf %813, %11 : vector<8x64xf32>
    %815 = vector.extract_strided_slice %495 {offsets = [32, 0], sizes = [4, 128], strides = [1, 1]} : vector<48x256xf32> to vector<4x128xf32>
    %816 = vector.extract_strided_slice %495 {offsets = [12, 128], sizes = [4, 128], strides = [1, 1]} : vector<48x256xf32> to vector<4x128xf32>
    %817 = tpu.concatenate %815, %816 in 0 : vector<4x128xf32>, vector<4x128xf32> -> vector<8x128xf32>
    %cst_117 = arith.constant dense<0.000000e+00> : vector<8x128xf32>
    %818 = tpu.matmul %814, %496, %cst_117 {dimension_numbers = #tpu.dot_dimension_numbers<[1], [0], [0], [1], [0, 0, 1, 1], [], []>} : vector<8x64xf32>, vector<64x128xf32>, vector<8x128xf32> -> vector<8x128xf32>
    %819 = arith.addf %817, %818 : vector<8x128xf32>
    %820 = vector.extract_strided_slice %819 {offsets = [0, 0], sizes = [8, 32], strides = [1, 1]} : vector<8x128xf32> to vector<8x32xf32>
    %821 = arith.negf %820 : vector<8x32xf32>
    %822 = math.exp %821 : vector<8x32xf32>
    %cst_118 = arith.constant 1.000000e+00 : f32
    %823 = vector.broadcast %cst_118 : f32 to vector<8x32xf32>
    %824 = arith.addf %823, %822 : vector<8x32xf32>
    %825 = arith.divf %823, %824 : vector<8x32xf32>
    %826 = vector.extract_strided_slice %819 {offsets = [0, 32], sizes = [8, 32], strides = [1, 1]} : vector<8x128xf32> to vector<8x32xf32>
    %827 = arith.negf %826 : vector<8x32xf32>
    %828 = math.exp %827 : vector<8x32xf32>
    %cst_119 = arith.constant 1.000000e+00 : f32
    %829 = vector.broadcast %cst_119 : f32 to vector<8x32xf32>
    %830 = arith.addf %829, %828 : vector<8x32xf32>
    %831 = arith.divf %829, %830 : vector<8x32xf32>
    %832 = vector.extract_strided_slice %819 {offsets = [0, 64], sizes = [8, 32], strides = [1, 1]} : vector<8x128xf32> to vector<8x32xf32>
    %833 = math.tanh %832 : vector<8x32xf32>
    %834 = vector.extract_strided_slice %819 {offsets = [0, 96], sizes = [8, 32], strides = [1, 1]} : vector<8x128xf32> to vector<8x32xf32>
    %835 = arith.negf %834 : vector<8x32xf32>
    %836 = math.exp %835 : vector<8x32xf32>
    %cst_120 = arith.constant 1.000000e+00 : f32
    %837 = vector.broadcast %cst_120 : f32 to vector<8x32xf32>
    %838 = arith.addf %837, %836 : vector<8x32xf32>
    %839 = arith.divf %837, %838 : vector<8x32xf32>
    %840 = arith.mulf %831, %808 : vector<8x32xf32>
    %841 = arith.mulf %825, %833 : vector<8x32xf32>
    %842 = arith.addf %840, %841 : vector<8x32xf32>
    %843 = math.tanh %842 : vector<8x32xf32>
    %844 = arith.mulf %839, %843 : vector<8x32xf32>
    %845 = vector.extract_strided_slice %844 {offsets = [0, 0], sizes = [4, 32], strides = [1, 1]} : vector<8x32xf32> to vector<4x32xf32>
    %846 = vector.extract_strided_slice %844 {offsets = [4, 0], sizes = [4, 32], strides = [1, 1]} : vector<8x32xf32> to vector<4x32xf32>
    %847 = tpu.concatenate %844, %844 in 1 : vector<8x32xf32>, vector<8x32xf32> -> vector<8x64xf32>
    %848 = arith.mulf %847, %11 : vector<8x64xf32>
    %849 = vector.extract_strided_slice %495 {offsets = [36, 0], sizes = [4, 128], strides = [1, 1]} : vector<48x256xf32> to vector<4x128xf32>
    %850 = vector.extract_strided_slice %495 {offsets = [8, 128], sizes = [4, 128], strides = [1, 1]} : vector<48x256xf32> to vector<4x128xf32>
    %851 = tpu.concatenate %849, %850 in 0 : vector<4x128xf32>, vector<4x128xf32> -> vector<8x128xf32>
    %cst_121 = arith.constant dense<0.000000e+00> : vector<8x128xf32>
    %852 = tpu.matmul %848, %496, %cst_121 {dimension_numbers = #tpu.dot_dimension_numbers<[1], [0], [0], [1], [0, 0, 1, 1], [], []>} : vector<8x64xf32>, vector<64x128xf32>, vector<8x128xf32> -> vector<8x128xf32>
    %853 = arith.addf %851, %852 : vector<8x128xf32>
    %854 = vector.extract_strided_slice %853 {offsets = [0, 0], sizes = [8, 32], strides = [1, 1]} : vector<8x128xf32> to vector<8x32xf32>
    %855 = arith.negf %854 : vector<8x32xf32>
    %856 = math.exp %855 : vector<8x32xf32>
    %cst_122 = arith.constant 1.000000e+00 : f32
    %857 = vector.broadcast %cst_122 : f32 to vector<8x32xf32>
    %858 = arith.addf %857, %856 : vector<8x32xf32>
    %859 = arith.divf %857, %858 : vector<8x32xf32>
    %860 = vector.extract_strided_slice %853 {offsets = [0, 32], sizes = [8, 32], strides = [1, 1]} : vector<8x128xf32> to vector<8x32xf32>
    %861 = arith.negf %860 : vector<8x32xf32>
    %862 = math.exp %861 : vector<8x32xf32>
    %cst_123 = arith.constant 1.000000e+00 : f32
    %863 = vector.broadcast %cst_123 : f32 to vector<8x32xf32>
    %864 = arith.addf %863, %862 : vector<8x32xf32>
    %865 = arith.divf %863, %864 : vector<8x32xf32>
    %866 = vector.extract_strided_slice %853 {offsets = [0, 64], sizes = [8, 32], strides = [1, 1]} : vector<8x128xf32> to vector<8x32xf32>
    %867 = math.tanh %866 : vector<8x32xf32>
    %868 = vector.extract_strided_slice %853 {offsets = [0, 96], sizes = [8, 32], strides = [1, 1]} : vector<8x128xf32> to vector<8x32xf32>
    %869 = arith.negf %868 : vector<8x32xf32>
    %870 = math.exp %869 : vector<8x32xf32>
    %cst_124 = arith.constant 1.000000e+00 : f32
    %871 = vector.broadcast %cst_124 : f32 to vector<8x32xf32>
    %872 = arith.addf %871, %870 : vector<8x32xf32>
    %873 = arith.divf %871, %872 : vector<8x32xf32>
    %874 = arith.mulf %865, %842 : vector<8x32xf32>
    %875 = arith.mulf %859, %867 : vector<8x32xf32>
    %876 = arith.addf %874, %875 : vector<8x32xf32>
    %877 = math.tanh %876 : vector<8x32xf32>
    %878 = arith.mulf %873, %877 : vector<8x32xf32>
    %879 = vector.extract_strided_slice %878 {offsets = [0, 0], sizes = [4, 32], strides = [1, 1]} : vector<8x32xf32> to vector<4x32xf32>
    %880 = vector.extract_strided_slice %878 {offsets = [4, 0], sizes = [4, 32], strides = [1, 1]} : vector<8x32xf32> to vector<4x32xf32>
    %881 = tpu.concatenate %878, %878 in 1 : vector<8x32xf32>, vector<8x32xf32> -> vector<8x64xf32>
    %882 = arith.mulf %881, %11 : vector<8x64xf32>
    %883 = vector.extract_strided_slice %495 {offsets = [40, 0], sizes = [4, 128], strides = [1, 1]} : vector<48x256xf32> to vector<4x128xf32>
    %884 = vector.extract_strided_slice %495 {offsets = [4, 128], sizes = [4, 128], strides = [1, 1]} : vector<48x256xf32> to vector<4x128xf32>
    %885 = tpu.concatenate %883, %884 in 0 : vector<4x128xf32>, vector<4x128xf32> -> vector<8x128xf32>
    %cst_125 = arith.constant dense<0.000000e+00> : vector<8x128xf32>
    %886 = tpu.matmul %882, %496, %cst_125 {dimension_numbers = #tpu.dot_dimension_numbers<[1], [0], [0], [1], [0, 0, 1, 1], [], []>} : vector<8x64xf32>, vector<64x128xf32>, vector<8x128xf32> -> vector<8x128xf32>
    %887 = arith.addf %885, %886 : vector<8x128xf32>
    %888 = vector.extract_strided_slice %887 {offsets = [0, 0], sizes = [8, 32], strides = [1, 1]} : vector<8x128xf32> to vector<8x32xf32>
    %889 = arith.negf %888 : vector<8x32xf32>
    %890 = math.exp %889 : vector<8x32xf32>
    %cst_126 = arith.constant 1.000000e+00 : f32
    %891 = vector.broadcast %cst_126 : f32 to vector<8x32xf32>
    %892 = arith.addf %891, %890 : vector<8x32xf32>
    %893 = arith.divf %891, %892 : vector<8x32xf32>
    %894 = vector.extract_strided_slice %887 {offsets = [0, 32], sizes = [8, 32], strides = [1, 1]} : vector<8x128xf32> to vector<8x32xf32>
    %895 = arith.negf %894 : vector<8x32xf32>
    %896 = math.exp %895 : vector<8x32xf32>
    %cst_127 = arith.constant 1.000000e+00 : f32
    %897 = vector.broadcast %cst_127 : f32 to vector<8x32xf32>
    %898 = arith.addf %897, %896 : vector<8x32xf32>
    %899 = arith.divf %897, %898 : vector<8x32xf32>
    %900 = vector.extract_strided_slice %887 {offsets = [0, 64], sizes = [8, 32], strides = [1, 1]} : vector<8x128xf32> to vector<8x32xf32>
    %901 = math.tanh %900 : vector<8x32xf32>
    %902 = vector.extract_strided_slice %887 {offsets = [0, 96], sizes = [8, 32], strides = [1, 1]} : vector<8x128xf32> to vector<8x32xf32>
    %903 = arith.negf %902 : vector<8x32xf32>
    %904 = math.exp %903 : vector<8x32xf32>
    %cst_128 = arith.constant 1.000000e+00 : f32
    %905 = vector.broadcast %cst_128 : f32 to vector<8x32xf32>
    %906 = arith.addf %905, %904 : vector<8x32xf32>
    %907 = arith.divf %905, %906 : vector<8x32xf32>
    %908 = arith.mulf %899, %876 : vector<8x32xf32>
    %909 = arith.mulf %893, %901 : vector<8x32xf32>
    %910 = arith.addf %908, %909 : vector<8x32xf32>
    %911 = math.tanh %910 : vector<8x32xf32>
    %912 = arith.mulf %907, %911 : vector<8x32xf32>
    %913 = vector.extract_strided_slice %912 {offsets = [0, 0], sizes = [4, 32], strides = [1, 1]} : vector<8x32xf32> to vector<4x32xf32>
    %914 = vector.extract_strided_slice %912 {offsets = [4, 0], sizes = [4, 32], strides = [1, 1]} : vector<8x32xf32> to vector<4x32xf32>
    %915 = tpu.concatenate %912, %912 in 1 : vector<8x32xf32>, vector<8x32xf32> -> vector<8x64xf32>
    %916 = arith.mulf %915, %11 : vector<8x64xf32>
    %917 = vector.extract_strided_slice %495 {offsets = [44, 0], sizes = [4, 128], strides = [1, 1]} : vector<48x256xf32> to vector<4x128xf32>
    %918 = vector.extract_strided_slice %495 {offsets = [0, 128], sizes = [4, 128], strides = [1, 1]} : vector<48x256xf32> to vector<4x128xf32>
    %919 = tpu.concatenate %917, %918 in 0 : vector<4x128xf32>, vector<4x128xf32> -> vector<8x128xf32>
    %cst_129 = arith.constant dense<0.000000e+00> : vector<8x128xf32>
    %920 = tpu.matmul %916, %496, %cst_129 {dimension_numbers = #tpu.dot_dimension_numbers<[1], [0], [0], [1], [0, 0, 1, 1], [], []>} : vector<8x64xf32>, vector<64x128xf32>, vector<8x128xf32> -> vector<8x128xf32>
    %921 = arith.addf %919, %920 : vector<8x128xf32>
    %922 = vector.extract_strided_slice %921 {offsets = [0, 0], sizes = [8, 32], strides = [1, 1]} : vector<8x128xf32> to vector<8x32xf32>
    %923 = arith.negf %922 : vector<8x32xf32>
    %924 = math.exp %923 : vector<8x32xf32>
    %cst_130 = arith.constant 1.000000e+00 : f32
    %925 = vector.broadcast %cst_130 : f32 to vector<8x32xf32>
    %926 = arith.addf %925, %924 : vector<8x32xf32>
    %927 = arith.divf %925, %926 : vector<8x32xf32>
    %928 = vector.extract_strided_slice %921 {offsets = [0, 32], sizes = [8, 32], strides = [1, 1]} : vector<8x128xf32> to vector<8x32xf32>
    %929 = arith.negf %928 : vector<8x32xf32>
    %930 = math.exp %929 : vector<8x32xf32>
    %cst_131 = arith.constant 1.000000e+00 : f32
    %931 = vector.broadcast %cst_131 : f32 to vector<8x32xf32>
    %932 = arith.addf %931, %930 : vector<8x32xf32>
    %933 = arith.divf %931, %932 : vector<8x32xf32>
    %934 = vector.extract_strided_slice %921 {offsets = [0, 64], sizes = [8, 32], strides = [1, 1]} : vector<8x128xf32> to vector<8x32xf32>
    %935 = math.tanh %934 : vector<8x32xf32>
    %936 = vector.extract_strided_slice %921 {offsets = [0, 96], sizes = [8, 32], strides = [1, 1]} : vector<8x128xf32> to vector<8x32xf32>
    %937 = arith.negf %936 : vector<8x32xf32>
    %938 = math.exp %937 : vector<8x32xf32>
    %cst_132 = arith.constant 1.000000e+00 : f32
    %939 = vector.broadcast %cst_132 : f32 to vector<8x32xf32>
    %940 = arith.addf %939, %938 : vector<8x32xf32>
    %941 = arith.divf %939, %940 : vector<8x32xf32>
    %942 = arith.mulf %933, %910 : vector<8x32xf32>
    %943 = arith.mulf %927, %935 : vector<8x32xf32>
    %944 = arith.addf %942, %943 : vector<8x32xf32>
    %945 = math.tanh %944 : vector<8x32xf32>
    %946 = arith.mulf %941, %945 : vector<8x32xf32>
    %947 = vector.extract_strided_slice %946 {offsets = [0, 0], sizes = [4, 32], strides = [1, 1]} : vector<8x32xf32> to vector<4x32xf32>
    %948 = vector.extract_strided_slice %946 {offsets = [4, 0], sizes = [4, 32], strides = [1, 1]} : vector<8x32xf32> to vector<4x32xf32>
    %949 = tpu.concatenate %540, %948 in 1 : vector<4x32xf32>, vector<4x32xf32> -> vector<4x64xf32>
    %950 = tpu.concatenate %585, %914 in 1 : vector<4x32xf32>, vector<4x32xf32> -> vector<4x64xf32>
    %951 = tpu.concatenate %630, %880 in 1 : vector<4x32xf32>, vector<4x32xf32> -> vector<4x64xf32>
    %952 = tpu.concatenate %675, %846 in 1 : vector<4x32xf32>, vector<4x32xf32> -> vector<4x64xf32>
    %953 = tpu.concatenate %709, %812 in 1 : vector<4x32xf32>, vector<4x32xf32> -> vector<4x64xf32>
    %954 = tpu.concatenate %743, %778 in 1 : vector<4x32xf32>, vector<4x32xf32> -> vector<4x64xf32>
    %955 = tpu.concatenate %777, %744 in 1 : vector<4x32xf32>, vector<4x32xf32> -> vector<4x64xf32>
    %956 = tpu.concatenate %811, %710 in 1 : vector<4x32xf32>, vector<4x32xf32> -> vector<4x64xf32>
    %957 = tpu.concatenate %845, %676 in 1 : vector<4x32xf32>, vector<4x32xf32> -> vector<4x64xf32>
    %958 = tpu.concatenate %879, %631 in 1 : vector<4x32xf32>, vector<4x32xf32> -> vector<4x64xf32>
    %959 = tpu.concatenate %913, %586 in 1 : vector<4x32xf32>, vector<4x32xf32> -> vector<4x64xf32>
    %960 = tpu.concatenate %947, %541 in 1 : vector<4x32xf32>, vector<4x32xf32> -> vector<4x64xf32>
    %961 = tpu.concatenate %949, %950, %951, %952, %953, %954, %955, %956, %957, %958, %959, %960 in 0 : vector<4x64xf32>, vector<4x64xf32>, vector<4x64xf32>, vector<4x64xf32>, vector<4x64xf32>, vector<4x64xf32>, vector<4x64xf32>, vector<4x64xf32>, vector<4x64xf32>, vector<4x64xf32>, vector<4x64xf32>, vector<4x64xf32> -> vector<48x64xf32>
    %c0_133 = arith.constant 0 : index
    %c0_134 = arith.constant 0 : index
    %962 = vector.load %arg9[%c0_133, %c0_134] : memref<64x32xf32, #tpu.memory_space<vmem>>, vector<64x32xf32>
    %cst_135 = arith.constant dense<0.000000e+00> : vector<48x32xf32>
    %963 = tpu.matmul %961, %962, %cst_135 {dimension_numbers = #tpu.dot_dimension_numbers<[1], [0], [0], [1], [0, 0, 1, 1], [], []>} : vector<48x64xf32>, vector<64x32xf32>, vector<48x32xf32> -> vector<48x32xf32>
    %964 = math.tanh %963 : vector<48x32xf32>
    %c0_136 = arith.constant 0 : index
    %c0_137 = arith.constant 0 : index
    %965 = vector.load %arg10[%c0_136, %c0_137] : memref<1x32xf32, #tpu.memory_space<vmem>>, vector<1x32xf32>
    %966 = vector.extract_strided_slice %964 {offsets = [0, 0], sizes = [4, 32], strides = [1, 1]} : vector<48x32xf32> to vector<4x32xf32>
    %967 = vector.broadcast %965 : vector<1x32xf32> to vector<4x32xf32>
    %968 = arith.mulf %966, %967 : vector<4x32xf32>
    %cst_138 = arith.constant dense<0.000000e+00> : vector<4xf32>
    %969 = vector.multi_reduction <add>, %968, %cst_138 [1] : vector<4x32xf32> to vector<4xf32>
    %970 = vector.shape_cast %969 : vector<4xf32> to vector<4x1xf32>
    %971 = vector.extract_strided_slice %964 {offsets = [4, 0], sizes = [4, 32], strides = [1, 1]} : vector<48x32xf32> to vector<4x32xf32>
    %972 = vector.broadcast %965 : vector<1x32xf32> to vector<4x32xf32>
    %973 = arith.mulf %971, %972 : vector<4x32xf32>
    %cst_139 = arith.constant dense<0.000000e+00> : vector<4xf32>
    %974 = vector.multi_reduction <add>, %973, %cst_139 [1] : vector<4x32xf32> to vector<4xf32>
    %975 = vector.shape_cast %974 : vector<4xf32> to vector<4x1xf32>
    %976 = vector.extract_strided_slice %964 {offsets = [8, 0], sizes = [4, 32], strides = [1, 1]} : vector<48x32xf32> to vector<4x32xf32>
    %977 = vector.broadcast %965 : vector<1x32xf32> to vector<4x32xf32>
    %978 = arith.mulf %976, %977 : vector<4x32xf32>
    %cst_140 = arith.constant dense<0.000000e+00> : vector<4xf32>
    %979 = vector.multi_reduction <add>, %978, %cst_140 [1] : vector<4x32xf32> to vector<4xf32>
    %980 = vector.shape_cast %979 : vector<4xf32> to vector<4x1xf32>
    %981 = vector.extract_strided_slice %964 {offsets = [12, 0], sizes = [4, 32], strides = [1, 1]} : vector<48x32xf32> to vector<4x32xf32>
    %982 = vector.broadcast %965 : vector<1x32xf32> to vector<4x32xf32>
    %983 = arith.mulf %981, %982 : vector<4x32xf32>
    %cst_141 = arith.constant dense<0.000000e+00> : vector<4xf32>
    %984 = vector.multi_reduction <add>, %983, %cst_141 [1] : vector<4x32xf32> to vector<4xf32>
    %985 = vector.shape_cast %984 : vector<4xf32> to vector<4x1xf32>
    %986 = vector.extract_strided_slice %964 {offsets = [16, 0], sizes = [4, 32], strides = [1, 1]} : vector<48x32xf32> to vector<4x32xf32>
    %987 = vector.broadcast %965 : vector<1x32xf32> to vector<4x32xf32>
    %988 = arith.mulf %986, %987 : vector<4x32xf32>
    %cst_142 = arith.constant dense<0.000000e+00> : vector<4xf32>
    %989 = vector.multi_reduction <add>, %988, %cst_142 [1] : vector<4x32xf32> to vector<4xf32>
    %990 = vector.shape_cast %989 : vector<4xf32> to vector<4x1xf32>
    %991 = vector.extract_strided_slice %964 {offsets = [20, 0], sizes = [4, 32], strides = [1, 1]} : vector<48x32xf32> to vector<4x32xf32>
    %992 = vector.broadcast %965 : vector<1x32xf32> to vector<4x32xf32>
    %993 = arith.mulf %991, %992 : vector<4x32xf32>
    %cst_143 = arith.constant dense<0.000000e+00> : vector<4xf32>
    %994 = vector.multi_reduction <add>, %993, %cst_143 [1] : vector<4x32xf32> to vector<4xf32>
    %995 = vector.shape_cast %994 : vector<4xf32> to vector<4x1xf32>
    %996 = vector.extract_strided_slice %964 {offsets = [24, 0], sizes = [4, 32], strides = [1, 1]} : vector<48x32xf32> to vector<4x32xf32>
    %997 = vector.broadcast %965 : vector<1x32xf32> to vector<4x32xf32>
    %998 = arith.mulf %996, %997 : vector<4x32xf32>
    %cst_144 = arith.constant dense<0.000000e+00> : vector<4xf32>
    %999 = vector.multi_reduction <add>, %998, %cst_144 [1] : vector<4x32xf32> to vector<4xf32>
    %1000 = vector.shape_cast %999 : vector<4xf32> to vector<4x1xf32>
    %1001 = vector.extract_strided_slice %964 {offsets = [28, 0], sizes = [4, 32], strides = [1, 1]} : vector<48x32xf32> to vector<4x32xf32>
    %1002 = vector.broadcast %965 : vector<1x32xf32> to vector<4x32xf32>
    %1003 = arith.mulf %1001, %1002 : vector<4x32xf32>
    %cst_145 = arith.constant dense<0.000000e+00> : vector<4xf32>
    %1004 = vector.multi_reduction <add>, %1003, %cst_145 [1] : vector<4x32xf32> to vector<4xf32>
    %1005 = vector.shape_cast %1004 : vector<4xf32> to vector<4x1xf32>
    %1006 = vector.extract_strided_slice %964 {offsets = [32, 0], sizes = [4, 32], strides = [1, 1]} : vector<48x32xf32> to vector<4x32xf32>
    %1007 = vector.broadcast %965 : vector<1x32xf32> to vector<4x32xf32>
    %1008 = arith.mulf %1006, %1007 : vector<4x32xf32>
    %cst_146 = arith.constant dense<0.000000e+00> : vector<4xf32>
    %1009 = vector.multi_reduction <add>, %1008, %cst_146 [1] : vector<4x32xf32> to vector<4xf32>
    %1010 = vector.shape_cast %1009 : vector<4xf32> to vector<4x1xf32>
    %c2_i32 = arith.constant 2 : i32
    %1011 = vector.broadcast %c2_i32 : i32 to vector<4x1xi32>
    %1012 = arith.cmpi slt, %1, %1011 : vector<4x1xi32>
    %cst_147 = arith.constant -1.000000e+30 : f32
    %cst_148 = arith.constant 0.000000e+00 : f32
    %1013 = vector.broadcast %cst_147 : f32 to vector<4x1xf32>
    %1014 = vector.broadcast %cst_148 : f32 to vector<4x1xf32>
    %1015 = arith.select %1012, %1013, %1014 : vector<4x1xi1>, vector<4x1xf32>
    %1016 = arith.addf %1010, %1015 : vector<4x1xf32>
    %1017 = vector.extract_strided_slice %964 {offsets = [36, 0], sizes = [4, 32], strides = [1, 1]} : vector<48x32xf32> to vector<4x32xf32>
    %1018 = vector.broadcast %965 : vector<1x32xf32> to vector<4x32xf32>
    %1019 = arith.mulf %1017, %1018 : vector<4x32xf32>
    %cst_149 = arith.constant dense<0.000000e+00> : vector<4xf32>
    %1020 = vector.multi_reduction <add>, %1019, %cst_149 [1] : vector<4x32xf32> to vector<4xf32>
    %1021 = vector.shape_cast %1020 : vector<4xf32> to vector<4x1xf32>
    %c2_i32_150 = arith.constant 2 : i32
    %1022 = vector.broadcast %c2_i32_150 : i32 to vector<4x1xi32>
    %1023 = arith.cmpi slt, %1, %1022 : vector<4x1xi32>
    %cst_151 = arith.constant -1.000000e+30 : f32
    %cst_152 = arith.constant 0.000000e+00 : f32
    %1024 = vector.broadcast %cst_151 : f32 to vector<4x1xf32>
    %1025 = vector.broadcast %cst_152 : f32 to vector<4x1xf32>
    %1026 = arith.select %1023, %1024, %1025 : vector<4x1xi1>, vector<4x1xf32>
    %1027 = arith.addf %1021, %1026 : vector<4x1xf32>
    %1028 = vector.extract_strided_slice %964 {offsets = [40, 0], sizes = [4, 32], strides = [1, 1]} : vector<48x32xf32> to vector<4x32xf32>
    %1029 = vector.broadcast %965 : vector<1x32xf32> to vector<4x32xf32>
    %1030 = arith.mulf %1028, %1029 : vector<4x32xf32>
    %cst_153 = arith.constant dense<0.000000e+00> : vector<4xf32>
    %1031 = vector.multi_reduction <add>, %1030, %cst_153 [1] : vector<4x32xf32> to vector<4xf32>
    %1032 = vector.shape_cast %1031 : vector<4xf32> to vector<4x1xf32>
    %c2_i32_154 = arith.constant 2 : i32
    %1033 = vector.broadcast %c2_i32_154 : i32 to vector<4x1xi32>
    %1034 = arith.cmpi slt, %1, %1033 : vector<4x1xi32>
    %cst_155 = arith.constant -1.000000e+30 : f32
    %cst_156 = arith.constant 0.000000e+00 : f32
    %1035 = vector.broadcast %cst_155 : f32 to vector<4x1xf32>
    %1036 = vector.broadcast %cst_156 : f32 to vector<4x1xf32>
    %1037 = arith.select %1034, %1035, %1036 : vector<4x1xi1>, vector<4x1xf32>
    %1038 = arith.addf %1032, %1037 : vector<4x1xf32>
    %1039 = vector.extract_strided_slice %964 {offsets = [44, 0], sizes = [4, 32], strides = [1, 1]} : vector<48x32xf32> to vector<4x32xf32>
    %1040 = vector.broadcast %965 : vector<1x32xf32> to vector<4x32xf32>
    %1041 = arith.mulf %1039, %1040 : vector<4x32xf32>
    %cst_157 = arith.constant dense<0.000000e+00> : vector<4xf32>
    %1042 = vector.multi_reduction <add>, %1041, %cst_157 [1] : vector<4x32xf32> to vector<4xf32>
    %1043 = vector.shape_cast %1042 : vector<4xf32> to vector<4x1xf32>
    %c2_i32_158 = arith.constant 2 : i32
    %1044 = vector.broadcast %c2_i32_158 : i32 to vector<4x1xi32>
    %1045 = arith.cmpi slt, %1, %1044 : vector<4x1xi32>
    %cst_159 = arith.constant -1.000000e+30 : f32
    %cst_160 = arith.constant 0.000000e+00 : f32
    %1046 = vector.broadcast %cst_159 : f32 to vector<4x1xf32>
    %1047 = vector.broadcast %cst_160 : f32 to vector<4x1xf32>
    %1048 = arith.select %1045, %1046, %1047 : vector<4x1xi1>, vector<4x1xf32>
    %1049 = arith.addf %1043, %1048 : vector<4x1xf32>
    %1050 = arith.maximumf %970, %975 : vector<4x1xf32>
    %1051 = arith.maximumf %1050, %980 : vector<4x1xf32>
    %1052 = arith.maximumf %1051, %985 : vector<4x1xf32>
    %1053 = arith.maximumf %1052, %990 : vector<4x1xf32>
    %1054 = arith.maximumf %1053, %995 : vector<4x1xf32>
    %1055 = arith.maximumf %1054, %1000 : vector<4x1xf32>
    %1056 = arith.maximumf %1055, %1005 : vector<4x1xf32>
    %1057 = arith.maximumf %1056, %1016 : vector<4x1xf32>
    %1058 = arith.maximumf %1057, %1027 : vector<4x1xf32>
    %1059 = arith.maximumf %1058, %1038 : vector<4x1xf32>
    %1060 = arith.maximumf %1059, %1049 : vector<4x1xf32>
    %cst_161 = arith.constant 0.000000e+00 : f32
    %1061 = vector.broadcast %cst_161 : f32 to vector<4x64xf32>
    %cst_162 = arith.constant 0.000000e+00 : f32
    %1062 = vector.broadcast %cst_162 : f32 to vector<4x1xf32>
    %1063 = arith.subf %970, %1060 : vector<4x1xf32>
    %1064 = math.exp %1063 : vector<4x1xf32>
    %1065 = arith.addf %1062, %1064 : vector<4x1xf32>
    %1066 = vector.broadcast %1064 : vector<4x1xf32> to vector<4x64xf32>
    %1067 = arith.mulf %1066, %949 : vector<4x64xf32>
    %1068 = arith.addf %1061, %1067 : vector<4x64xf32>
    %1069 = arith.subf %975, %1060 : vector<4x1xf32>
    %1070 = math.exp %1069 : vector<4x1xf32>
    %1071 = arith.addf %1065, %1070 : vector<4x1xf32>
    %1072 = vector.broadcast %1070 : vector<4x1xf32> to vector<4x64xf32>
    %1073 = arith.mulf %1072, %950 : vector<4x64xf32>
    %1074 = arith.addf %1068, %1073 : vector<4x64xf32>
    %1075 = arith.subf %980, %1060 : vector<4x1xf32>
    %1076 = math.exp %1075 : vector<4x1xf32>
    %1077 = arith.addf %1071, %1076 : vector<4x1xf32>
    %1078 = vector.broadcast %1076 : vector<4x1xf32> to vector<4x64xf32>
    %1079 = arith.mulf %1078, %951 : vector<4x64xf32>
    %1080 = arith.addf %1074, %1079 : vector<4x64xf32>
    %1081 = arith.subf %985, %1060 : vector<4x1xf32>
    %1082 = math.exp %1081 : vector<4x1xf32>
    %1083 = arith.addf %1077, %1082 : vector<4x1xf32>
    %1084 = vector.broadcast %1082 : vector<4x1xf32> to vector<4x64xf32>
    %1085 = arith.mulf %1084, %952 : vector<4x64xf32>
    %1086 = arith.addf %1080, %1085 : vector<4x64xf32>
    %1087 = arith.subf %990, %1060 : vector<4x1xf32>
    %1088 = math.exp %1087 : vector<4x1xf32>
    %1089 = arith.addf %1083, %1088 : vector<4x1xf32>
    %1090 = vector.broadcast %1088 : vector<4x1xf32> to vector<4x64xf32>
    %1091 = arith.mulf %1090, %953 : vector<4x64xf32>
    %1092 = arith.addf %1086, %1091 : vector<4x64xf32>
    %1093 = arith.subf %995, %1060 : vector<4x1xf32>
    %1094 = math.exp %1093 : vector<4x1xf32>
    %1095 = arith.addf %1089, %1094 : vector<4x1xf32>
    %1096 = vector.broadcast %1094 : vector<4x1xf32> to vector<4x64xf32>
    %1097 = arith.mulf %1096, %954 : vector<4x64xf32>
    %1098 = arith.addf %1092, %1097 : vector<4x64xf32>
    %1099 = arith.subf %1000, %1060 : vector<4x1xf32>
    %1100 = math.exp %1099 : vector<4x1xf32>
    %1101 = arith.addf %1095, %1100 : vector<4x1xf32>
    %1102 = vector.broadcast %1100 : vector<4x1xf32> to vector<4x64xf32>
    %1103 = arith.mulf %1102, %955 : vector<4x64xf32>
    %1104 = arith.addf %1098, %1103 : vector<4x64xf32>
    %1105 = arith.subf %1005, %1060 : vector<4x1xf32>
    %1106 = math.exp %1105 : vector<4x1xf32>
    %1107 = arith.addf %1101, %1106 : vector<4x1xf32>
    %1108 = vector.broadcast %1106 : vector<4x1xf32> to vector<4x64xf32>
    %1109 = arith.mulf %1108, %956 : vector<4x64xf32>
    %1110 = arith.addf %1104, %1109 : vector<4x64xf32>
    %1111 = arith.subf %1016, %1060 : vector<4x1xf32>
    %1112 = math.exp %1111 : vector<4x1xf32>
    %1113 = arith.addf %1107, %1112 : vector<4x1xf32>
    %1114 = vector.broadcast %1112 : vector<4x1xf32> to vector<4x64xf32>
    %1115 = arith.mulf %1114, %957 : vector<4x64xf32>
    %1116 = arith.addf %1110, %1115 : vector<4x64xf32>
    %1117 = arith.subf %1027, %1060 : vector<4x1xf32>
    %1118 = math.exp %1117 : vector<4x1xf32>
    %1119 = arith.addf %1113, %1118 : vector<4x1xf32>
    %1120 = vector.broadcast %1118 : vector<4x1xf32> to vector<4x64xf32>
    %1121 = arith.mulf %1120, %958 : vector<4x64xf32>
    %1122 = arith.addf %1116, %1121 : vector<4x64xf32>
    %1123 = arith.subf %1038, %1060 : vector<4x1xf32>
    %1124 = math.exp %1123 : vector<4x1xf32>
    %1125 = arith.addf %1119, %1124 : vector<4x1xf32>
    %1126 = vector.broadcast %1124 : vector<4x1xf32> to vector<4x64xf32>
    %1127 = arith.mulf %1126, %959 : vector<4x64xf32>
    %1128 = arith.addf %1122, %1127 : vector<4x64xf32>
    %1129 = arith.subf %1049, %1060 : vector<4x1xf32>
    %1130 = math.exp %1129 : vector<4x1xf32>
    %1131 = arith.addf %1125, %1130 : vector<4x1xf32>
    %1132 = vector.broadcast %1130 : vector<4x1xf32> to vector<4x64xf32>
    %1133 = arith.mulf %1132, %960 : vector<4x64xf32>
    %1134 = arith.addf %1128, %1133 : vector<4x64xf32>
    %1135 = vector.broadcast %1131 : vector<4x1xf32> to vector<4x64xf32>
    %1136 = arith.divf %1134, %1135 : vector<4x64xf32>
    %1137 = vector.extract_strided_slice %1136 {offsets = [0, 0], sizes = [2, 64], strides = [1, 1]} : vector<4x64xf32> to vector<2x64xf32>
    %1138 = vector.extract_strided_slice %1136 {offsets = [2, 0], sizes = [2, 64], strides = [1, 1]} : vector<4x64xf32> to vector<2x64xf32>
    %1139 = arith.subf %1137, %1138 : vector<2x64xf32>
    %1140 = math.absf %1139 : vector<2x64xf32>
    %1141 = arith.mulf %1137, %1138 : vector<2x64xf32>
    %1142 = tpu.concatenate %1137, %1138, %1140, %1141 in 1 : vector<2x64xf32>, vector<2x64xf32>, vector<2x64xf32>, vector<2x64xf32> -> vector<2x256xf32>
    %c0_163 = arith.constant 0 : index
    %c0_164 = arith.constant 0 : index
    %1143 = vector.load %arg13[%c0_163, %c0_164] : memref<256x32xf32, #tpu.memory_space<vmem>>, vector<256x32xf32>
    %cst_165 = arith.constant dense<0.000000e+00> : vector<2x32xf32>
    %1144 = tpu.matmul %1142, %1143, %cst_165 {dimension_numbers = #tpu.dot_dimension_numbers<[1], [0], [0], [1], [0, 0, 1, 1], [], []>} : vector<2x256xf32>, vector<256x32xf32>, vector<2x32xf32> -> vector<2x32xf32>
    %c0_166 = arith.constant 0 : index
    %c0_167 = arith.constant 0 : index
    %1145 = vector.load %arg14[%c0_166, %c0_167] : memref<1x32xf32, #tpu.memory_space<vmem>>, vector<1x32xf32>
    %1146 = vector.broadcast %1145 : vector<1x32xf32> to vector<2x32xf32>
    %1147 = arith.addf %1144, %1146 : vector<2x32xf32>
    %cst_168 = arith.constant 0.000000e+00 : f32
    %1148 = vector.broadcast %cst_168 : f32 to vector<2x32xf32>
    %1149 = arith.maximumf %1147, %1148 : vector<2x32xf32>
    %c0_169 = arith.constant 0 : index
    %c0_170 = arith.constant 0 : index
    %1150 = vector.load %arg1[%c0_169, %c0_170] : memref<2x14xf32, #tpu.memory_space<vmem>>, vector<2x14xf32>
    %c0_171 = arith.constant 0 : index
    %c0_172 = arith.constant 0 : index
    %1151 = vector.load %arg11[%c0_171, %c0_172] : memref<14x28xf32, #tpu.memory_space<vmem>>, vector<14x28xf32>
    %cst_173 = arith.constant dense<0.000000e+00> : vector<2x28xf32>
    %1152 = tpu.matmul %1150, %1151, %cst_173 {dimension_numbers = #tpu.dot_dimension_numbers<[1], [0], [0], [1], [0, 0, 1, 1], [], []>} : vector<2x14xf32>, vector<14x28xf32>, vector<2x28xf32> -> vector<2x28xf32>
    %c0_174 = arith.constant 0 : index
    %c0_175 = arith.constant 0 : index
    %1153 = vector.load %arg12[%c0_174, %c0_175] : memref<1x28xf32, #tpu.memory_space<vmem>>, vector<1x28xf32>
    %1154 = vector.broadcast %1153 : vector<1x28xf32> to vector<2x28xf32>
    %1155 = arith.addf %1152, %1154 : vector<2x28xf32>
    %cst_176 = arith.constant 0.000000e+00 : f32
    %1156 = vector.broadcast %cst_176 : f32 to vector<2x28xf32>
    %1157 = arith.maximumf %1155, %1156 : vector<2x28xf32>
    %1158 = tpu.concatenate %1149, %1157 in 1 : vector<2x32xf32>, vector<2x28xf32> -> vector<2x60xf32>
    %c0_177 = arith.constant 0 : index
    %c0_178 = arith.constant 0 : index
    %1159 = vector.load %arg15[%c0_177, %c0_178] : memref<60x32xf32, #tpu.memory_space<vmem>>, vector<60x32xf32>
    %cst_179 = arith.constant dense<0.000000e+00> : vector<2x32xf32>
    %1160 = tpu.matmul %1158, %1159, %cst_179 {dimension_numbers = #tpu.dot_dimension_numbers<[1], [0], [0], [1], [0, 0, 1, 1], [], []>} : vector<2x60xf32>, vector<60x32xf32>, vector<2x32xf32> -> vector<2x32xf32>
    %c0_180 = arith.constant 0 : index
    %c0_181 = arith.constant 0 : index
    %1161 = vector.load %arg16[%c0_180, %c0_181] : memref<1x32xf32, #tpu.memory_space<vmem>>, vector<1x32xf32>
    %1162 = vector.broadcast %1161 : vector<1x32xf32> to vector<2x32xf32>
    %1163 = arith.addf %1160, %1162 : vector<2x32xf32>
    %cst_182 = arith.constant 0.000000e+00 : f32
    %1164 = vector.broadcast %cst_182 : f32 to vector<2x32xf32>
    %1165 = arith.maximumf %1163, %1164 : vector<2x32xf32>
    %c0_183 = arith.constant 0 : index
    %c0_184 = arith.constant 0 : index
    %1166 = vector.load %arg17[%c0_183, %c0_184] : memref<32x2xf32, #tpu.memory_space<vmem>>, vector<32x2xf32>
    %cst_185 = arith.constant dense<0.000000e+00> : vector<2x2xf32>
    %1167 = tpu.matmul %1165, %1166, %cst_185 {dimension_numbers = #tpu.dot_dimension_numbers<[1], [0], [0], [1], [0, 0, 1, 1], [], []>} : vector<2x32xf32>, vector<32x2xf32>, vector<2x2xf32> -> vector<2x2xf32>
    %c0_186 = arith.constant 0 : index
    %c0_187 = arith.constant 0 : index
    %1168 = vector.load %arg18[%c0_186, %c0_187] : memref<1x2xf32, #tpu.memory_space<vmem>>, vector<1x2xf32>
    %1169 = vector.broadcast %1168 : vector<1x2xf32> to vector<2x2xf32>
    %1170 = arith.addf %1167, %1169 : vector<2x2xf32>
    %cst_188 = arith.constant dense<0xFF800000> : vector<2xf32>
    %1171 = vector.multi_reduction <maximumf>, %1170, %cst_188 [1] : vector<2x2xf32> to vector<2xf32>
    %1172 = vector.shape_cast %1171 : vector<2xf32> to vector<2x1xf32>
    %1173 = vector.broadcast %1172 : vector<2x1xf32> to vector<2x2xf32>
    %1174 = arith.subf %1170, %1173 : vector<2x2xf32>
    %1175 = math.exp %1174 : vector<2x2xf32>
    %cst_189 = arith.constant dense<0.000000e+00> : vector<2xf32>
    %1176 = vector.multi_reduction <add>, %1175, %cst_189 [1] : vector<2x2xf32> to vector<2xf32>
    %1177 = vector.shape_cast %1176 : vector<2xf32> to vector<2x1xf32>
    %1178 = math.log %1177 : vector<2x1xf32>
    %1179 = arith.addf %1178, %1172 : vector<2x1xf32>
    %1180 = vector.broadcast %1179 : vector<2x1xf32> to vector<2x2xf32>
    %1181 = arith.subf %1170, %1180 : vector<2x2xf32>
    %c0_190 = arith.constant 0 : index
    %c0_191 = arith.constant 0 : index
    %1182 = vector.load %arg19[%c0_190, %c0_191] : memref<2x2xf32, #tpu.memory_space<vmem>>, vector<2x2xf32>
    tpu.vector_store %arg19[%c0_190, %c0_191], %1181 {strides = array<i32>} : memref<2x2xf32, #tpu.memory_space<vmem>>, vector<2x2xf32>,
    return
  }
}

</mosaic_0001>

<bundles_post_ra>
// kernel: siamese_forward.1
= control target key start
LH: loop header
LB: loop body
LE: loop exit
PB: predicated region body
PF: predicated region fallthrough
CT: control target
= control target key end

     0   :  { %s7176_s0 = inlined_call_operand.vmem [shape: s32[48,1], index: 0, kind: input, shape index: {}]   ;;  %s7177_s1 = inlined_call_operand.vmem [shape: f32[2,14], index: 1, kind: input, shape index: {}]   ;;  %s7178_s2 = inlined_call_operand.vmem [shape: f32[56,32], index: 2, kind: input, shape index: {}]   ;;  %s7179_s3 = inlined_call_operand.vmem [shape: f32[32,256], index: 3, kind: input, shape index: {}]   ;;  %s7180_s4 = inlined_call_operand.hbm [shape: f32[64,128], index: 4, kind: input, shape index: {}]   ;;  %s7181_s5 = inlined_call_operand.hbm [shape: f32[1,256], index: 5, kind: input, shape index: {}]   ;;  %s7182_s6 = inlined_call_operand.hbm [shape: f32[64,256], index: 6, kind: input, shape index: {}]   ;;  %s7183_s7 = inlined_call_operand.hbm [shape: f32[64,128], index: 7, kind: input, shape index: {}]   ;;  %s7184_s8 = inlined_call_operand.hbm [shape: f32[1,256], index: 8, kind: input, shape index: {}]   ;;  %s7185_s9 = inlined_call_operand.hbm [shape: f32[64,32], index: 9, kind: input, shape index: {}]   ;;  %s7186_s10 = inlined_call_operand.vmem [shape: f32[1,32], index: 10, kind: input, shape index: {}]   ;;  %s7187_s11 = inlined_call_operand.hbm [shape: f32[14,28], index: 11, kind: input, shape index: {}]   ;;  %s7188_s12 = inlined_call_operand.vmem [shape: f32[1,28], index: 12, kind: input, shape index: {}]   ;;  %s7189_s13 = inlined_call_operand.hbm [shape: f32[256,32], index: 13, kind: input, shape index: {}]   ;;  %s7190_s14 = inlined_call_operand.vmem [shape: f32[1,32], index: 14, kind: input, shape index: {}, may-alias: {14,16}]   ;;  %s7191_s15 = inlined_call_operand.hbm [shape: f32[60,32], index: 15, kind: input, shape index: {}]   ;;  %s7192_s16 = inlined_call_operand.vmem [shape: f32[1,32], index: 16, kind: input, shape index: {}, may-alias: {14,16}]   ;;  %s7193_s17 = inlined_call_operand.hbm [shape: f32[32,2], index: 17, kind: input, shape index: {}]   ;;  %s7194_s18 = inlined_call_operand.vmem [shape: f32[1,2], index: 18, kind: input, shape index: {}]   ;;  %s7195_s19 = inlined_call_operand.hbm [shape: f32[2,2], index: 19, kind: output, shape index: {}]  }
   0x1   :  { %7199 = sst [smem:[#allocation27_spill]] %s7176_s0 }
   0x2   :  { %7200 = sst [smem:[#allocation28_spill]] %s7177_s1 }
   0x3   :  { %7201 = sst [smem:[#allocation29_spill]] %s7178_s2 }
   0x4   :  { %7202 = sst [smem:[#allocation30_spill]] %s7179_s3 }
   0x5   :  { %24 = vsyncpa [#allocation3], 0 }
   0x6   :  { %25 = vsyncpa [#allocation6], 0 }
   0x7   :  { %26 = vsyncpa [#allocation9], 0 }
   0x8   :  { %27 = vsyncpa [#allocation12], 0 }
   0x9   :  { %28 = vsyncpa [#allocation15], 0 }
   0xa   :  { %29 = vsyncpa [#allocation18], 0 }
   0xb   :  { %30 = vsyncpa [#allocation4], 0  ;;  %s5767_s0 = smov [#allocation5]  }
   0xc   :  { %s57_s30 = sshll.u32 %s5767_s0, 4  ;;  %s58_s30 = int_to_ptr.vmem [resolvable:$true] %s57_s30 }
   0xd   :  { %s5541_s20 = scalar_lea.vmem %s58_s30, 32  ;;  %p5546_p1 = scmp.lt.s32.totalorder %s58_s30, %s58_s30 }
   0xe   :  { %p5542_p0 = scmp.ne.s32.totalorder %s58_s30, %s5541_s20  ;;  %p5547_p2 = scmp.lt.s32.totalorder %s5541_s20, %s5541_s20 }
  0x10   :  { %p5548_p3 = por %p5547_p2, %p5546_p1 }
  0x12   :  { %p5549_p4 = pnand %p5548_p3, %p5542_p0 }
  0x14   :  { %5552 = shalt.err (!%p5549_p4)
}
  0x15   :  { %60 = dma.hbm_to_vmem [thread:$0]  %s7181_s5, 32, %s58_s30, [#allocation6]  }
  0x16   :  { %s5768_s22 = smov [#allocation8]   ;;  %s5769_s23 = smov [#allocation11]  }
  0x17   :  { %s78_s2 = sshll.u32 %s5768_s22, 4  ;;  %s100_s24 = sshll.u32 %s5769_s23, 4  ;;  %s79_s2 = int_to_ptr.vmem [resolvable:$true] %s78_s2  ;;  %s101_s24 = int_to_ptr.vmem [resolvable:$true] %s100_s24 }
  0x18   :  { %s5561_s25 = scalar_lea.vmem %s79_s2, 1024  ;;  %p5566_p6 = scmp.lt.s32.totalorder %s79_s2, %s79_s2 }
  0x19   :  { %p5562_p5 = scmp.ne.s32.totalorder %s79_s2, %s5561_s25  ;;  %p5567_p7 = scmp.lt.s32.totalorder %s5561_s25, %s5561_s25 }
  0x1b   :  { %p5568_p8 = por %p5567_p7, %p5566_p6 }
  0x1d   :  { %p5569_p9 = pnand %p5568_p8, %p5562_p5 }
  0x1f   :  { %5572 = shalt.err (!%p5569_p9)
}
  0x20   :  { %s5770_s3 = smov 128   ;;  %s5771_s26 = smov 8  }
  0x21   :  { %84 = dma.hbm_to_vmem [thread:$0]  %s7183_s7, 1024, %s79_s2, [#allocation9], %s5770_s3, %s5770_s3, %s5771_s26  }
  0x22   :  { %s5581_s5 = scalar_lea.vmem %s101_s24, 1024  ;;  %p5586_p11 = scmp.lt.s32.totalorder %s101_s24, %s101_s24 }
  0x23   :  { %p5582_p10 = scmp.ne.s32.totalorder %s101_s24, %s5581_s5  ;;  %p5587_p12 = scmp.lt.s32.totalorder %s5581_s5, %s5581_s5 }
  0x25   :  { %p5588_p13 = por %p5587_p12, %p5586_p11 }
  0x27   :  { %p5589_p0 = pnand %p5588_p13, %p5582_p10 }
  0x29   :  { %5592 = shalt.err (!%p5589_p0)
}
  0x2a   :  { %106 = dma.hbm_to_vmem [thread:$0]  %s7185_s9, 1024, %s101_s24, [#allocation12], %s5770_s3, %s5770_s3, %s5771_s26  }
  0x2b   :  { %s5772_s30 = smov [#allocation14]   ;;  %s5773_s21 = smov [#allocation2]  }
  0x2c   :  { %s128_s20 = sshll.u32 %s5772_s30, 4  ;;  %s44_s7 = sshll.u32 %s5773_s21, 4  ;;  %s129_s20 = int_to_ptr.vmem [resolvable:$true] %s128_s20  ;;  %s45_s7 = int_to_ptr.vmem [resolvable:$true] %s44_s7 }
  0x2d   :  { %s5601_s1 = scalar_lea.vmem %s129_s20, 4096  ;;  %p5606_p2 = scmp.lt.s32.totalorder %s129_s20, %s129_s20 }
  0x2e   :  { %p5602_p1 = scmp.ne.s32.totalorder %s129_s20, %s5601_s1  ;;  %p5607_p3 = scmp.lt.s32.totalorder %s5601_s1, %s5601_s1 }
  0x30   :  { %p5608_p4 = por %p5607_p3, %p5606_p2 }
  0x32   :  { %p5609_p5 = pnand %p5608_p4, %p5602_p1 }
  0x34   :  { %5612 = shalt.err (!%p5609_p5)
}
  0x35   :  { %134 = dma.hbm_to_vmem [thread:$0]  %s7189_s13, 4096, %s129_s20, [#allocation15], %s5770_s3, %s5770_s3, %s5771_s26  }
  0x36   :  { %s5621_s9 = scalar_lea.vmem %s45_s7, 1024  ;;  %p5626_p7 = scmp.lt.s32.totalorder %s45_s7, %s45_s7 }
  0x37   :  { %p5622_p6 = scmp.ne.s32.totalorder %s45_s7, %s5621_s9  ;;  %p5627_p8 = scmp.lt.s32.totalorder %s5621_s9, %s5621_s9 }
  0x39   :  { %p5628_p9 = por %p5627_p8, %p5626_p7 }
  0x3b   :  { %p5629_p10 = pnand %p5628_p9, %p5622_p6 }
  0x3d   :  { %5632 = shalt.err (!%p5629_p10)
}
  0x3e   :  { %50 = dma.hbm_to_vmem [thread:$0]  %s7180_s4, 1024, %s45_s7, [#allocation3], %s5770_s3, %s5770_s3, %s5771_s26  }
  0x3f   :  { %s5774_s25 = smov [#allocation7]  }
  0x40   :  { %s66_s27 = sshll.u32 %s5774_s25, 4  ;;  %s67_s27 = int_to_ptr.vmem [resolvable:$true] %s66_s27 }
  0x41   :  { %s5641_s28 = scalar_lea.vmem %s67_s27, 2048  ;;  %p5646_p12 = scmp.lt.s32.totalorder %s67_s27, %s67_s27 }
  0x42   :  { %p5642_p11 = scmp.ne.s32.totalorder %s67_s27, %s5641_s28  ;;  %p5647_p13 = scmp.lt.s32.totalorder %s5641_s28, %s5641_s28 }
  0x44   :  { %p5648_p0 = por %p5647_p13, %p5646_p12 }
  0x46   :  { %p5649_p1 = pnand %p5648_p0, %p5642_p11 }
  0x48   :  { %5652 = shalt.err (!%p5649_p1)
}
  0x49   :  { %s5775_s13 = smov 256   ;;  %s5776_s5 = smov 16  }
  0x4a   :  { %72 = dma.hbm_to_vmem [thread:$0]  %s7182_s6, 2048, %s67_s27, [#allocation6], %s5775_s13, %s5775_s13, %s5776_s5  }
  0x4b   :  { %s5777_s30 = smov [#allocation10]   ;;  %s5778_s21 = smov [#allocation13]  }
  0x4c   :  { %s91_s20 = sshll.u32 %s5777_s30, 4  ;;  %s114_s4 = sshll.u32 %s5778_s21, 4  ;;  %s92_s20 = int_to_ptr.vmem [resolvable:$true] %s91_s20  ;;  %s115_s4 = int_to_ptr.vmem [resolvable:$true] %s114_s4 }
  0x4d   :  { %s5661_s7 = scalar_lea.vmem %s92_s20, 32  ;;  %p5666_p3 = scmp.lt.s32.totalorder %s92_s20, %s92_s20 }
  0x4e   :  { %p5662_p2 = scmp.ne.s32.totalorder %s92_s20, %s5661_s7  ;;  %p5667_p4 = scmp.lt.s32.totalorder %s5661_s7, %s5661_s7 }
  0x50   :  { %p5668_p5 = por %p5667_p4, %p5666_p3 }
  0x52   :  { %p5669_p6 = pnand %p5668_p5, %p5662_p2 }
  0x54   :  { %5672 = shalt.err (!%p5669_p6)
}
  0x55   :  { %94 = dma.hbm_to_vmem [thread:$0]  %s7184_s8, 32, %s92_s20, [#allocation9]  }
  0x56   :  { %s5681_s2 = scalar_lea.vmem %s115_s4, 256  ;;  %p5686_p8 = scmp.lt.s32.totalorder %s115_s4, %s115_s4 }
  0x57   :  { %p5682_p7 = scmp.ne.s32.totalorder %s115_s4, %s5681_s2  ;;  %p5687_p9 = scmp.lt.s32.totalorder %s5681_s2, %s5681_s2 }
  0x59   :  { %p5688_p10 = por %p5687_p9, %p5686_p8 }
  0x5b   :  { %p5689_p11 = pnand %p5688_p10, %p5682_p7 }
  0x5d   :  { %5692 = shalt.err (!%p5689_p11)
}
  0x5e   :  { %120 = dma.hbm_to_vmem [thread:$0]  %s7187_s11, 256, %s115_s4, [#allocation12], %s5770_s3, %s5770_s3, %s5771_s26  }
  0x5f   :  { %s5779_s23 = smov [#allocation16]   ;;  %s5780_s25 = smov [#allocation17]  }
  0x60   :  { %s142_s24 = sshll.u32 %s5779_s23, 4  ;;  %s156_s27 = sshll.u32 %s5780_s25, 4  ;;  %s143_s24 = int_to_ptr.vmem [resolvable:$true] %s142_s24  ;;  %s157_s27 = int_to_ptr.vmem [resolvable:$true] %s156_s27 }
  0x61   :  { %s5701_s8 = scalar_lea.vmem %s143_s24, 1024  ;;  %p5706_p13 = scmp.lt.s32.totalorder %s143_s24, %s143_s24 }
  0x62   :  { %p5702_p12 = scmp.ne.s32.totalorder %s143_s24, %s5701_s8  ;;  %p5707_p0 = scmp.lt.s32.totalorder %s5701_s8, %s5701_s8 }
  0x64   :  { %p5708_p1 = por %p5707_p0, %p5706_p13 }
  0x66   :  { %p5709_p2 = pnand %p5708_p1, %p5702_p12 }
  0x68   :  { %5712 = shalt.err (!%p5709_p2)
}
  0x69   :  { %148 = dma.hbm_to_vmem [thread:$0]  %s7191_s15, 1024, %s143_s24, [#allocation15], %s5770_s3, %s5770_s3, %s5771_s26  }
  0x6a   :  { %s5721_s11 = scalar_lea.vmem %s157_s27, 512  ;;  %p5726_p4 = scmp.lt.s32.totalorder %s157_s27, %s157_s27 }
  0x6b   :  { %p5722_p3 = scmp.ne.s32.totalorder %s157_s27, %s5721_s11  ;;  %p5727_p5 = scmp.lt.s32.totalorder %s5721_s11, %s5721_s11 }
  0x6d   :  { %p5728_p6 = por %p5727_p5, %p5726_p4 }
  0x6f   :  { %p5729_p7 = pnand %p5728_p6, %p5722_p3 }
  0x71   :  { %5732 = shalt.err (!%p5729_p7)
}
  0x72   :  { %162 = dma.hbm_to_vmem [thread:$0]  %s7193_s17, 512, %s157_s27, [#allocation18], %s5770_s3, %s5770_s3, %s5771_s26  }
  0x73   :  { %5753 = dma.done.wait [#allocation3], 1024  }
  0x74   :  { %5754 = vsyncadd [#allocation3], 4294966272 }
  0x75   :  { %5755 = dma.done.wait [#allocation6], 2080  }
  0x76   :  { %5756 = vsyncadd [#allocation6], 4294965216 }
  0x77   :  { %5757 = dma.done.wait [#allocation9], 1056  }
  0x78   :  { %5758 = vsyncadd [#allocation9], 4294966240 }
  0x79   :  { %5759 = dma.done.wait [#allocation12], 1280  }
  0x7a   :  { %5760 = vsyncadd [#allocation12], 4294966016 }
  0x7b   :  { %5761 = dma.done.wait [#allocation15], 5120  }
  0x7c   :  { %5762 = vsyncadd [#allocation15], 4294962176 }
  0x7d   :  { %5763 = dma.done.wait [#allocation18], 512  }
  0x7e   :  { %5764 = vsyncadd [#allocation18], 4294966784  ;;  %v5781_v0 = vmov 0   ;;  %v5782_v1 = vmov 0.0   ;;  %s7203_s3 = sld [smem:[#allocation27_spill]]  ;;  %v195_v20 = vlaneseq  ;;  %vm254_vm0 = vcmask 457728  }
  0x7f   :  { %5277 = vset.pattern.permute.xlu1 %v5781_v0  ;;  %5276 = vset.pattern.permute.xlu0 %v5781_v0  ;;  %s7204_s22 = sld [smem:[#allocation29_spill]]  ;;  %v6026_v37 = vld [vmem:[#allocation2 + $0x38] sm:$0xff]  ;;  %v6029_v38 = vld [vmem:[#allocation2 + $0x30] sm:$0xff]  ;;  %v6034_v39 = vld [vmem:[#allocation2 + $0x28] sm:$0xff]  ;;  %vm5783_vm7 = vmmov 0   ;;  %vm388_vm8 = vcmask 261120  }
  0x80   :  { %471 = vmatprep.mubr.f32.mxu1 %v5782_v1  ;;  %s7205_s17 = sld [smem:[#allocation30_spill]]  ;;  %v5996_v21 = vand.u32 127, %v195_v20  ;;  %v6037_v40 = vld [vmem:[#allocation2 + $0x20] sm:$0xff]  ;;  %v6042_v41 = vld [vmem:[#allocation2 + $0x18] sm:$0xff]  ;;  %v6045_v42 = vld [vmem:[#allocation2 + $0x10] sm:$0xff]  ;;  %v6109_v53 = vshrl.u32 %v195_v20, 7 }
  0x81   :  { %v6050_v43 = vld [vmem:[#allocation2 + $0x8] sm:$0xff]  ;;  %v6053_v44 = vld [vmem:[#allocation2] sm:$0xff]  ;;  %vm516_vm9 = vcmask 1043456   ;;  %s5784_s28 = smov 64   ;;  %s5785_s13 = smov 32   ;;  %vm5786_vm15 = vmmov 1  }
  0x82   :  { %v384_v54 = vsub.s32 1, %v6109_v53  ;;  %v376_v55 = vld [vmem:[#allocation5] sm:$0x3]  ;;  %v380_v56 = vsub.s32 0, %v6109_v53  ;;  %vm199_vm10 = vcmp.lt.s32.totalorder %v6109_v53, 4  ;;  %vm617_vm11 = vcmp.ge.s32.totalorder %v6109_v53, 6 }
  0x83   :  { %vm618_vm12 = vmor %vm199_vm10, %vm617_vm11  ;;  %vm200_vm13 = vcmp.lt.s32.totalorder %v5996_v21, 32  ;;  %s7206_s15 = sld [smem:[#allocation28_spill]] }
  0x84   :  { %v207_v2 = vld [vmem:[%s7203_s3 + $0x10] sm:$0xff]  ;;  %v205_v3 = vld [vmem:[%s7203_s3] sm:$0xff]  ;;  %v208_v4 = vld [vmem:[%s7203_s3 + $0x18] sm:$0xff]  ;;  %v385_v57 = vrot.slane %v376_v55, %v384_v54  ;;  %v381_v60 = vrot.slane %v376_v55, %v380_v56 }
  0x85   :  { %218 = vperm.xlu1 %5277, %v207_v2   ;;  %212 = vperm.xlu0 %5276, %v205_v3   ;;  %v206_v5 = vld [vmem:[%s7203_s3 + $0x8] sm:$0xff]  ;;  %v253_v6 = vld [vmem:[%s7204_s22 + $0x30] sm:$0xff]  ;;  %v251_v8 = vld [vmem:[%s7204_s22 + $0x20] sm:$0xff] }
  0x86   :  { %4714 = vmatprep.subr.mxu0 %v253_v6  ;;  %v252_v7 = vld [vmem:[%s7204_s22 + $0x28] sm:$0xff]  ;;  %v209_v10 = vld [vmem:[%s7203_s3 + $0x20] sm:$0xff]  ;;  %v250_v11 = vld [vmem:[%s7204_s22 + $0x18] sm:$0xff] }
  0x87   :  { %4715 = vmatpush3.msra.mxu0 %v253_v6  ;;  %v210_v9 = vld [vmem:[%s7203_s3 + $0x28] sm:$0xff]  ;;  %v249_v12 = vld [vmem:[%s7204_s22 + $0x10] sm:$0xff]  ;;  %v375_v13 = vld [vmem:[%s7205_s17 + $0x38] sm:$0xff] }
  0x88   :  { %4716 = vmatprep.subr.mxu0 %v252_v7  ;;  %v374_v14 = vld [vmem:[%s7205_s17 + $0x30] sm:$0xff]  ;;  %v373_v15 = vld [vmem:[%s7205_s17 + $0x28] sm:$0xff]  ;;  %431 = vmatprep.subr.mxu1 %v375_v13  ;;  %v372_v17 = vld [vmem:[%s7205_s17 + $0x20] sm:$0xff] }
  0x89   :  { %221 = vperm.xlu1 %5277, %v208_v4   ;;  %215 = vperm.xlu0 %5276, %v206_v5   ;;  %v248_v16 = vld [vmem:[%s7204_s22 + $0x8] sm:$0xff]  ;;  %v371_v18 = vld [vmem:[%s7205_s17 + $0x18] sm:$0xff]  ;;  %v247_v19 = vld [vmem:[%s7204_s22] sm:$0xff] }
  0x8a   :  { %4717 = vmatpush3.msra.mxu0 %v252_v7  ;;  %432 = vmatpush1.msra.mxu1 %v374_v14  ;;  %v370_v34 = vld [vmem:[%s7205_s17 + $0x10] sm:$0xff]  ;;  %v369_v35 = vld [vmem:[%s7205_s17 + $0x8] sm:$0xff]  ;;  %v368_v36 = vld [vmem:[%s7205_s17] sm:$0xff] }
  0x8b   :  { %4718 = vmatprep.subr.mxu0 %v251_v8  ;;  %433 = vmatprep.subr.mxu1 %v373_v15  ;;  %vm201_vm14 = vmxor %vm199_vm10, %vm200_vm13 }
  0x8c   :  { %4719 = vmatpush3.msra.mxu0 %v251_v8  ;;  %434 = vmatpush1.msra.mxu1 %v372_v17 }
  0x8d   :  { %227 = vperm.xlu1 %5277, %v210_v9   ;;  %224 = vperm.xlu0 %5276, %v209_v10  }
  0x8e   :  { %4720 = vmatprep.subr.mxu0 %v250_v11  ;;  %435 = vmatprep.subr.mxu1 %v371_v18 }
  0x8f   :  { %4721 = vmatpush3.msra.mxu0 %v250_v11  ;;  %436 = vmatpush1.msra.mxu1 %v370_v34 }
  0x90   :  { %4722 = vmatprep.subr.mxu0 %v249_v12  ;;  %437 = vmatprep.subr.mxu1 %v369_v35 }
  0x91   :  { %4723 = vmatpush3.msra.mxu0 %v249_v12  ;;  %438 = vmatpush1.msra.mxu1 %v368_v36 }
  0x92   :  { %4724 = vmatprep.subr.mxu0 %v248_v16  ;;  %4756 = vmatprep.subr.mxu1 %v5782_v1 }
  0x93   :  { %4725 = vmatpush3.msra.mxu0 %v248_v16 }
  0x94   :  { %4726 = vmatprep.subr.mxu0 %v247_v19 }
  0x95   :  { %4727 = vmatpush3.msra.mxu0 %v247_v19 }
  0x96   :  { %4737 = vmatprep.subr.mxu0 %v5782_v1 }
 0x100   :  { %v219_v22 = vpop.permute.xlu1 %218  ;;  %v213_v23 = vpop.permute.xlu0 %212 }
 0x101   :  { %vm229_vm1 = vcmp.eq.s32.totalorder %v213_v23, %v5996_v21  ;;  %vm231_vm2 = vcmp.eq.s32.totalorder %v219_v22, %v5996_v21 }
 0x102   :  { %v4332_v24 = vsel %vm229_vm1, 1.0, %v5782_v1  ;;  %v4334_v27 = vsel %vm231_vm2, 1.0, %v5782_v1  ;;  %vm518_vm1 = vcmask 523264   ;;  %vm3647_vm2 = vcmask 257024  }
 0x103   :  { %4728 = vmatprep.mubr.msk.f32.mxu0 %vm254_vm0, %v4332_v24 }
 0x104   :  { %v222_v25 = vpop.permute.xlu1 %221  ;;  %v216_v26 = vpop.permute.xlu0 %215 }
 0x105   :  { %vm232_vm3 = vcmp.eq.s32.totalorder %v222_v25, %v5996_v21  ;;  %vm230_vm4 = vcmp.eq.s32.totalorder %v216_v26, %v5996_v21 }
 0x106   :  { %v4333_v28 = vsel %vm230_vm4, 1.0, %v5782_v1  ;;  %v4335_v29 = vsel %vm232_vm3, 1.0, %v5782_v1  ;;  %vm3651_vm3 = vcmask 261124   ;;  %vm3680_vm4 = vcmp.lt.s32.totalorder %v6109_v53, 2 }
 0x107   :  { %4729 = vmatmul.mubr.msk.f32.vlgmr.msra.gmra.mxu0 %vm254_vm0, %v4333_v28 }
 0x108   :  { %v228_v30 = vpop.permute.xlu1 %227  ;;  %v225_v31 = vpop.permute.xlu0 %224  ;;  %4731 = vmatprep.mubr.msk.f32.mxu0 %vm254_vm0, %v4334_v27  ;;  %4738 = vmatpush3.msra.mxu0 %v6026_v37 }
 0x109   :  { %vm233_vm5 = vcmp.eq.s32.totalorder %v225_v31, %v5996_v21  ;;  %vm234_vm6 = vcmp.eq.s32.totalorder %v228_v30, %v5996_v21  ;;  %4739 = vmatprep.subr.mxu0 %v5782_v1 }
 0x10a   :  { %v4336_v32 = vsel %vm233_vm5, 1.0, %v5782_v1  ;;  %v4337_v33 = vsel %vm234_vm6, 1.0, %v5782_v1  ;;  %4740 = vmatpush3.msra.mxu0 %v6029_v38  ;;  %vm4039_vm5 = vcmask 1045504   ;;  %vm4035_vm6 = vcmask 113664  }
 0x10b   :  { %4732 = vmatmul.mubr.msk.f32.gmra.mxu0 %vm254_vm0, %v4335_v29  ;;  %4741 = vmatprep.subr.mxu0 %v5782_v1 }
 0x10c   :  { %4734 = vmatprep.mubr.msk.f32.mxu0 %vm254_vm0, %v4336_v32  ;;  %4742 = vmatpush3.msra.mxu0 %v6034_v39 }
 0x10d   :  { %4743 = vmatprep.subr.mxu0 %v5782_v1 }
 0x10e   :  { %4744 = vmatpush3.msra.mxu0 %v6037_v40 }
 0x10f   :  { %4735 = vmatmul.mubr.msk.f32.gmra.mxu0 %vm254_vm0, %v4337_v33  ;;  %4745 = vmatprep.subr.mxu0 %v5782_v1  ;;  %vm202_vm0 = vmxor %vm201_vm14, %vm5786_vm15 }
 0x110   :  { %4746 = vmatpush3.msra.mxu0 %v6042_v41  ;;  %4753 = vmatprep.mubr.msk.f32.mxu0 %vm5783_vm7, %v5782_v1 }
 0x111   :  { %4747 = vmatprep.subr.mxu0 %v5782_v1 }
 0x112   :  { %4748 = vmatpush3.msra.mxu0 %v6045_v42 }
 0x113   :  { %4749 = vmatprep.subr.mxu0 %v5782_v1 }
 0x114   :  { %4750 = vmatpush3.msra.mxu0 %v6050_v43 }
 0x115   :  { %4751 = vmatprep.subr.mxu0 %v5782_v1 }
 0x116   :  { %4752 = vmatpush3.msra.mxu0 %v6053_v44 }
 0x117   :  { %4754 = vmatmul.mubr.f32.vlgmr.msra.gmra.mxu0 %v5782_v1  ;;  %4775 = vmatprep.subr.mxu0 %v5782_v1 }
 0x118   :  { %4776 = vmatpush3.msra.mxu0 %v6026_v37  ;;  %4791 = vmatprep.mubr.msk.f32.mxu0 %vm5783_vm7, %v5782_v1 }
 0x119   :  { %4777 = vmatprep.subr.mxu0 %v5782_v1 }
 0x11a   :  { %4778 = vmatpush3.msra.mxu0 %v6029_v38 }
 0x11b   :  { %4779 = vmatprep.subr.mxu0 %v5782_v1 }
 0x11c   :  { %4780 = vmatpush3.msra.mxu0 %v6034_v39 }
 0x11d   :  { %4781 = vmatprep.subr.mxu0 %v5782_v1 }
 0x11e   :  { %4782 = vmatpush3.msra.mxu0 %v6037_v40 }
 0x11f   :  { %4783 = vmatprep.subr.mxu0 %v5782_v1 }
 0x120   :  { %4784 = vmatpush3.msra.mxu0 %v6042_v41 }
 0x121   :  { %4785 = vmatprep.subr.mxu0 %v5782_v1 }
 0x122   :  { %4786 = vmatpush3.msra.mxu0 %v6045_v42 }
 0x123   :  { %4787 = vmatprep.subr.mxu0 %v5782_v1 }
 0x124   :  { %4788 = vmatpush3.msra.mxu0 %v6050_v43 }
 0x125   :  { %4789 = vmatprep.subr.mxu0 %v5782_v1 }
 0x126   :  { %4790 = vmatpush3.msra.mxu0 %v6053_v44 }
 0x127   :  { %4813 = vmatprep.subr.mxu0 %v5782_v1 }
 0x1c7   :  { %v4730_v45 = vpop.f32.mrf.mxu0 }
 0x1c9   :  { %v339_v46 = vpop.f32.mrf.mxu0 }
 0x1ca   :  { %4344 = vmatmul.mubr.msk.f32.vlgmr.msra.gmra.mxu1 %vm388_vm8, %v339_v46 }
 0x1cb   :  { %477 = vmatprep.mubr.f32.mxu1 %v5782_v1  ;;  %4757 = vmatpush3.msra.mxu1 %v6026_v37  ;;  %v4733_v47 = vpop.f32.mrf.mxu0 }
 0x1cc   :  { %4758 = vmatprep.subr.mxu1 %v5782_v1 }
 0x1cd   :  { %4759 = vmatpush3.msra.mxu1 %v6029_v38  ;;  %v349_v48 = vpop.f32.mrf.mxu0 }
 0x1ce   :  { %4345 = vmatmul.mubr.msk.f32.gmra.mxu1 %vm388_vm8, %v4730_v45  ;;  %4760 = vmatprep.subr.mxu1 %v5782_v1 }
 0x1cf   :  { %483 = vmatprep.mubr.f32.mxu1 %v5782_v1  ;;  %4761 = vmatpush3.msra.mxu1 %v6034_v39  ;;  %v4736_v49 = vpop.f32.mrf.mxu0 }
 0x1d0   :  { %4762 = vmatprep.subr.mxu1 %v5782_v1 }
 0x1d1   :  { %4763 = vmatpush3.msra.mxu1 %v6037_v40  ;;  %v359_v50 = vpop.f32.mrf.mxu0 }
 0x1d2   :  { %4346 = vmatmul.mubr.msk.f32.gmra.mxu1 %vm388_vm8, %v349_v48  ;;  %4764 = vmatprep.subr.mxu1 %v5782_v1 }
 0x1d3   :  { %489 = vmatprep.mubr.f32.mxu1 %v5782_v1  ;;  %4765 = vmatpush3.msra.mxu1 %v6042_v41 }
 0x1d4   :  { %4766 = vmatprep.subr.mxu1 %v5782_v1 }
 0x1d5   :  { %4767 = vmatpush3.msra.mxu1 %v6045_v42 }
 0x1d6   :  { %4347 = vmatmul.mubr.msk.f32.gmra.mxu1 %vm388_vm8, %v4733_v47  ;;  %4768 = vmatprep.subr.mxu1 %v5782_v1 }
 0x1d7   :  { %495 = vmatprep.mubr.f32.mxu1 %v5782_v1  ;;  %4769 = vmatpush3.msra.mxu1 %v6050_v43  ;;  %v588_v51 = vpop.f32.mrf.mxu0 }
 0x1d8   :  { %4770 = vmatprep.subr.mxu1 %v5782_v1 }
 0x1d9   :  { %4771 = vmatpush3.msra.mxu1 %v6053_v44  ;;  %v4755_v52 = vpop.f32.mrf.mxu0 }
 0x1da   :  { %4348 = vmatmul.mubr.msk.f32.gmra.mxu1 %vm388_vm8, %v359_v50  ;;  %4794 = vmatprep.subr.mxu1 %v5782_v1 }
 0x1db   :  { %501 = vmatprep.mubr.f32.mxu1 %v5782_v1 }
 0x1de   :  { %4349 = vmatmul.mubr.msk.f32.gmra.mxu1 %vm388_vm8, %v4736_v49 }
 0x1df   :  { %4772 = vmatprep.mubr.msk.f32.mxu1 %vm5783_vm7, %v5782_v1 }
 0x28a   :  { %v473_v58 = vpop.f32.mrf.mxu1 }
 0x28b   :  { %v474_v27 = vadd.f32 %v473_v58, %v381_v60 }
 0x28c   :  { %v475_v59 = vpop.f32.mrf.mxu1 }
 0x28d   :  { %v476_v61 = vadd.f32 %v475_v59, %v385_v57  ;;  %v633_v48 = vrot.slane %v474_v27, 4 }
 0x28e   :  { %v479_v62 = vpop.f32.mrf.mxu1 }
 0x28f   :  { %v480_v63 = vadd.f32 %v479_v62, %v381_v60  ;;  %v1752_v34 = vrot.slane %v476_v61, 4 }
 0x290   :  { %v481_v0 = vpop.f32.mrf.mxu1 }
 0x291   :  { %v482_v2 = vadd.f32 %v481_v0, %v385_v57  ;;  %v859_v28 = vrot.slane %v480_v63, 4 }
 0x292   :  { %v485_v3 = vpop.f32.mrf.mxu1 }
 0x293   :  { %v486_v4 = vadd.f32 %v485_v3, %v381_v60  ;;  %v1530_v20 = vrot.slane %v482_v2, 4 }
 0x294   :  { %v487_v5 = vpop.f32.mrf.mxu1 }
 0x295   :  { %v488_v6 = vadd.f32 %v487_v5, %v385_v57  ;;  %v1083_v14 = vrot.slane %v486_v4, 4 }
 0x296   :  { %v491_v7 = vpop.f32.mrf.mxu1 }
 0x297   :  { %v492_v8 = vadd.f32 %v491_v7, %v381_v60  ;;  %v1308_v10 = vrot.slane %v488_v6, 4  ;;  %v6155_v7 = vsel %vm618_vm12, 1.0, %v5782_v1 }
 0x298   :  { %v493_v9 = vpop.f32.mrf.mxu1 }
 0x299   :  { %v1305_v11 = vrot.slane %v492_v8, 4  ;;  %v494_v12 = vadd.f32 %v493_v9, %v385_v57  ;;  %v6118_v13 = vsel %vm516_vm9, %v492_v8, %v488_v6  ;;  %v6166_v9 = vsel %vm202_vm0, 1.0, %v5782_v1 }
 0x29a   :  { %v497_v15 = vpop.f32.mrf.mxu1 }
 0x29b   :  { %v1086_v16 = vrot.slane %v494_v12, 4  ;;  %v498_v17 = vadd.f32 %v497_v15, %v381_v60  ;;  %v6121_v18 = vsel %vm516_vm9, %v486_v4, %v494_v12  ;;  %v6124_v19 = vsel %vm516_vm9, %v1305_v11, %v1308_v10 }
 0x29c   :  { %v499_v22 = vpop.f32.mrf.mxu1 }
 0x29d   :  { %v1527_v23 = vrot.slane %v498_v17, 4  ;;  %v500_v24 = vadd.f32 %v499_v22, %v385_v57  ;;  %v6127_v25 = vsel %vm516_vm9, %v1083_v14, %v1086_v16  ;;  %v6130_v26 = vsel %vm516_vm9, %v498_v17, %v482_v2 }
 0x29e   :  { %v503_v29 = vpop.f32.mrf.mxu1 }
 0x29f   :  { %v862_v30 = vrot.slane %v500_v24, 4  ;;  %v504_v31 = vadd.f32 %v503_v29, %v381_v60  ;;  %v6133_v32 = vsel %vm516_vm9, %v480_v63, %v500_v24  ;;  %v6136_v33 = vsel %vm516_vm9, %v1527_v23, %v1530_v20 }
 0x2a0   :  { %v505_v35 = vpop.f32.mrf.mxu1 }
 0x2a1   :  { %v1749_v36 = vrot.slane %v504_v31, 4  ;;  %v506_v45 = vadd.f32 %v505_v35, %v385_v57  ;;  %v6139_v46 = vsel %vm516_vm9, %v859_v28, %v862_v30  ;;  %v6142_v47 = vsel %vm516_vm9, %v504_v31, %v476_v61 }
 0x2a3   :  { %v636_v49 = vrot.slane %v506_v45, 4  ;;  %v517_v50 = vsel %vm516_vm9, %v474_v27, %v506_v45  ;;  %v6146_v52 = vsel %vm516_vm9, %v1749_v36, %v1752_v34 }
 0x2a4   :  { %v592_v55 = vadd.f32 %v588_v51, %v517_v50 }
 0x2a5   :  { %v638_v58 = vsel %vm516_vm9, %v633_v48, %v636_v49 }
 0x2a6   :  { %5283 = vtanh.f32 %v592_v55  ;;  %v4350_v57 = vmul.f32 -1.442695, %v592_v55 }
 0x2a8   :  { %5285 = vpow2.f32 %v4350_v57 }
 0x2b3   :  { %v5284_v59 = vpop.eup %5283 }
 0x2b4   :  { %602 = vrot.lane.b32.xlu0 %v5284_v59, %s5784_s28 }
 0x2b5   :  { %v5286_v60 = vpop.eup %5285 }
 0x2b6   :  { %v596_v61 = vadd.f32 1.0, %v5286_v60 }
 0x2b8   :  { %5287 = vrcp.f32 %v596_v61 }
 0x2c5   :  { %v5288_v62 = vpop.eup %5287 }
 0x2c6   :  { %v600_v2 = vmul.f32 0.0, %v5288_v62 }
 0x326   :  { %v603_v63 = vpop.permute.xlu0 %602 }
 0x327   :  { %v605_v0 = vmul.f32 %v5288_v62, %v603_v63 }
 0x329   :  { %607 = vrot.lane.b32.xlu1 %v605_v0, %s5785_s13 }
 0x39b   :  { %v608_v51 = vpop.permute.xlu1 %607 }
 0x39c   :  { %v610_v3 = vadd.f32 %v608_v51, %v600_v2 }
 0x39e   :  { %5289 = vtanh.f32 %v610_v3  ;;  %v622_v29 = vmul.f32 %v6155_v7, %v610_v3 }
 0x3ab   :  { %v5290_v4 = vpop.eup %5289 }
 0x3ac   :  { %613 = vrot.lane.b32.xlu0 %v5290_v4, %s5784_s28 }
 0x41e   :  { %v614_v5 = vpop.permute.xlu0 %613 }
 0x41f   :  { %v616_v6 = vmul.f32 %v5288_v62, %v614_v5 }
 0x421   :  { %v6158_v8 = vmul.f32 %v6155_v7, %v616_v6 }
 0x423   :  { %627 = vrot.lane.b32.xlu0 %v6158_v8, %s5784_s28  ;;  %624 = vrot.lane.b32.xlu1 %v6158_v8, %s5785_s13 }
 0x495   :  { %v628_v10 = vpop.permute.xlu0 %627  ;;  %v6168_v11 = vpop.permute.xlu1 %624 }
 0x496   :  { %v630_v12 = vsel %vm388_vm8, %v6168_v11, %v628_v10 }
 0x497   :  { %v631_v14 = vmul.f32 %v6166_v9, %v630_v12 }
 0x499   :  { %4773 = vmatmul.mubr.msk.f32.vlgmr.msra.gmra.mxu1 %vm518_vm1, %v631_v14 }
 0x49a   :  { %4795 = vmatpush3.msra.mxu1 %v6026_v37  ;;  %4810 = vmatprep.mubr.msk.f32.mxu1 %vm5783_vm7, %v5782_v1 }
 0x49b   :  { %4796 = vmatprep.subr.mxu1 %v5782_v1 }
 0x49c   :  { %4797 = vmatpush3.msra.mxu1 %v6029_v38 }
 0x49d   :  { %4798 = vmatprep.subr.mxu1 %v5782_v1 }
 0x49e   :  { %4799 = vmatpush3.msra.mxu1 %v6034_v39 }
 0x49f   :  { %4800 = vmatprep.subr.mxu1 %v5782_v1 }
 0x4a0   :  { %4801 = vmatpush3.msra.mxu1 %v6037_v40 }
 0x4a1   :  { %4802 = vmatprep.subr.mxu1 %v5782_v1 }
 0x4a2   :  { %4803 = vmatpush3.msra.mxu1 %v6042_v41 }
 0x4a3   :  { %4804 = vmatprep.subr.mxu1 %v5782_v1 }
 0x4a4   :  { %4805 = vmatpush3.msra.mxu1 %v6045_v42 }
 0x4a5   :  { %4806 = vmatprep.subr.mxu1 %v5782_v1 }
 0x4a6   :  { %4807 = vmatpush3.msra.mxu1 %v6050_v43 }
 0x4a7   :  { %4808 = vmatprep.subr.mxu1 %v5782_v1 }
 0x4a8   :  { %4809 = vmatpush3.msra.mxu1 %v6053_v44 }
 0x4a9   :  { %4832 = vmatprep.subr.mxu1 %v5782_v1 }
 0x559   :  { %v708_v21 = vpop.f32.mrf.mxu1 }
 0x55a   :  { %v712_v15 = vadd.f32 %v708_v21, %v638_v58 }
 0x55b   :  { %v4774_v16 = vpop.f32.mrf.mxu1 }
 0x55c   :  { %5291 = vtanh.f32 %v712_v15  ;;  %v4353_v20 = vmul.f32 -1.442695, %v712_v15 }
 0x55e   :  { %5293 = vpow2.f32 %v4353_v20 }
 0x569   :  { %v5292_v17 = vpop.eup %5291 }
 0x56a   :  { %722 = vrot.lane.b32.xlu1 %v5292_v17, %s5784_s28 }
 0x56b   :  { %v5294_v22 = vpop.eup %5293 }
 0x56c   :  { %v716_v23 = vadd.f32 1.0, %v5294_v22 }
 0x56e   :  { %5295 = vrcp.f32 %v716_v23 }
 0x57b   :  { %v5296_v24 = vpop.eup %5295 }
 0x57c   :  { %v720_v30 = vmul.f32 %v5296_v24, %v622_v29 }
 0x5dc   :  { %v723_v27 = vpop.permute.xlu1 %722 }
 0x5dd   :  { %v725_v28 = vmul.f32 %v5296_v24, %v723_v27 }
 0x5df   :  { %727 = vrot.lane.b32.xlu0 %v725_v28, %s5785_s13 }
 0x651   :  { %v728_v31 = vpop.permute.xlu0 %727 }
 0x652   :  { %v730_v34 = vadd.f32 %v728_v31, %v720_v30 }
 0x654   :  { %5297 = vtanh.f32 %v730_v34  ;;  %v738_v4 = vmul.f32 %v6155_v7, %v730_v34 }
 0x661   :  { %v5298_v35 = vpop.eup %5297 }
 0x662   :  { %733 = vrot.lane.b32.xlu1 %v5298_v35, %s5784_s28 }
 0x6d4   :  { %v734_v36 = vpop.permute.xlu1 %733 }
 0x6d5   :  { %v736_v45 = vmul.f32 %v5296_v24, %v734_v36 }
 0x6d7   :  { %v6197_v48 = vmul.f32 %v6155_v7, %v736_v45 }
 0x6d9   :  { %743 = vrot.lane.b32.xlu1 %v6197_v48, %s5784_s28  ;;  %740 = vrot.lane.b32.xlu0 %v6197_v48, %s5785_s13 }
 0x74b   :  { %v744_v49 = vpop.permute.xlu1 %743  ;;  %v6203_v50 = vpop.permute.xlu0 %740 }
 0x74c   :  { %v746_v55 = vsel %vm388_vm8, %v6203_v50, %v744_v49 }
 0x74d   :  { %v747_v58 = vmul.f32 %v6166_v9, %v746_v55 }
 0x74f   :  { %4792 = vmatmul.mubr.msk.f32.vlgmr.msra.gmra.mxu0 %vm518_vm1, %v747_v58 }
 0x750   :  { %4814 = vmatpush3.msra.mxu0 %v6026_v37  ;;  %4829 = vmatprep.mubr.msk.f32.mxu0 %vm5783_vm7, %v5782_v1 }
 0x751   :  { %4815 = vmatprep.subr.mxu0 %v5782_v1 }
 0x752   :  { %4816 = vmatpush3.msra.mxu0 %v6029_v38 }
 0x753   :  { %4817 = vmatprep.subr.mxu0 %v5782_v1 }
 0x754   :  { %4818 = vmatpush3.msra.mxu0 %v6034_v39 }
 0x755   :  { %4819 = vmatprep.subr.mxu0 %v5782_v1 }
 0x756   :  { %4820 = vmatpush3.msra.mxu0 %v6037_v40 }
 0x757   :  { %4821 = vmatprep.subr.mxu0 %v5782_v1 }
 0x758   :  { %4822 = vmatpush3.msra.mxu0 %v6042_v41 }
 0x759   :  { %4823 = vmatprep.subr.mxu0 %v5782_v1 }
 0x75a   :  { %4824 = vmatpush3.msra.mxu0 %v6045_v42 }
 0x75b   :  { %4825 = vmatprep.subr.mxu0 %v5782_v1 }
 0x75c   :  { %4826 = vmatpush3.msra.mxu0 %v6050_v43 }
 0x75d   :  { %4827 = vmatprep.subr.mxu0 %v5782_v1 }
 0x75e   :  { %4828 = vmatpush3.msra.mxu0 %v6053_v44 }
 0x75f   :  { %4851 = vmatprep.subr.mxu0 %v5782_v1 }
 0x80f   :  { %v818_v59 = vpop.f32.mrf.mxu0 }
 0x810   :  { %v822_v57 = vadd.f32 %v818_v59, %v6133_v32 }
 0x811   :  { %v4793_v60 = vpop.f32.mrf.mxu0 }
 0x812   :  { %5299 = vtanh.f32 %v822_v57  ;;  %v4355_v62 = vmul.f32 -1.442695, %v822_v57 }
 0x814   :  { %5301 = vpow2.f32 %v4355_v62 }
 0x81f   :  { %v5300_v61 = vpop.eup %5299 }
 0x820   :  { %832 = vrot.lane.b32.xlu0 %v5300_v61, %s5784_s28 }
 0x821   :  { %v5302_v63 = vpop.eup %5301 }
 0x822   :  { %v826_v0 = vadd.f32 1.0, %v5302_v63 }
 0x824   :  { %5303 = vrcp.f32 %v826_v0 }
 0x831   :  { %v5304_v2 = vpop.eup %5303 }
 0x832   :  { %v830_v5 = vmul.f32 %v5304_v2, %v738_v4 }
 0x892   :  { %v833_v51 = vpop.permute.xlu0 %832 }
 0x893   :  { %v835_v3 = vmul.f32 %v5304_v2, %v833_v51 }
 0x895   :  { %837 = vrot.lane.b32.xlu1 %v835_v3, %s5785_s13 }
 0x907   :  { %v838_v6 = vpop.permute.xlu1 %837 }
 0x908   :  { %v840_v32 = vadd.f32 %v838_v6, %v830_v5 }
 0x90a   :  { %5305 = vtanh.f32 %v840_v32  ;;  %v848_v36 = vmul.f32 %v6155_v7, %v840_v32 }
 0x917   :  { %v5306_v10 = vpop.eup %5305 }
 0x918   :  { %843 = vrot.lane.b32.xlu0 %v5306_v10, %s5784_s28 }
 0x98a   :  { %v844_v12 = vpop.permute.xlu0 %843 }
 0x98b   :  { %v846_v14 = vmul.f32 %v5304_v2, %v844_v12 }
 0x98d   :  { %v6233_v21 = vmul.f32 %v6155_v7, %v846_v14 }
 0x98f   :  { %853 = vrot.lane.b32.xlu0 %v6233_v21, %s5784_s28  ;;  %850 = vrot.lane.b32.xlu1 %v6233_v21, %s5785_s13 }
 0xa01   :  { %v854_v15 = vpop.permute.xlu0 %853  ;;  %v6239_v16 = vpop.permute.xlu1 %850 }
 0xa02   :  { %v856_v17 = vsel %vm388_vm8, %v6239_v16, %v854_v15 }
 0xa03   :  { %v857_v20 = vmul.f32 %v6166_v9, %v856_v17 }
 0xa05   :  { %4811 = vmatmul.mubr.msk.f32.vlgmr.msra.gmra.mxu1 %vm518_vm1, %v857_v20 }
 0xa06   :  { %4833 = vmatpush3.msra.mxu1 %v6026_v37  ;;  %4848 = vmatprep.mubr.msk.f32.mxu1 %vm5783_vm7, %v5782_v1 }
 0xa07   :  { %4834 = vmatprep.subr.mxu1 %v5782_v1 }
 0xa08   :  { %4835 = vmatpush3.msra.mxu1 %v6029_v38 }
 0xa09   :  { %4836 = vmatprep.subr.mxu1 %v5782_v1 }
 0xa0a   :  { %4837 = vmatpush3.msra.mxu1 %v6034_v39 }
 0xa0b   :  { %4838 = vmatprep.subr.mxu1 %v5782_v1 }
 0xa0c   :  { %4839 = vmatpush3.msra.mxu1 %v6037_v40 }
 0xa0d   :  { %4840 = vmatprep.subr.mxu1 %v5782_v1 }
 0xa0e   :  { %4841 = vmatpush3.msra.mxu1 %v6042_v41 }
 0xa0f   :  { %4842 = vmatprep.subr.mxu1 %v5782_v1 }
 0xa10   :  { %4843 = vmatpush3.msra.mxu1 %v6045_v42 }
 0xa11   :  { %4844 = vmatprep.subr.mxu1 %v5782_v1 }
 0xa12   :  { %4845 = vmatpush3.msra.mxu1 %v6050_v43 }
 0xa13   :  { %4846 = vmatprep.subr.mxu1 %v5782_v1 }
 0xa14   :  { %4847 = vmatpush3.msra.mxu1 %v6053_v44 }
 0xa15   :  { %4870 = vmatprep.subr.mxu1 %v5782_v1 }
 0xac5   :  { %v934_v22 = vpop.f32.mrf.mxu1 }
 0xac6   :  { %v938_v23 = vadd.f32 %v934_v22, %v6139_v46 }
 0xac7   :  { %v4812_v24 = vpop.f32.mrf.mxu1 }
 0xac8   :  { %5307 = vtanh.f32 %v938_v23  ;;  %v4357_v28 = vmul.f32 -1.442695, %v938_v23 }
 0xaca   :  { %5309 = vpow2.f32 %v4357_v28 }
 0xad5   :  { %v5308_v27 = vpop.eup %5307 }
 0xad6   :  { %948 = vrot.lane.b32.xlu1 %v5308_v27, %s5784_s28 }
 0xad7   :  { %v5310_v29 = vpop.eup %5309 }
 0xad8   :  { %v942_v30 = vadd.f32 1.0, %v5310_v29 }
 0xada   :  { %5311 = vrcp.f32 %v942_v30 }
 0xae7   :  { %v5312_v31 = vpop.eup %5311 }
 0xae8   :  { %v946_v45 = vmul.f32 %v5312_v31, %v848_v36 }
 0xb48   :  { %v949_v34 = vpop.permute.xlu1 %948 }
 0xb49   :  { %v951_v35 = vmul.f32 %v5312_v31, %v949_v34 }
 0xb4b   :  { %953 = vrot.lane.b32.xlu0 %v951_v35, %s5785_s13 }
 0xbbd   :  { %v954_v49 = vpop.permute.xlu0 %953 }
 0xbbe   :  { %v956_v46 = vadd.f32 %v954_v49, %v946_v45 }
 0xbc0   :  { %5313 = vtanh.f32 %v956_v46  ;;  %v964_v14 = vmul.f32 %v6155_v7, %v956_v46 }
 0xbcd   :  { %v5314_v55 = vpop.eup %5313 }
 0xbce   :  { %959 = vrot.lane.b32.xlu1 %v5314_v55, %s5784_s28 }
 0xc40   :  { %v960_v58 = vpop.permute.xlu1 %959 }
 0xc41   :  { %v962_v59 = vmul.f32 %v5312_v31, %v960_v58 }
 0xc43   :  { %v6269_v57 = vmul.f32 %v6155_v7, %v962_v59 }
 0xc45   :  { %969 = vrot.lane.b32.xlu1 %v6269_v57, %s5784_s28  ;;  %966 = vrot.lane.b32.xlu0 %v6269_v57, %s5785_s13 }
 0xcb7   :  { %v970_v60 = vpop.permute.xlu1 %969  ;;  %v6275_v61 = vpop.permute.xlu0 %966 }
 0xcb8   :  { %v972_v62 = vsel %vm388_vm8, %v6275_v61, %v970_v60 }
 0xcb9   :  { %v973_v63 = vmul.f32 %v6166_v9, %v972_v62 }
 0xcbb   :  { %4830 = vmatmul.mubr.msk.f32.vlgmr.msra.gmra.mxu0 %vm518_vm1, %v973_v63 }
 0xcbc   :  { %4852 = vmatpush3.msra.mxu0 %v6026_v37  ;;  %4867 = vmatprep.mubr.msk.f32.mxu0 %vm5783_vm7, %v5782_v1 }
 0xcbd   :  { %4853 = vmatprep.subr.mxu0 %v5782_v1 }
 0xcbe   :  { %4854 = vmatpush3.msra.mxu0 %v6029_v38 }
 0xcbf   :  { %4855 = vmatprep.subr.mxu0 %v5782_v1 }
 0xcc0   :  { %4856 = vmatpush3.msra.mxu0 %v6034_v39 }
 0xcc1   :  { %4857 = vmatprep.subr.mxu0 %v5782_v1 }
 0xcc2   :  { %4858 = vmatpush3.msra.mxu0 %v6037_v40 }
 0xcc3   :  { %4859 = vmatprep.subr.mxu0 %v5782_v1 }
 0xcc4   :  { %4860 = vmatpush3.msra.mxu0 %v6042_v41 }
 0xcc5   :  { %4861 = vmatprep.subr.mxu0 %v5782_v1 }
 0xcc6   :  { %4862 = vmatpush3.msra.mxu0 %v6045_v42 }
 0xcc7   :  { %4863 = vmatprep.subr.mxu0 %v5782_v1 }
 0xcc8   :  { %4864 = vmatpush3.msra.mxu0 %v6050_v43 }
 0xcc9   :  { %4865 = vmatprep.subr.mxu0 %v5782_v1 }
 0xcca   :  { %4866 = vmatpush3.msra.mxu0 %v6053_v44 }
 0xccb   :  { %4889 = vmatprep.subr.mxu0 %v5782_v1 }
 0xd7b   :  { %v1044_v0 = vpop.f32.mrf.mxu0 }
 0xd7c   :  { %v1048_v2 = vadd.f32 %v1044_v0, %v6121_v18 }
 0xd7d   :  { %v4831_v51 = vpop.f32.mrf.mxu0 }
 0xd7e   :  { %5315 = vtanh.f32 %v1048_v2  ;;  %v4359_v4 = vmul.f32 -1.442695, %v1048_v2 }
 0xd80   :  { %5317 = vpow2.f32 %v4359_v4 }
 0xd8b   :  { %v5316_v3 = vpop.eup %5315 }
 0xd8c   :  { %1058 = vrot.lane.b32.xlu0 %v5316_v3, %s5784_s28 }
 0xd8d   :  { %v5318_v5 = vpop.eup %5317 }
 0xd8e   :  { %v1052_v6 = vadd.f32 1.0, %v5318_v5 }
 0xd90   :  { %5319 = vrcp.f32 %v1052_v6 }
 0xd9d   :  { %v5320_v32 = vpop.eup %5319 }
 0xd9e   :  { %v1056_v15 = vmul.f32 %v5320_v32, %v964_v14 }
 0xdfe   :  { %v1059_v10 = vpop.permute.xlu0 %1058 }
 0xdff   :  { %v1061_v12 = vmul.f32 %v5320_v32, %v1059_v10 }
 0xe01   :  { %1063 = vrot.lane.b32.xlu1 %v1061_v12, %s5785_s13 }
 0xe73   :  { %v1064_v17 = vpop.permute.xlu1 %1063 }
 0xe74   :  { %v1066_v18 = vadd.f32 %v1064_v17, %v1056_v15 }
 0xe76   :  { %5321 = vtanh.f32 %v1066_v18 }
 0xe83   :  { %v5322_v20 = vpop.eup %5321 }
 0xe84   :  { %1069 = vrot.lane.b32.xlu0 %v5322_v20, %s5784_s28 }
 0xef6   :  { %v1070_v22 = vpop.permute.xlu0 %1069 }
 0xef7   :  { %v6304_v23 = vmul.f32 %v5320_v32, %v1070_v22 }
 0xef9   :  { %1077 = vrot.lane.b32.xlu0 %v6304_v23, %s5784_s28  ;;  %1074 = vrot.lane.b32.xlu1 %v6304_v23, %s5785_s13 }
 0xf6b   :  { %v1078_v24 = vpop.permute.xlu0 %1077  ;;  %v6310_v27 = vpop.permute.xlu1 %1074 }
 0xf6c   :  { %v1080_v28 = vsel %vm388_vm8, %v6310_v27, %v1078_v24 }
 0xf6d   :  { %v1081_v29 = vmul.f32 %v6166_v9, %v1080_v28 }
 0xf6f   :  { %4849 = vmatmul.mubr.msk.f32.vlgmr.msra.gmra.mxu1 %vm518_vm1, %v1081_v29 }
 0xf70   :  { %4871 = vmatpush3.msra.mxu1 %v6026_v37  ;;  %4886 = vmatprep.mubr.msk.f32.mxu1 %vm5783_vm7, %v5782_v1 }
 0xf71   :  { %4872 = vmatprep.subr.mxu1 %v5782_v1 }
 0xf72   :  { %4873 = vmatpush3.msra.mxu1 %v6029_v38 }
 0xf73   :  { %4874 = vmatprep.subr.mxu1 %v5782_v1 }
 0xf74   :  { %4875 = vmatpush3.msra.mxu1 %v6034_v39 }
 0xf75   :  { %4876 = vmatprep.subr.mxu1 %v5782_v1 }
 0xf76   :  { %4877 = vmatpush3.msra.mxu1 %v6037_v40 }
 0xf77   :  { %4878 = vmatprep.subr.mxu1 %v5782_v1 }
 0xf78   :  { %4879 = vmatpush3.msra.mxu1 %v6042_v41 }
 0xf79   :  { %4880 = vmatprep.subr.mxu1 %v5782_v1 }
 0xf7a   :  { %4881 = vmatpush3.msra.mxu1 %v6045_v42 }
 0xf7b   :  { %4882 = vmatprep.subr.mxu1 %v5782_v1 }
 0xf7c   :  { %4883 = vmatpush3.msra.mxu1 %v6050_v43 }
 0xf7d   :  { %4884 = vmatprep.subr.mxu1 %v5782_v1 }
 0xf7e   :  { %4885 = vmatpush3.msra.mxu1 %v6053_v44 }
 0xf7f   :  { %4908 = vmatprep.subr.mxu1 %v5782_v1 }
0x102f   :  { %v1158_v30 = vpop.f32.mrf.mxu1 }
0x1030   :  { %v1162_v31 = vadd.f32 %v1158_v30, %v6127_v25 }
0x1031   :  { %v4850_v34 = vpop.f32.mrf.mxu1 }
0x1032   :  { %5323 = vtanh.f32 %v1162_v31  ;;  %v4361_v36 = vmul.f32 -1.442695, %v1162_v31 }
0x1034   :  { %5325 = vpow2.f32 %v4361_v36 }
0x103f   :  { %v5324_v35 = vpop.eup %5323 }
0x1040   :  { %1172 = vrot.lane.b32.xlu1 %v5324_v35, %s5784_s28 }
0x1041   :  { %v5326_v45 = vpop.eup %5325 }
0x1042   :  { %v1166_v49 = vadd.f32 1.0, %v5326_v45 }
0x1044   :  { %5327 = vrcp.f32 %v1166_v49 }
0x1051   :  { %v5328_v46 = vpop.eup %5327 }
0x1052   :  { %v1170_v59 = vmul.f32 %v5328_v46, %v1066_v18 }
0x10b2   :  { %v1173_v55 = vpop.permute.xlu1 %1172 }
0x10b3   :  { %v1175_v58 = vmul.f32 %v5328_v46, %v1173_v55 }
0x10b5   :  { %1177 = vrot.lane.b32.xlu0 %v1175_v58, %s5785_s13 }
0x1127   :  { %v1178_v60 = vpop.permute.xlu0 %1177 }
0x1128   :  { %v1180_v62 = vadd.f32 %v1178_v60, %v1170_v59 }
0x112a   :  { %5329 = vtanh.f32 %v1180_v62 }
0x1137   :  { %v5330_v25 = vpop.eup %5329 }
0x1138   :  { %1183 = vrot.lane.b32.xlu1 %v5330_v25, %s5784_s28 }
0x11aa   :  { %v1184_v63 = vpop.permute.xlu1 %1183 }
0x11ab   :  { %v6338_v0 = vmul.f32 %v5328_v46, %v1184_v63 }
0x11ad   :  { %1191 = vrot.lane.b32.xlu1 %v6338_v0, %s5784_s28  ;;  %1188 = vrot.lane.b32.xlu0 %v6338_v0, %s5785_s13 }
0x121f   :  { %v1192_v2 = vpop.permute.xlu1 %1191  ;;  %v6344_v51 = vpop.permute.xlu0 %1188 }
0x1220   :  { %v1194_v3 = vsel %vm388_vm8, %v6344_v51, %v1192_v2 }
0x1221   :  { %v1195_v4 = vmul.f32 %v6166_v9, %v1194_v3 }
0x1223   :  { %4868 = vmatmul.mubr.msk.f32.vlgmr.msra.gmra.mxu0 %vm518_vm1, %v1195_v4 }
0x1224   :  { %4890 = vmatpush3.msra.mxu0 %v6026_v37  ;;  %4905 = vmatprep.mubr.msk.f32.mxu0 %vm5783_vm7, %v5782_v1 }
0x1225   :  { %4891 = vmatprep.subr.mxu0 %v5782_v1 }
0x1226   :  { %4892 = vmatpush3.msra.mxu0 %v6029_v38 }
0x1227   :  { %4893 = vmatprep.subr.mxu0 %v5782_v1 }
0x1228   :  { %4894 = vmatpush3.msra.mxu0 %v6034_v39 }
0x1229   :  { %4895 = vmatprep.subr.mxu0 %v5782_v1 }
0x122a   :  { %4896 = vmatpush3.msra.mxu0 %v6037_v40 }
0x122b   :  { %4897 = vmatprep.subr.mxu0 %v5782_v1 }
0x122c   :  { %4898 = vmatpush3.msra.mxu0 %v6042_v41 }
0x122d   :  { %4899 = vmatprep.subr.mxu0 %v5782_v1 }
0x122e   :  { %4900 = vmatpush3.msra.mxu0 %v6045_v42 }
0x122f   :  { %4901 = vmatprep.subr.mxu0 %v5782_v1 }
0x1230   :  { %4902 = vmatpush3.msra.mxu0 %v6050_v43 }
0x1231   :  { %4903 = vmatprep.subr.mxu0 %v5782_v1 }
0x1232   :  { %4904 = vmatpush3.msra.mxu0 %v6053_v44 }
0x1233   :  { %4927 = vmatprep.subr.mxu0 %v5782_v1 }
0x12e3   :  { %v1266_v5 = vpop.f32.mrf.mxu0 }
0x12e4   :  { %v1270_v6 = vadd.f32 %v1266_v5, %v6118_v13 }
0x12e5   :  { %v4869_v32 = vpop.f32.mrf.mxu0 }
0x12e6   :  { %5331 = vtanh.f32 %v1270_v6  ;;  %v4363_v12 = vmul.f32 -1.442695, %v1270_v6  ;;  %v5517_v32 = vld [vmem:[#allocation2 + $0x38] sm:$0xff] }
0x12e8   :  { %5333 = vpow2.f32 %v4363_v12  ;;  %v5519_v12 = vld [vmem:[#allocation2 + $0x28] sm:$0xff] }
0x12f3   :  { %v5332_v10 = vpop.eup %5331 }
0x12f4   :  { %1280 = vrot.lane.b32.xlu0 %v5332_v10, %s5784_s28  ;;  %v5518_v10 = vld [vmem:[#allocation2 + $0x30] sm:$0xff] }
0x12f5   :  { %v5334_v14 = vpop.eup %5333 }
0x12f6   :  { %v1274_v15 = vadd.f32 1.0, %v5334_v14  ;;  %v5520_v14 = vld [vmem:[#allocation2 + $0x20] sm:$0xff] }
0x12f8   :  { %5335 = vrcp.f32 %v1274_v15 }
0x1305   :  { %v5336_v17 = vpop.eup %5335 }
0x1306   :  { %v1278_v22 = vmul.f32 %v5336_v17, %v1180_v62 }
0x1366   :  { %v1281_v18 = vpop.permute.xlu0 %1280 }
0x1367   :  { %v1283_v20 = vmul.f32 %v5336_v17, %v1281_v18 }
0x1369   :  { %1285 = vrot.lane.b32.xlu1 %v1283_v20, %s5785_s13 }
0x13db   :  { %v1286_v24 = vpop.permute.xlu1 %1285 }
0x13dc   :  { %v1288_v28 = vadd.f32 %v1286_v24, %v1278_v22 }
0x13de   :  { %5337 = vtanh.f32 %v1288_v28 }
0x13eb   :  { %v5338_v13 = vpop.eup %5337 }
0x13ec   :  { %1291 = vrot.lane.b32.xlu0 %v5338_v13, %s5784_s28 }
0x145e   :  { %v1292_v29 = vpop.permute.xlu0 %1291 }
0x145f   :  { %v6372_v30 = vmul.f32 %v5336_v17, %v1292_v29 }
0x1461   :  { %1299 = vrot.lane.b32.xlu0 %v6372_v30, %s5784_s28  ;;  %1296 = vrot.lane.b32.xlu1 %v6372_v30, %s5785_s13 }
0x14d3   :  { %v1300_v31 = vpop.permute.xlu0 %1299  ;;  %v6378_v34 = vpop.permute.xlu1 %1296 }
0x14d4   :  { %v1302_v35 = vsel %vm388_vm8, %v6378_v34, %v1300_v31 }
0x14d5   :  { %v1303_v36 = vmul.f32 %v6166_v9, %v1302_v35 }
0x14d7   :  { %4887 = vmatmul.mubr.msk.f32.vlgmr.msra.gmra.mxu1 %vm518_vm1, %v1303_v36 }
0x14d8   :  { %4909 = vmatpush3.msra.mxu1 %v6026_v37  ;;  %4924 = vmatprep.mubr.msk.f32.mxu1 %vm5783_vm7, %v5782_v1 }
0x14d9   :  { %4910 = vmatprep.subr.mxu1 %v5782_v1 }
0x14da   :  { %4911 = vmatpush3.msra.mxu1 %v6029_v38 }
0x14db   :  { %4912 = vmatprep.subr.mxu1 %v5782_v1 }
0x14dc   :  { %4913 = vmatpush3.msra.mxu1 %v6034_v39 }
0x14dd   :  { %4914 = vmatprep.subr.mxu1 %v5782_v1 }
0x14de   :  { %4915 = vmatpush3.msra.mxu1 %v6037_v40 }
0x14df   :  { %4916 = vmatprep.subr.mxu1 %v5782_v1 }
0x14e0   :  { %4917 = vmatpush3.msra.mxu1 %v6042_v41 }
0x14e1   :  { %4918 = vmatprep.subr.mxu1 %v5782_v1 }
0x14e2   :  { %4919 = vmatpush3.msra.mxu1 %v6045_v42 }
0x14e3   :  { %4920 = vmatprep.subr.mxu1 %v5782_v1 }
0x14e4   :  { %4921 = vmatpush3.msra.mxu1 %v6050_v43 }
0x14e5   :  { %4922 = vmatprep.subr.mxu1 %v5782_v1 }
0x14e6   :  { %4923 = vmatpush3.msra.mxu1 %v6053_v44 }
0x14e7   :  { %4946 = vmatprep.subr.mxu1 %v5782_v1 }
0x1597   :  { %v1380_v37 = vpop.f32.mrf.mxu1 }
0x1598   :  { %v1384_v38 = vadd.f32 %v1380_v37, %v6124_v19 }
0x1599   :  { %v4888_v39 = vpop.f32.mrf.mxu1 }
0x159a   :  { %5339 = vtanh.f32 %v1384_v38  ;;  %v4365_v45 = vmul.f32 -1.442695, %v1384_v38 }
0x159c   :  { %5341 = vpow2.f32 %v4365_v45  ;;  %v5522_v45 = vld [vmem:[#allocation2 + $0x10] sm:$0xff] }
0x15a7   :  { %v5340_v40 = vpop.eup %5339 }
0x15a8   :  { %1394 = vrot.lane.b32.xlu1 %v5340_v40, %s5784_s28  ;;  %v5521_v40 = vld [vmem:[#allocation2 + $0x18] sm:$0xff] }
0x15a9   :  { %v5342_v49 = vpop.eup %5341 }
0x15aa   :  { %v1388_v46 = vadd.f32 1.0, %v5342_v49  ;;  %v5523_v49 = vld [vmem:[#allocation2 + $0x8] sm:$0xff] }
0x15ac   :  { %5343 = vrcp.f32 %v1388_v46  ;;  %v5524_v46 = vld [vmem:[#allocation2] sm:$0xff] }
0x15b9   :  { %v5344_v55 = vpop.eup %5343 }
0x15ba   :  { %v1392_v60 = vmul.f32 %v5344_v55, %v1288_v28 }
0x161a   :  { %v1395_v58 = vpop.permute.xlu1 %1394 }
0x161b   :  { %v1397_v59 = vmul.f32 %v5344_v55, %v1395_v58 }
0x161d   :  { %1399 = vrot.lane.b32.xlu0 %v1397_v59, %s5785_s13 }
0x168f   :  { %v1400_v62 = vpop.permute.xlu0 %1399 }
0x1690   :  { %v1402_v25 = vadd.f32 %v1400_v62, %v1392_v60 }
0x1692   :  { %5345 = vtanh.f32 %v1402_v25 }
0x169f   :  { %v5346_v19 = vpop.eup %5345 }
0x16a0   :  { %1405 = vrot.lane.b32.xlu1 %v5346_v19, %s5784_s28 }
0x1712   :  { %v1406_v63 = vpop.permute.xlu1 %1405 }
0x1713   :  { %v6406_v2 = vmul.f32 %v5344_v55, %v1406_v63 }
0x1715   :  { %1413 = vrot.lane.b32.xlu1 %v6406_v2, %s5784_s28  ;;  %1410 = vrot.lane.b32.xlu0 %v6406_v2, %s5785_s13 }
0x1787   :  { %v1414_v3 = vpop.permute.xlu1 %1413  ;;  %v6412_v4 = vpop.permute.xlu0 %1410 }
0x1788   :  { %v1416_v5 = vsel %vm388_vm8, %v6412_v4, %v1414_v3 }
0x1789   :  { %v1417_v6 = vmul.f32 %v6166_v9, %v1416_v5 }
0x178b   :  { %4906 = vmatmul.mubr.msk.f32.vlgmr.msra.gmra.mxu0 %vm518_vm1, %v1417_v6 }
0x178c   :  { %4928 = vmatpush3.msra.mxu0 %v5517_v32  ;;  %4943 = vmatprep.mubr.msk.f32.mxu0 %vm5783_vm7, %v5782_v1 }
0x178d   :  { %4929 = vmatprep.subr.mxu0 %v5782_v1 }
0x178e   :  { %4930 = vmatpush3.msra.mxu0 %v5518_v10 }
0x178f   :  { %4931 = vmatprep.subr.mxu0 %v5782_v1 }
0x1790   :  { %4932 = vmatpush3.msra.mxu0 %v5519_v12 }
0x1791   :  { %4933 = vmatprep.subr.mxu0 %v5782_v1 }
0x1792   :  { %4934 = vmatpush3.msra.mxu0 %v5520_v14 }
0x1793   :  { %4935 = vmatprep.subr.mxu0 %v5782_v1 }
0x1794   :  { %4936 = vmatpush3.msra.mxu0 %v6042_v41 }
0x1795   :  { %4937 = vmatprep.subr.mxu0 %v5782_v1 }
0x1796   :  { %4938 = vmatpush3.msra.mxu0 %v6045_v42 }
0x1797   :  { %4939 = vmatprep.subr.mxu0 %v5782_v1 }
0x1798   :  { %4940 = vmatpush3.msra.mxu0 %v6050_v43 }
0x1799   :  { %4941 = vmatprep.subr.mxu0 %v5782_v1 }
0x179a   :  { %4942 = vmatpush3.msra.mxu0 %v6053_v44 }
0x184b   :  { %v1488_v15 = vpop.f32.mrf.mxu0 }
0x184c   :  { %v1492_v17 = vadd.f32 %v1488_v15, %v6130_v26 }
0x184d   :  { %v4907_v18 = vpop.f32.mrf.mxu0 }
0x184e   :  { %5347 = vtanh.f32 %v1492_v17  ;;  %v4367_v41 = vmul.f32 -1.442695, %v1492_v17 }
0x1850   :  { %5349 = vpow2.f32 %v4367_v41 }
0x185b   :  { %v5348_v20 = vpop.eup %5347 }
0x185c   :  { %1502 = vrot.lane.b32.xlu0 %v5348_v20, %s5784_s28 }
0x185d   :  { %v5350_v22 = vpop.eup %5349 }
0x185e   :  { %v1496_v42 = vadd.f32 1.0, %v5350_v22 }
0x1860   :  { %5351 = vrcp.f32 %v1496_v42 }
0x186d   :  { %v5352_v24 = vpop.eup %5351 }
0x186e   :  { %v1500_v13 = vmul.f32 %v5352_v24, %v1402_v25 }
0x18ce   :  { %v1503_v28 = vpop.permute.xlu0 %1502 }
0x18cf   :  { %v1505_v43 = vmul.f32 %v5352_v24, %v1503_v28 }
0x18d1   :  { %1507 = vrot.lane.b32.xlu1 %v1505_v43, %s5785_s13 }
0x1943   :  { %v1508_v44 = vpop.permute.xlu1 %1507 }
0x1944   :  { %v1510_v29 = vadd.f32 %v1508_v44, %v1500_v13 }
0x1946   :  { %5353 = vtanh.f32 %v1510_v29 }
0x1953   :  { %v5354_v26 = vpop.eup %5353 }
0x1954   :  { %1513 = vrot.lane.b32.xlu0 %v5354_v26, %s5784_s28 }
0x19c6   :  { %v1514_v31 = vpop.permute.xlu0 %1513 }
0x19c7   :  { %v6435_v35 = vmul.f32 %v5352_v24, %v1514_v31 }
0x19c9   :  { %1521 = vrot.lane.b32.xlu0 %v6435_v35, %s5784_s28  ;;  %1518 = vrot.lane.b32.xlu1 %v6435_v35, %s5785_s13 }
0x1a3b   :  { %v1522_v36 = vpop.permute.xlu0 %1521  ;;  %v6441_v37 = vpop.permute.xlu1 %1518 }
0x1a3c   :  { %v1524_v38 = vsel %vm388_vm8, %v6441_v37, %v1522_v36 }
0x1a3d   :  { %v1525_v39 = vmul.f32 %v6166_v9, %v1524_v38 }
0x1a3f   :  { %4925 = vmatmul.mubr.msk.f32.vlgmr.msra.gmra.mxu1 %vm518_vm1, %v1525_v39 }
0x1a40   :  { %4947 = vmatpush3.msra.mxu1 %v5517_v32  ;;  %4962 = vmatprep.mubr.msk.f32.mxu1 %vm5783_vm7, %v5782_v1 }
0x1a41   :  { %4948 = vmatprep.subr.mxu1 %v5782_v1 }
0x1a42   :  { %4949 = vmatpush3.msra.mxu1 %v5518_v10 }
0x1a43   :  { %4950 = vmatprep.subr.mxu1 %v5782_v1 }
0x1a44   :  { %4951 = vmatpush3.msra.mxu1 %v5519_v12 }
0x1a45   :  { %4952 = vmatprep.subr.mxu1 %v5782_v1 }
0x1a46   :  { %4953 = vmatpush3.msra.mxu1 %v5520_v14 }
0x1a47   :  { %4954 = vmatprep.subr.mxu1 %v5782_v1 }
0x1a48   :  { %4955 = vmatpush3.msra.mxu1 %v5521_v40 }
0x1a49   :  { %4956 = vmatprep.subr.mxu1 %v5782_v1 }
0x1a4a   :  { %4957 = vmatpush3.msra.mxu1 %v5522_v45 }
0x1a4b   :  { %4958 = vmatprep.subr.mxu1 %v5782_v1 }
0x1a4c   :  { %4959 = vmatpush3.msra.mxu1 %v5523_v49 }
0x1a4d   :  { %4960 = vmatprep.subr.mxu1 %v5782_v1 }
0x1a4e   :  { %4961 = vmatpush3.msra.mxu1 %v5524_v46 }
0x1a4f   :  { %4965 = vmatprep.subr.mxu1 %v5782_v1 }
0x1aff   :  { %v1602_v55 = vpop.f32.mrf.mxu1 }
0x1b00   :  { %v1606_v58 = vadd.f32 %v1602_v55, %v6136_v33 }
0x1b01   :  { %v4926_v59 = vpop.f32.mrf.mxu1 }
0x1b02   :  { %5355 = vtanh.f32 %v1606_v58  ;;  %v4369_v62 = vmul.f32 -1.442695, %v1606_v58 }
0x1b04   :  { %5357 = vpow2.f32 %v4369_v62 }
0x1b0f   :  { %v5356_v60 = vpop.eup %5355 }
0x1b10   :  { %1616 = vrot.lane.b32.xlu1 %v5356_v60, %s5784_s28 }
0x1b11   :  { %v5358_v25 = vpop.eup %5357 }
0x1b12   :  { %v1610_v19 = vadd.f32 1.0, %v5358_v25 }
0x1b14   :  { %5359 = vrcp.f32 %v1610_v19 }
0x1b21   :  { %v5360_v63 = vpop.eup %5359 }
0x1b22   :  { %v1614_v6 = vmul.f32 %v5360_v63, %v1510_v29 }
0x1b82   :  { %v1617_v3 = vpop.permute.xlu1 %1616 }
0x1b83   :  { %v1619_v5 = vmul.f32 %v5360_v63, %v1617_v3 }
0x1b85   :  { %1621 = vrot.lane.b32.xlu0 %v1619_v5, %s5785_s13 }
0x1bf7   :  { %v1622_v32 = vpop.permute.xlu0 %1621 }
0x1bf8   :  { %v1624_v10 = vadd.f32 %v1622_v32, %v1614_v6 }
0x1bfa   :  { %5361 = vtanh.f32 %v1624_v10 }
0x1c07   :  { %v5362_v33 = vpop.eup %5361 }
0x1c08   :  { %1627 = vrot.lane.b32.xlu1 %v5362_v33, %s5784_s28  ;;  %v1889_v33 = vrot.slane %v6304_v23, 4  ;;  %v1952_v23 = vld [vmem:[#allocation7 + $0x58] sm:$0xff] }
0x1c7a   :  { %v1628_v12 = vpop.permute.xlu1 %1627 }
0x1c7b   :  { %v6461_v14 = vmul.f32 %v5360_v63, %v1628_v12  ;;  %v1899_v12 = vrot.slane %v6233_v21, 4  ;;  %v1950_v21 = vld [vmem:[#allocation7 + $0x48] sm:$0xff] }
0x1c7d   :  { %1635 = vrot.lane.b32.xlu1 %v6461_v14, %s5784_s28  ;;  %1632 = vrot.lane.b32.xlu0 %v6461_v14, %s5785_s13 }
0x1cef   :  { %v1636_v15 = vpop.permute.xlu1 %1635  ;;  %v6467_v17 = vpop.permute.xlu0 %1632 }
0x1cf0   :  { %v1638_v18 = vsel %vm388_vm8, %v6467_v17, %v1636_v15 }
0x1cf1   :  { %v1639_v20 = vmul.f32 %v6166_v9, %v1638_v18 }
0x1cf3   :  { %4944 = vmatmul.mubr.msk.f32.vlgmr.msra.gmra.mxu0 %vm518_vm1, %v1639_v20 }
0x1cf4   :  { %2051 = vmatprep.mubr.f32.mxu0 %v5782_v1 }
0x1db3   :  { %v1710_v41 = vpop.f32.mrf.mxu0 }
0x1db4   :  { %v1714_v22 = vadd.f32 %v1710_v41, %v6142_v47 }
0x1db5   :  { %v4945_v42 = vpop.f32.mrf.mxu0 }
0x1db6   :  { %5363 = vtanh.f32 %v1714_v22  ;;  %v4371_v28 = vmul.f32 -1.442695, %v1714_v22  ;;  %v1955_v22 = vld [vmem:[#allocation7 + $0x70] sm:$0xff]  ;;  %v1953_v42 = vld [vmem:[#allocation7 + $0x60] sm:$0xff] }
0x1db8   :  { %5365 = vpow2.f32 %v4371_v28  ;;  %v1949_v28 = vld [vmem:[#allocation7 + $0x40] sm:$0xff] }
0x1dc3   :  { %v5364_v24 = vpop.eup %5363 }
0x1dc4   :  { %1724 = vrot.lane.b32.xlu0 %v5364_v24, %s5784_s28  ;;  %v1951_v24 = vld [vmem:[#allocation7 + $0x50] sm:$0xff] }
0x1dc5   :  { %v5366_v43 = vpop.eup %5365 }
0x1dc6   :  { %v1718_v13 = vadd.f32 1.0, %v5366_v43  ;;  %v1948_v43 = vld [vmem:[#allocation7 + $0x38] sm:$0xff] }
0x1dc8   :  { %5367 = vrcp.f32 %v1718_v13  ;;  %v1947_v13 = vld [vmem:[#allocation7 + $0x30] sm:$0xff] }
0x1dd5   :  { %v5368_v44 = vpop.eup %5367 }
0x1dd6   :  { %v1722_v31 = vmul.f32 %v5368_v44, %v1624_v10  ;;  %v1879_v10 = vrot.slane %v6372_v30, 4  ;;  %v1954_v30 = vld [vmem:[#allocation7 + $0x68] sm:$0xff] }
0x1e36   :  { %v1725_v29 = vpop.permute.xlu0 %1724 }
0x1e37   :  { %v1727_v26 = vmul.f32 %v5368_v44, %v1725_v29  ;;  %v1945_v29 = vld [vmem:[#allocation7 + $0x20] sm:$0xff] }
0x1e39   :  { %1729 = vrot.lane.b32.xlu1 %v1727_v26, %s5785_s13  ;;  %v1944_v26 = vld [vmem:[#allocation7 + $0x18] sm:$0xff] }
0x1eab   :  { %v1730_v36 = vpop.permute.xlu1 %1729 }
0x1eac   :  { %v1732_v38 = vadd.f32 %v1730_v36, %v1722_v31  ;;  %v1943_v31 = vld [vmem:[#allocation7 + $0x10] sm:$0xff]  ;;  %v1942_v36 = vld [vmem:[#allocation7 + $0x8] sm:$0xff] }
0x1eae   :  { %5369 = vtanh.f32 %v1732_v38 }
0x1ebb   :  { %v5370_v47 = vpop.eup %5369 }
0x1ebc   :  { %1735 = vrot.lane.b32.xlu0 %v5370_v47, %s5784_s28 }
0x1f2e   :  { %v1736_v39 = vpop.permute.xlu0 %1735 }
0x1f2f   :  { %v1738_v40 = vmul.f32 %v5368_v44, %v1736_v39  ;;  %v1946_v44 = vld [vmem:[#allocation7 + $0x28] sm:$0xff] }
0x1f31   :  { %1743 = vrot.lane.b32.xlu0 %v1738_v40, %s5784_s28  ;;  %1740 = vrot.lane.b32.xlu1 %v1738_v40, %s5785_s13  ;;  %v1859_v32 = vrot.slane %v1738_v40, 4 }
0x1fa3   :  { %v1744_v45 = vpop.permute.xlu0 %1743  ;;  %v6480_v49 = vpop.permute.xlu1 %1740 }
0x1fa4   :  { %v1746_v46 = vsel %vm388_vm8, %v6480_v49, %v1744_v45  ;;  %v6503_v45 = vld [vmem:[#allocation8 + $0x38] sm:$0xff] }
0x1fa5   :  { %v1747_v55 = vmul.f32 %v6166_v9, %v1746_v46  ;;  %v1904_v46 = vrot.slane %v6197_v48, 4  ;;  %v6520_v48 = vld [vmem:[#allocation8 + $0x20] sm:$0xff] }
0x1fa7   :  { %4963 = vmatmul.mubr.msk.f32.vlgmr.msra.gmra.mxu1 %vm518_vm1, %v1747_v55  ;;  %v6509_v55 = vld [vmem:[#allocation8 + $0x30] sm:$0xff] }
0x1fa8   :  { %4981 = vmatprep.mubr.msk.f32.mxu1 %vm5783_vm7, %v5782_v1  ;;  %4966 = vmatpush3.msra.mxu1 %v6503_v45 }
0x1fa9   :  { %4967 = vmatprep.subr.mxu1 %v5782_v1 }
0x1faa   :  { %4968 = vmatpush3.msra.mxu1 %v6509_v55 }
0x1fab   :  { %4969 = vmatprep.subr.mxu1 %v5782_v1 }
0x2067   :  { %v1824_v58 = vpop.f32.mrf.mxu1 }
0x2068   :  { %v1828_v59 = vadd.f32 %v1824_v58, %v6146_v52  ;;  %v1869_v52 = vrot.slane %v6435_v35, 4  ;;  %v1956_v35 = vld [vmem:[#allocation7 + $0x78] sm:$0xff]  ;;  %v1864_v58 = vrot.slane %v6461_v14, 4  ;;  %v6530_v14 = vld [vmem:[#allocation8 + $0x10] sm:$0xff] }
0x2069   :  { %v4964_v60 = vpop.f32.mrf.mxu1  ;;  %2003 = vmatprep.subr.mxu0 %v1956_v35 }
0x206a   :  { %5371 = vtanh.f32 %v1828_v59  ;;  %v4373_v25 = vmul.f32 -1.442695, %v1828_v59  ;;  %2004 = vmatpush1.msra.mxu0 %v1955_v22  ;;  %v6515_v59 = vld [vmem:[#allocation8 + $0x28] sm:$0xff]  ;;  %v1874_v60 = vrot.slane %v6406_v2, 4  ;;  %v6538_v2 = vld [vmem:[#allocation8] sm:$0xff] }
0x206b   :  { %2005 = vmatprep.subr.mxu0 %v1954_v30  ;;  %4970 = vmatpush3.msra.mxu1 %v6515_v59 }
0x206c   :  { %5373 = vpow2.f32 %v4373_v25  ;;  %2006 = vmatpush1.msra.mxu0 %v1953_v42  ;;  %4971 = vmatprep.subr.mxu1 %v5782_v1  ;;  %v1884_v25 = vrot.slane %v6338_v0, 4  ;;  %v1912_v0 = vrot.slane %v6158_v8, 4 }
0x206d   :  { %2007 = vmatprep.subr.mxu0 %v1952_v23  ;;  %4972 = vmatpush3.msra.mxu1 %v6520_v48 }
0x206e   :  { %2008 = vmatpush1.msra.mxu0 %v1951_v24  ;;  %4973 = vmatprep.subr.mxu1 %v5782_v1 }
0x206f   :  { %2009 = vmatprep.subr.mxu0 %v1950_v21 }
0x2070   :  { %2010 = vmatpush1.msra.mxu0 %v1949_v28 }
0x2071   :  { %2011 = vmatprep.subr.mxu0 %v1948_v43 }
0x2072   :  { %2012 = vmatpush1.msra.mxu0 %v1947_v13 }
0x2073   :  { %2013 = vmatprep.subr.mxu0 %v1946_v44 }
0x2074   :  { %2014 = vmatpush1.msra.mxu0 %v1945_v29 }
0x2075   :  { %2015 = vmatprep.subr.mxu0 %v1944_v26 }
0x2076   :  { %2016 = vmatpush1.msra.mxu0 %v1943_v31 }
0x2077   :  { %v5372_v62 = vpop.eup %5371  ;;  %2017 = vmatprep.subr.mxu0 %v1942_v36 }
0x2078   :  { %1838 = vrot.lane.b32.xlu1 %v5372_v62, %s5784_s28  ;;  %v6525_v62 = vld [vmem:[#allocation8 + $0x18] sm:$0xff] }
0x2079   :  { %v5374_v19 = vpop.eup %5373  ;;  %4974 = vmatpush3.msra.mxu1 %v6525_v62 }
0x207a   :  { %v1832_v63 = vadd.f32 1.0, %v5374_v19  ;;  %4975 = vmatprep.subr.mxu1 %v5782_v1  ;;  %v6535_v19 = vld [vmem:[#allocation8 + $0x8] sm:$0xff] }
0x207b   :  { %4976 = vmatpush3.msra.mxu1 %v6530_v14 }
0x207c   :  { %5375 = vrcp.f32 %v1832_v63  ;;  %4977 = vmatprep.subr.mxu1 %v5782_v1  ;;  %v1894_v63 = vrot.slane %v6269_v57, 4 }
0x207d   :  { %4978 = vmatpush3.msra.mxu1 %v6535_v19 }
0x207e   :  { %4979 = vmatprep.subr.mxu1 %v5782_v1 }
0x207f   :  { %4980 = vmatpush3.msra.mxu1 %v6538_v2 }
0x2080   :  { %4982 = vmatmul.mubr.f32.vlgmr.msra.gmra.mxu1 %v5782_v1  ;;  %4984 = vmatprep.subr.mxu1 %v5782_v1 }
0x2081   :  { %4985 = vmatpush3.msra.mxu1 %v6503_v45  ;;  %5000 = vmatprep.mubr.msk.f32.mxu1 %vm5783_vm7, %v5782_v1 }
0x2082   :  { %4986 = vmatprep.subr.mxu1 %v5782_v1 }
0x2083   :  { %4987 = vmatpush3.msra.mxu1 %v6509_v55 }
0x2084   :  { %4988 = vmatprep.subr.mxu1 %v5782_v1 }
0x2085   :  { %4989 = vmatpush3.msra.mxu1 %v6515_v59 }
0x2086   :  { %4990 = vmatprep.subr.mxu1 %v5782_v1 }
0x2087   :  { %4991 = vmatpush3.msra.mxu1 %v6520_v48 }
0x2088   :  { %4992 = vmatprep.subr.mxu1 %v5782_v1 }
0x2089   :  { %v5376_v3 = vpop.eup %5375  ;;  %4993 = vmatpush3.msra.mxu1 %v6525_v62 }
0x208a   :  { %v1836_v15 = vmul.f32 %v5376_v3, %v1732_v38  ;;  %v1941_v38 = vld [vmem:[#allocation7] sm:$0xff]  ;;  %4994 = vmatprep.subr.mxu1 %v5782_v1 }
0x208b   :  { %2018 = vmatpush1.msra.mxu0 %v1941_v38  ;;  %4995 = vmatpush3.msra.mxu1 %v6530_v14  ;;  %v1957_v38 = vld [vmem:[#allocation10] sm:$0x3] }
0x208c   :  { %5003 = vmatprep.subr.mxu0 %v5782_v1  ;;  %4996 = vmatprep.subr.mxu1 %v5782_v1 }
0x208d   :  { %4997 = vmatpush3.msra.mxu1 %v6535_v19 }
0x208e   :  { %4998 = vmatprep.subr.mxu1 %v5782_v1 }
0x208f   :  { %4999 = vmatpush3.msra.mxu1 %v6538_v2 }
0x2090   :  { %5022 = vmatprep.subr.mxu1 %v5782_v1 }
0x20ea   :  { %v1839_v5 = vpop.permute.xlu1 %1838 }
0x20eb   :  { %v1841_v6 = vmul.f32 %v5376_v3, %v1839_v5 }
0x20ed   :  { %1843 = vrot.lane.b32.xlu0 %v1841_v6, %s5785_s13 }
0x20f1   :  { %1860 = vrot.lane.b32.xlu0 %v1859_v32, %s5784_s28 }
0x20f5   :  { %1870 = vrot.lane.b32.xlu0 %v1869_v52, %s5784_s28 }
0x20f9   :  { %1880 = vrot.lane.b32.xlu0 %v1879_v10, %s5784_s28 }
0x20fd   :  { %1890 = vrot.lane.b32.xlu0 %v1889_v33, %s5784_s28 }
0x2101   :  { %1900 = vrot.lane.b32.xlu0 %v1899_v12, %s5784_s28 }
0x2140   :  { %v2163_v31 = vpop.f32.mrf.mxu1 }
0x2142   :  { %v4983_v36 = vpop.f32.mrf.mxu1 }
0x215f   :  { %v1844_v18 = vpop.permute.xlu0 %1843 }
0x2160   :  { %v1846_v20 = vadd.f32 %v1844_v18, %v1836_v15 }
0x2162   :  { %5377 = vtanh.f32 %v1846_v20 }
0x2163   :  { %v1861_v8 = vpop.permute.xlu0 %1860 }
0x2167   :  { %v1871_v57 = vpop.permute.xlu0 %1870 }
0x2168   :  { %v1873_v52 = vsel %vm388_vm8, %v6275_v61, %v1871_v57 }
0x2169   :  { %v1921_v12 = vrot.slane %v1873_v52, 4 }
0x216b   :  { %v1881_v5 = vpop.permute.xlu0 %1880 }
0x216f   :  { %v5378_v41 = vpop.eup %5377  ;;  %v1891_v15 = vpop.permute.xlu0 %1890 }
0x2170   :  { %1849 = vrot.lane.b32.xlu1 %v5378_v41, %s5784_s28 }
0x2173   :  { %v1901_v35 = vpop.permute.xlu0 %1900 }
0x21e2   :  { %v1850_v47 = vpop.permute.xlu1 %1849 }
0x21e3   :  { %v1852_v39 = vmul.f32 %v5376_v3, %v1850_v47  ;;  %v1863_v3 = vsel %vm388_vm8, %v6203_v50, %v1861_v8  ;;  %v1883_v50 = vsel %vm388_vm8, %v6344_v51, %v1881_v5  ;;  %v1893_v51 = vsel %vm388_vm8, %v6412_v4, %v1891_v15 }
0x21e4   :  { %v1918_v6 = vrot.slane %v1863_v3, 4  ;;  %v1924_v20 = vrot.slane %v1883_v50, 4  ;;  %v1927_v30 = vrot.slane %v1893_v51, 4  ;;  %v1966_v47 = vrot.slane %v1957_v38, %v384_v54 }
0x21e5   :  { %v1854_v40 = vrot.slane %v1852_v39, 4  ;;  %1909 = vrot.lane.b32.xlu0 %v1852_v39, %s5785_s13 }
0x21e7   :  { %1855 = vrot.lane.b32.xlu1 %v1854_v40, %s5784_s28 }
0x21e9   :  { %1905 = vrot.lane.b32.xlu0 %v1904_v46, %s5784_s28  ;;  %v1962_v46 = vrot.slane %v1957_v38, %v380_v56 }
0x21eb   :  { %1865 = vrot.lane.b32.xlu1 %v1864_v58, %s5784_s28 }
0x21ef   :  { %1875 = vrot.lane.b32.xlu1 %v1874_v60, %s5784_s28 }
0x21f3   :  { %1885 = vrot.lane.b32.xlu1 %v1884_v25, %s5784_s28 }
0x21f7   :  { %1895 = vrot.lane.b32.xlu1 %v1894_v63, %s5784_s28 }
0x21fb   :  { %1913 = vrot.lane.b32.xlu1 %v1912_v0, %s5784_s28 }
0x2257   :  { %v1910_v23 = vpop.permute.xlu0 %1909 }
0x2259   :  { %v1856_v32 = vpop.permute.xlu1 %1855 }
0x225a   :  { %v1858_v10 = vsel %vm388_vm8, %v6168_v11, %v1856_v32 }
0x225b   :  { %v1935_v33 = vsel %vm516_vm9, %v1858_v10, %v1918_v6  ;;  %v1906_v43 = vpop.permute.xlu0 %1905 }
0x225c   :  { %4374 = vmatmul.mubr.msk.f32.vlgmr.msra.gmra.mxu0 %vm518_vm1, %v1935_v33 }
0x225d   :  { %v1866_v18 = vpop.permute.xlu1 %1865  ;;  %2057 = vmatprep.mubr.f32.mxu0 %v5782_v1  ;;  %5004 = vmatpush3.msra.mxu0 %v6503_v45 }
0x225e   :  { %v1868_v61 = vsel %vm388_vm8, %v6239_v16, %v1866_v18  ;;  %5005 = vmatprep.subr.mxu0 %v5782_v1 }
0x225f   :  { %v1936_v11 = vsel %vm516_vm9, %v1868_v61, %v1921_v12  ;;  %5006 = vmatpush3.msra.mxu0 %v6509_v55 }
0x2260   :  { %4375 = vmatmul.mubr.msk.f32.gmra.mxu0 %vm518_vm1, %v1936_v11  ;;  %5007 = vmatprep.subr.mxu0 %v5782_v1 }
0x2261   :  { %v1876_v41 = vpop.permute.xlu1 %1875  ;;  %2063 = vmatprep.mubr.f32.mxu0 %v5782_v1  ;;  %5008 = vmatpush3.msra.mxu0 %v6515_v59 }
0x2262   :  { %v1878_v16 = vsel %vm388_vm8, %v6310_v27, %v1876_v41  ;;  %5009 = vmatprep.subr.mxu0 %v5782_v1  ;;  %v1903_v27 = vsel %vm388_vm8, %v6467_v17, %v1901_v35 }
0x2263   :  { %v1937_v22 = vsel %vm516_vm9, %v1878_v16, %v1924_v20  ;;  %5010 = vmatpush3.msra.mxu0 %v6520_v48  ;;  %v1930_v21 = vrot.slane %v1903_v27, 4 }
0x2264   :  { %4376 = vmatmul.mubr.msk.f32.gmra.mxu0 %vm518_vm1, %v1937_v22  ;;  %5011 = vmatprep.subr.mxu0 %v5782_v1 }
0x2265   :  { %v1886_v42 = vpop.permute.xlu1 %1885  ;;  %2069 = vmatprep.mubr.f32.mxu0 %v5782_v1  ;;  %5012 = vmatpush3.msra.mxu0 %v6525_v62 }
0x2266   :  { %v1888_v4 = vsel %vm388_vm8, %v6378_v34, %v1886_v42  ;;  %5013 = vmatprep.subr.mxu0 %v5782_v1 }
0x2267   :  { %v1938_v24 = vsel %vm516_vm9, %v1888_v4, %v1927_v30  ;;  %5014 = vmatpush3.msra.mxu0 %v6530_v14 }
0x2268   :  { %4377 = vmatmul.mubr.msk.f32.gmra.mxu0 %vm518_vm1, %v1938_v24  ;;  %5015 = vmatprep.subr.mxu0 %v5782_v1 }
0x2269   :  { %v1896_v28 = vpop.permute.xlu1 %1895  ;;  %2075 = vmatprep.mubr.f32.mxu0 %v5782_v1  ;;  %5016 = vmatpush3.msra.mxu0 %v6535_v19 }
0x226a   :  { %v1898_v34 = vsel %vm388_vm8, %v6441_v37, %v1896_v28  ;;  %5017 = vmatprep.subr.mxu0 %v5782_v1  ;;  %v1908_v37 = vsel %vm388_vm8, %v6480_v49, %v1906_v43 }
0x226b   :  { %v1939_v17 = vsel %vm516_vm9, %v1898_v34, %v1930_v21  ;;  %5018 = vmatpush3.msra.mxu0 %v6538_v2 }
0x226c   :  { %4378 = vmatmul.mubr.msk.f32.gmra.mxu0 %vm518_vm1, %v1939_v17  ;;  %5041 = vmatprep.subr.mxu0 %v5782_v1 }
0x226d   :  { %v1914_v13 = vpop.permute.xlu1 %1913  ;;  %2081 = vmatprep.mubr.f32.mxu0 %v5782_v1 }
0x226e   :  { %v1916_v44 = vsel %vm388_vm8, %v1910_v23, %v1914_v13 }
0x226f   :  { %v1933_v29 = vrot.slane %v1916_v44, 4 }
0x2271   :  { %v1940_v26 = vsel %vm516_vm9, %v1908_v37, %v1933_v29 }
0x2272   :  { %4379 = vmatmul.mubr.msk.f32.gmra.mxu0 %vm518_vm1, %v1940_v26 }
0x2273   :  { %5019 = vmatprep.mubr.msk.f32.mxu0 %vm5783_vm7, %v5782_v1 }
0x231c   :  { %v2053_v39 = vpop.f32.mrf.mxu0 }
0x231d   :  { %v2054_v23 = vadd.f32 %v2053_v39, %v1962_v46 }
0x231e   :  { %v2055_v40 = vpop.f32.mrf.mxu0 }
0x231f   :  { %v2056_v58 = vadd.f32 %v2055_v40, %v1966_v47  ;;  %v2204_v44 = vrot.slane %v2054_v23, 4 }
0x2320   :  { %v2059_v49 = vpop.f32.mrf.mxu0 }
0x2321   :  { %v2060_v60 = vadd.f32 %v2059_v49, %v1962_v46  ;;  %v3323_v34 = vrot.slane %v2056_v58, 4 }
0x2322   :  { %v2061_v25 = vpop.f32.mrf.mxu0 }
0x2323   :  { %v2062_v63 = vadd.f32 %v2061_v25, %v1966_v47  ;;  %v2430_v22 = vrot.slane %v2060_v60, 4 }
0x2324   :  { %v2065_v0 = vpop.f32.mrf.mxu0 }
0x2325   :  { %v2066_v8 = vadd.f32 %v2065_v0, %v1962_v46  ;;  %v3101_v11 = vrot.slane %v2062_v63, 4 }
0x2326   :  { %v2067_v57 = vpop.f32.mrf.mxu0 }
0x2327   :  { %v2068_v3 = vadd.f32 %v2067_v57, %v1966_v47  ;;  %v2654_v12 = vrot.slane %v2066_v8, 4 }
0x2328   :  { %v2071_v5 = vpop.f32.mrf.mxu0 }
0x2329   :  { %v2072_v6 = vadd.f32 %v2071_v5, %v1962_v46  ;;  %v2879_v52 = vrot.slane %v2068_v3, 4 }
0x232a   :  { %v2073_v32 = vpop.f32.mrf.mxu0 }
0x232b   :  { %v2876_v10 = vrot.slane %v2072_v6, 4  ;;  %v2074_v54 = vadd.f32 %v2073_v32, %v1966_v47  ;;  %v6630_v33 = vsel %vm516_vm9, %v2072_v6, %v2068_v3 }
0x232c   :  { %v2077_v56 = vpop.f32.mrf.mxu0 }
0x232d   :  { %v2657_v15 = vrot.slane %v2074_v54, 4  ;;  %v2078_v18 = vadd.f32 %v2077_v56, %v1962_v46  ;;  %v6633_v50 = vsel %vm516_vm9, %v2066_v8, %v2074_v54  ;;  %v6636_v61 = vsel %vm516_vm9, %v2876_v10, %v2879_v52 }
0x232e   :  { %v2079_v20 = vpop.f32.mrf.mxu0 }
0x232f   :  { %v3098_v41 = vrot.slane %v2078_v18, 4  ;;  %v2080_v51 = vadd.f32 %v2079_v20, %v1966_v47  ;;  %v6639_v16 = vsel %vm516_vm9, %v2654_v12, %v2657_v15  ;;  %v6642_v35 = vsel %vm516_vm9, %v2078_v18, %v2062_v63 }
0x2331   :  { %v2433_v30 = vrot.slane %v2080_v51, 4  ;;  %v6645_v42 = vsel %vm516_vm9, %v2060_v60, %v2080_v51  ;;  %v6648_v27 = vsel %vm516_vm9, %v3098_v41, %v3101_v11 }
0x2332   :  { %v2083_v4 = vpop.f32.mrf.mxu0 }
0x2333   :  { %v2084_v24 = vadd.f32 %v2083_v4, %v1962_v46  ;;  %v6651_v21 = vsel %vm516_vm9, %v2430_v22, %v2433_v30 }
0x2334   :  { %v2085_v28 = vpop.f32.mrf.mxu0 }
0x2335   :  { %v3320_v17 = vrot.slane %v2084_v24, 4  ;;  %v2086_v43 = vadd.f32 %v2085_v28, %v1966_v47  ;;  %v6654_v13 = vsel %vm516_vm9, %v2084_v24, %v2056_v58 }
0x2337   :  { %v2207_v29 = vrot.slane %v2086_v43, 4  ;;  %v2096_v37 = vsel %vm516_vm9, %v2054_v23, %v2086_v43  ;;  %v6658_v26 = vsel %vm516_vm9, %v3320_v17, %v3323_v34 }
0x2338   :  { %v2167_v36 = vadd.f32 %v2163_v31, %v2096_v37 }
0x2339   :  { %v2209_v38 = vsel %vm516_vm9, %v2204_v44, %v2207_v29 }
0x233a   :  { %5379 = vtanh.f32 %v2167_v36  ;;  %v4380_v40 = vmul.f32 -1.442695, %v2167_v36 }
0x233c   :  { %5381 = vpow2.f32 %v4380_v40 }
0x2347   :  { %v5380_v39 = vpop.eup %5379 }
0x2348   :  { %2177 = vrot.lane.b32.xlu1 %v5380_v39, %s5784_s28 }
0x2349   :  { %v5382_v47 = vpop.eup %5381 }
0x234a   :  { %v2171_v46 = vadd.f32 1.0, %v5382_v47 }
0x234c   :  { %5383 = vrcp.f32 %v2171_v46 }
0x2359   :  { %v5384_v58 = vpop.eup %5383 }
0x235a   :  { %v2175_v25 = vmul.f32 0.0, %v5384_v58 }
0x23ba   :  { %v2178_v49 = vpop.permute.xlu1 %2177 }
0x23bb   :  { %v2180_v60 = vmul.f32 %v5384_v58, %v2178_v49 }
0x23bd   :  { %2182 = vrot.lane.b32.xlu0 %v2180_v60, %s5785_s13 }
0x242f   :  { %v2183_v63 = vpop.permute.xlu0 %2182 }
0x2430   :  { %v2185_v0 = vadd.f32 %v2183_v63, %v2175_v25 }
0x2432   :  { %5385 = vtanh.f32 %v2185_v0  ;;  %v2193_v22 = vmul.f32 %v6155_v7, %v2185_v0 }
0x243f   :  { %v5386_v31 = vpop.eup %5385 }
0x2440   :  { %2188 = vrot.lane.b32.xlu1 %v5386_v31, %s5784_s28 }
0x24b2   :  { %v2189_v8 = vpop.permute.xlu1 %2188 }
0x24b3   :  { %v2191_v57 = vmul.f32 %v5384_v58, %v2189_v8 }
0x24b5   :  { %v6665_v3 = vmul.f32 %v6155_v7, %v2191_v57 }
0x24b7   :  { %2198 = vrot.lane.b32.xlu1 %v6665_v3, %s5784_s28  ;;  %2195 = vrot.lane.b32.xlu0 %v6665_v3, %s5785_s13 }
0x2529   :  { %v2199_v5 = vpop.permute.xlu1 %2198  ;;  %v6671_v6 = vpop.permute.xlu0 %2195 }
0x252a   :  { %v2201_v32 = vsel %vm388_vm8, %v6671_v6, %v2199_v5 }
0x252b   :  { %v2202_v52 = vmul.f32 %v6166_v9, %v2201_v32 }
0x252d   :  { %5001 = vmatmul.mubr.msk.f32.vlgmr.msra.gmra.mxu1 %vm518_vm1, %v2202_v52 }
0x252e   :  { %5023 = vmatpush3.msra.mxu1 %v6503_v45  ;;  %5038 = vmatprep.mubr.msk.f32.mxu1 %vm5783_vm7, %v5782_v1 }
0x252f   :  { %5024 = vmatprep.subr.mxu1 %v5782_v1 }
0x2530   :  { %5025 = vmatpush3.msra.mxu1 %v6509_v55 }
0x2531   :  { %5026 = vmatprep.subr.mxu1 %v5782_v1 }
0x2532   :  { %5027 = vmatpush3.msra.mxu1 %v6515_v59 }
0x2533   :  { %5028 = vmatprep.subr.mxu1 %v5782_v1 }
0x2534   :  { %5029 = vmatpush3.msra.mxu1 %v6520_v48 }
0x2535   :  { %5030 = vmatprep.subr.mxu1 %v5782_v1 }
0x2536   :  { %5031 = vmatpush3.msra.mxu1 %v6525_v62 }
0x2537   :  { %5032 = vmatprep.subr.mxu1 %v5782_v1 }
0x2538   :  { %5033 = vmatpush3.msra.mxu1 %v6530_v14 }
0x2539   :  { %5034 = vmatprep.subr.mxu1 %v5782_v1 }
0x253a   :  { %5035 = vmatpush3.msra.mxu1 %v6535_v19 }
0x253b   :  { %5036 = vmatprep.subr.mxu1 %v5782_v1 }
0x253c   :  { %5037 = vmatpush3.msra.mxu1 %v6538_v2 }
0x253d   :  { %5060 = vmatprep.subr.mxu1 %v5782_v1 }
0x25ed   :  { %v2279_v10 = vpop.f32.mrf.mxu1 }
0x25ee   :  { %v2283_v54 = vadd.f32 %v2279_v10, %v2209_v38 }
0x25ef   :  { %v5002_v12 = vpop.f32.mrf.mxu1 }
0x25f0   :  { %5387 = vtanh.f32 %v2283_v54  ;;  %v4382_v15 = vmul.f32 -1.442695, %v2283_v54 }
0x25f2   :  { %5389 = vpow2.f32 %v4382_v15 }
0x25fd   :  { %v5388_v56 = vpop.eup %5387 }
0x25fe   :  { %2293 = vrot.lane.b32.xlu0 %v5388_v56, %s5784_s28 }
0x25ff   :  { %v5390_v18 = vpop.eup %5389 }
0x2600   :  { %v2287_v11 = vadd.f32 1.0, %v5390_v18 }
0x2602   :  { %5391 = vrcp.f32 %v2287_v11 }
0x260f   :  { %v5392_v20 = vpop.eup %5391 }
0x2610   :  { %v2291_v30 = vmul.f32 %v5392_v20, %v2193_v22 }
0x2670   :  { %v2294_v41 = vpop.permute.xlu0 %2293 }
0x2671   :  { %v2296_v51 = vmul.f32 %v5392_v20, %v2294_v41 }
0x2673   :  { %2298 = vrot.lane.b32.xlu1 %v2296_v51, %s5785_s13 }
0x26e5   :  { %v2299_v4 = vpop.permute.xlu1 %2298 }
0x26e6   :  { %v2301_v23 = vadd.f32 %v2299_v4, %v2291_v30 }
0x26e8   :  { %5393 = vtanh.f32 %v2301_v23  ;;  %v2309_v63 = vmul.f32 %v6155_v7, %v2301_v23 }
0x26f5   :  { %v5394_v24 = vpop.eup %5393 }
0x26f6   :  { %2304 = vrot.lane.b32.xlu0 %v5394_v24, %s5784_s28 }
0x2768   :  { %v2305_v28 = vpop.permute.xlu0 %2304 }
0x2769   :  { %v2307_v34 = vmul.f32 %v5392_v20, %v2305_v28 }
0x276b   :  { %v6700_v17 = vmul.f32 %v6155_v7, %v2307_v34 }
0x276d   :  { %2314 = vrot.lane.b32.xlu0 %v6700_v17, %s5784_s28  ;;  %2311 = vrot.lane.b32.xlu1 %v6700_v17, %s5785_s13 }
0x27df   :  { %v2315_v43 = vpop.permute.xlu0 %2314  ;;  %v6706_v44 = vpop.permute.xlu1 %2311 }
0x27e0   :  { %v2317_v29 = vsel %vm388_vm8, %v6706_v44, %v2315_v43 }
0x27e1   :  { %v2318_v37 = vmul.f32 %v6166_v9, %v2317_v29 }
0x27e3   :  { %5020 = vmatmul.mubr.msk.f32.vlgmr.msra.gmra.mxu0 %vm518_vm1, %v2318_v37 }
0x27e4   :  { %5042 = vmatpush3.msra.mxu0 %v6503_v45  ;;  %5057 = vmatprep.mubr.msk.f32.mxu0 %vm5783_vm7, %v5782_v1 }
0x27e5   :  { %5043 = vmatprep.subr.mxu0 %v5782_v1 }
0x27e6   :  { %5044 = vmatpush3.msra.mxu0 %v6509_v55 }
0x27e7   :  { %5045 = vmatprep.subr.mxu0 %v5782_v1 }
0x27e8   :  { %5046 = vmatpush3.msra.mxu0 %v6515_v59 }
0x27e9   :  { %5047 = vmatprep.subr.mxu0 %v5782_v1 }
0x27ea   :  { %5048 = vmatpush3.msra.mxu0 %v6520_v48 }
0x27eb   :  { %5049 = vmatprep.subr.mxu0 %v5782_v1 }
0x27ec   :  { %5050 = vmatpush3.msra.mxu0 %v6525_v62 }
0x27ed   :  { %5051 = vmatprep.subr.mxu0 %v5782_v1 }
0x27ee   :  { %5052 = vmatpush3.msra.mxu0 %v6530_v14 }
0x27ef   :  { %5053 = vmatprep.subr.mxu0 %v5782_v1 }
0x27f0   :  { %5054 = vmatpush3.msra.mxu0 %v6535_v19 }
0x27f1   :  { %5055 = vmatprep.subr.mxu0 %v5782_v1 }
0x27f2   :  { %5056 = vmatpush3.msra.mxu0 %v6538_v2 }
0x27f3   :  { %5079 = vmatprep.subr.mxu0 %v5782_v1 }
0x28a3   :  { %v2389_v36 = vpop.f32.mrf.mxu0 }
0x28a4   :  { %v2393_v38 = vadd.f32 %v2389_v36, %v6645_v42 }
0x28a5   :  { %v5021_v39 = vpop.f32.mrf.mxu0 }
0x28a6   :  { %5395 = vtanh.f32 %v2393_v38  ;;  %v4384_v47 = vmul.f32 -1.442695, %v2393_v38 }
0x28a8   :  { %5397 = vpow2.f32 %v4384_v47 }
0x28b3   :  { %v5396_v40 = vpop.eup %5395 }
0x28b4   :  { %2403 = vrot.lane.b32.xlu1 %v5396_v40, %s5784_s28 }
0x28b5   :  { %v5398_v46 = vpop.eup %5397 }
0x28b6   :  { %v2397_v58 = vadd.f32 1.0, %v5398_v46 }
0x28b8   :  { %5399 = vrcp.f32 %v2397_v58 }
0x28c5   :  { %v5400_v49 = vpop.eup %5399 }
0x28c6   :  { %v2401_v0 = vmul.f32 %v5400_v49, %v2309_v63 }
0x2926   :  { %v2404_v60 = vpop.permute.xlu1 %2403 }
0x2927   :  { %v2406_v25 = vmul.f32 %v5400_v49, %v2404_v60 }
0x2929   :  { %2408 = vrot.lane.b32.xlu0 %v2406_v25, %s5785_s13 }
0x299b   :  { %v2409_v31 = vpop.permute.xlu0 %2408 }
0x299c   :  { %v2411_v42 = vadd.f32 %v2409_v31, %v2401_v0 }
0x299e   :  { %5401 = vtanh.f32 %v2411_v42  ;;  %v2419_v23 = vmul.f32 %v6155_v7, %v2411_v42 }
0x29ab   :  { %v5402_v8 = vpop.eup %5401 }
0x29ac   :  { %2414 = vrot.lane.b32.xlu1 %v5402_v8, %s5784_s28 }
0x2a1e   :  { %v2415_v57 = vpop.permute.xlu1 %2414 }
0x2a1f   :  { %v2417_v5 = vmul.f32 %v5400_v49, %v2415_v57 }
0x2a21   :  { %v6736_v32 = vmul.f32 %v6155_v7, %v2417_v5 }
0x2a23   :  { %2424 = vrot.lane.b32.xlu1 %v6736_v32, %s5784_s28  ;;  %2421 = vrot.lane.b32.xlu0 %v6736_v32, %s5785_s13 }
0x2a95   :  { %v2425_v52 = vpop.permute.xlu1 %2424  ;;  %v6742_v10 = vpop.permute.xlu0 %2421 }
0x2a96   :  { %v2427_v54 = vsel %vm388_vm8, %v6742_v10, %v2425_v52 }
0x2a97   :  { %v2428_v12 = vmul.f32 %v6166_v9, %v2427_v54 }
0x2a99   :  { %5039 = vmatmul.mubr.msk.f32.vlgmr.msra.gmra.mxu1 %vm518_vm1, %v2428_v12 }
0x2a9a   :  { %5061 = vmatpush3.msra.mxu1 %v6503_v45  ;;  %5076 = vmatprep.mubr.msk.f32.mxu1 %vm5783_vm7, %v5782_v1 }
0x2a9b   :  { %5062 = vmatprep.subr.mxu1 %v5782_v1 }
0x2a9c   :  { %5063 = vmatpush3.msra.mxu1 %v6509_v55 }
0x2a9d   :  { %5064 = vmatprep.subr.mxu1 %v5782_v1 }
0x2a9e   :  { %5065 = vmatpush3.msra.mxu1 %v6515_v59 }
0x2a9f   :  { %5066 = vmatprep.subr.mxu1 %v5782_v1 }
0x2aa0   :  { %5067 = vmatpush3.msra.mxu1 %v6520_v48 }
0x2aa1   :  { %5068 = vmatprep.subr.mxu1 %v5782_v1 }
0x2aa2   :  { %5069 = vmatpush3.msra.mxu1 %v6525_v62 }
0x2aa3   :  { %5070 = vmatprep.subr.mxu1 %v5782_v1 }
0x2aa4   :  { %5071 = vmatpush3.msra.mxu1 %v6530_v14 }
0x2aa5   :  { %5072 = vmatprep.subr.mxu1 %v5782_v1 }
0x2aa6   :  { %5073 = vmatpush3.msra.mxu1 %v6535_v19 }
0x2aa7   :  { %5074 = vmatprep.subr.mxu1 %v5782_v1 }
0x2aa8   :  { %5075 = vmatpush3.msra.mxu1 %v6538_v2 }
0x2aa9   :  { %5098 = vmatprep.subr.mxu1 %v5782_v1 }
0x2b59   :  { %v2505_v56 = vpop.f32.mrf.mxu1 }
0x2b5a   :  { %v2509_v15 = vadd.f32 %v2505_v56, %v6651_v21 }
0x2b5b   :  { %v5040_v18 = vpop.f32.mrf.mxu1 }
0x2b5c   :  { %5403 = vtanh.f32 %v2509_v15  ;;  %v4386_v20 = vmul.f32 -1.442695, %v2509_v15 }
0x2b5e   :  { %5405 = vpow2.f32 %v4386_v20 }
0x2b69   :  { %v5404_v11 = vpop.eup %5403 }
0x2b6a   :  { %2519 = vrot.lane.b32.xlu0 %v5404_v11, %s5784_s28 }
0x2b6b   :  { %v5406_v41 = vpop.eup %5405 }
0x2b6c   :  { %v2513_v51 = vadd.f32 1.0, %v5406_v41 }
0x2b6e   :  { %5407 = vrcp.f32 %v2513_v51 }
0x2b7b   :  { %v5408_v22 = vpop.eup %5407 }
0x2b7c   :  { %v2517_v24 = vmul.f32 %v5408_v22, %v2419_v23 }
0x2bdc   :  { %v2520_v30 = vpop.permute.xlu0 %2519 }
0x2bdd   :  { %v2522_v4 = vmul.f32 %v5408_v22, %v2520_v30 }
0x2bdf   :  { %2524 = vrot.lane.b32.xlu1 %v2522_v4, %s5785_s13 }
0x2c51   :  { %v2525_v28 = vpop.permute.xlu1 %2524 }
0x2c52   :  { %v2527_v21 = vadd.f32 %v2525_v28, %v2517_v24 }
0x2c54   :  { %5409 = vtanh.f32 %v2527_v21  ;;  %v2535_v8 = vmul.f32 %v6155_v7, %v2527_v21 }
0x2c61   :  { %v5410_v34 = vpop.eup %5409 }
0x2c62   :  { %2530 = vrot.lane.b32.xlu0 %v5410_v34, %s5784_s28 }
0x2cd4   :  { %v2531_v43 = vpop.permute.xlu0 %2530 }
0x2cd5   :  { %v2533_v29 = vmul.f32 %v5408_v22, %v2531_v43 }
0x2cd7   :  { %v6772_v37 = vmul.f32 %v6155_v7, %v2533_v29 }
0x2cd9   :  { %2540 = vrot.lane.b32.xlu0 %v6772_v37, %s5784_s28  ;;  %2537 = vrot.lane.b32.xlu1 %v6772_v37, %s5785_s13 }
0x2d4b   :  { %v2541_v36 = vpop.permute.xlu0 %2540  ;;  %v6778_v38 = vpop.permute.xlu1 %2537 }
0x2d4c   :  { %v2543_v39 = vsel %vm388_vm8, %v6778_v38, %v2541_v36 }
0x2d4d   :  { %v2544_v40 = vmul.f32 %v6166_v9, %v2543_v39 }
0x2d4f   :  { %5058 = vmatmul.mubr.msk.f32.vlgmr.msra.gmra.mxu0 %vm518_vm1, %v2544_v40 }
0x2d50   :  { %5080 = vmatpush3.msra.mxu0 %v6503_v45  ;;  %5095 = vmatprep.mubr.msk.f32.mxu0 %vm5783_vm7, %v5782_v1 }
0x2d51   :  { %5081 = vmatprep.subr.mxu0 %v5782_v1 }
0x2d52   :  { %5082 = vmatpush3.msra.mxu0 %v6509_v55 }
0x2d53   :  { %5083 = vmatprep.subr.mxu0 %v5782_v1 }
0x2d54   :  { %5084 = vmatpush3.msra.mxu0 %v6515_v59 }
0x2d55   :  { %5085 = vmatprep.subr.mxu0 %v5782_v1 }
0x2d56   :  { %5086 = vmatpush3.msra.mxu0 %v6520_v48 }
0x2d57   :  { %5087 = vmatprep.subr.mxu0 %v5782_v1 }
0x2d58   :  { %5088 = vmatpush3.msra.mxu0 %v6525_v62 }
0x2d59   :  { %5089 = vmatprep.subr.mxu0 %v5782_v1 }
0x2d5a   :  { %5090 = vmatpush3.msra.mxu0 %v6530_v14 }
0x2d5b   :  { %5091 = vmatprep.subr.mxu0 %v5782_v1 }
0x2d5c   :  { %5092 = vmatpush3.msra.mxu0 %v6535_v19 }
0x2d5d   :  { %5093 = vmatprep.subr.mxu0 %v5782_v1 }
0x2d5e   :  { %5094 = vmatpush3.msra.mxu0 %v6538_v2 }
0x2d5f   :  { %5117 = vmatprep.subr.mxu0 %v5782_v1 }
0x2e0f   :  { %v2615_v47 = vpop.f32.mrf.mxu0 }
0x2e10   :  { %v2619_v46 = vadd.f32 %v2615_v47, %v6633_v50 }
0x2e11   :  { %v5059_v58 = vpop.f32.mrf.mxu0 }
0x2e12   :  { %5411 = vtanh.f32 %v2619_v46  ;;  %v4388_v60 = vmul.f32 -1.442695, %v2619_v46 }
0x2e14   :  { %5413 = vpow2.f32 %v4388_v60 }
0x2e1f   :  { %v5412_v49 = vpop.eup %5411 }
0x2e20   :  { %2629 = vrot.lane.b32.xlu1 %v5412_v49, %s5784_s28 }
0x2e21   :  { %v5414_v25 = vpop.eup %5413 }
0x2e22   :  { %v2623_v63 = vadd.f32 1.0, %v5414_v25 }
0x2e24   :  { %5415 = vrcp.f32 %v2623_v63 }
0x2e31   :  { %v5416_v0 = vpop.eup %5415 }
0x2e32   :  { %v2627_v57 = vmul.f32 %v5416_v0, %v2535_v8 }
0x2e92   :  { %v2630_v31 = vpop.permute.xlu1 %2629 }
0x2e93   :  { %v2632_v42 = vmul.f32 %v5416_v0, %v2630_v31 }
0x2e95   :  { %2634 = vrot.lane.b32.xlu0 %v2632_v42, %s5785_s13 }
0x2f07   :  { %v2635_v5 = vpop.permute.xlu0 %2634 }
0x2f08   :  { %v2637_v50 = vadd.f32 %v2635_v5, %v2627_v57 }
0x2f0a   :  { %5417 = vtanh.f32 %v2637_v50 }
0x2f17   :  { %v5418_v52 = vpop.eup %5417 }
0x2f18   :  { %2640 = vrot.lane.b32.xlu1 %v5418_v52, %s5784_s28 }
0x2f8a   :  { %v2641_v54 = vpop.permute.xlu1 %2640 }
0x2f8b   :  { %v6807_v12 = vmul.f32 %v5416_v0, %v2641_v54 }
0x2f8d   :  { %2648 = vrot.lane.b32.xlu1 %v6807_v12, %s5784_s28  ;;  %2645 = vrot.lane.b32.xlu0 %v6807_v12, %s5785_s13 }
0x2fff   :  { %v2649_v56 = vpop.permute.xlu1 %2648  ;;  %v6813_v15 = vpop.permute.xlu0 %2645 }
0x3000   :  { %v2651_v7 = vsel %vm388_vm8, %v6813_v15, %v2649_v56 }
0x3001   :  { %v2652_v18 = vmul.f32 %v6166_v9, %v2651_v7 }
0x3003   :  { %5077 = vmatmul.mubr.msk.f32.vlgmr.msra.gmra.mxu1 %vm518_vm1, %v2652_v18 }
0x3004   :  { %5099 = vmatpush3.msra.mxu1 %v6503_v45  ;;  %5114 = vmatprep.mubr.msk.f32.mxu1 %vm5783_vm7, %v5782_v1 }
0x3005   :  { %5100 = vmatprep.subr.mxu1 %v5782_v1 }
0x3006   :  { %5101 = vmatpush3.msra.mxu1 %v6509_v55 }
0x3007   :  { %5102 = vmatprep.subr.mxu1 %v5782_v1 }
0x3008   :  { %5103 = vmatpush3.msra.mxu1 %v6515_v59 }
0x3009   :  { %5104 = vmatprep.subr.mxu1 %v5782_v1 }
0x300a   :  { %5105 = vmatpush3.msra.mxu1 %v6520_v48 }
0x300b   :  { %5106 = vmatprep.subr.mxu1 %v5782_v1 }
0x300c   :  { %5107 = vmatpush3.msra.mxu1 %v6525_v62 }
0x300d   :  { %5108 = vmatprep.subr.mxu1 %v5782_v1 }
0x300e   :  { %5109 = vmatpush3.msra.mxu1 %v6530_v14 }
0x300f   :  { %5110 = vmatprep.subr.mxu1 %v5782_v1 }
0x3010   :  { %5111 = vmatpush3.msra.mxu1 %v6535_v19 }
0x3011   :  { %5112 = vmatprep.subr.mxu1 %v5782_v1 }
0x3012   :  { %5113 = vmatpush3.msra.mxu1 %v6538_v2 }
0x3013   :  { %5136 = vmatprep.subr.mxu1 %v5782_v1 }
0x30c3   :  { %v2729_v11 = vpop.f32.mrf.mxu1 }
0x30c4   :  { %v2733_v20 = vadd.f32 %v2729_v11, %v6639_v16 }
0x30c5   :  { %v5078_v41 = vpop.f32.mrf.mxu1 }
0x30c6   :  { %5419 = vtanh.f32 %v2733_v20  ;;  %v4390_v22 = vmul.f32 -1.442695, %v2733_v20 }
0x30c8   :  { %5421 = vpow2.f32 %v4390_v22 }
0x30d3   :  { %v5420_v51 = vpop.eup %5419 }
0x30d4   :  { %2743 = vrot.lane.b32.xlu0 %v5420_v51, %s5784_s28 }
0x30d5   :  { %v5422_v30 = vpop.eup %5421 }
0x30d6   :  { %v2737_v4 = vadd.f32 1.0, %v5422_v30 }
0x30d8   :  { %5423 = vrcp.f32 %v2737_v4 }
0x30e5   :  { %v5424_v23 = vpop.eup %5423 }
0x30e6   :  { %v2741_v21 = vmul.f32 %v5424_v23, %v2637_v50 }
0x3146   :  { %v2744_v24 = vpop.permute.xlu0 %2743 }
0x3147   :  { %v2746_v28 = vmul.f32 %v5424_v23, %v2744_v24 }
0x3149   :  { %2748 = vrot.lane.b32.xlu1 %v2746_v28, %s5785_s13 }
0x31bb   :  { %v2749_v34 = vpop.permute.xlu1 %2748 }
0x31bc   :  { %v2751_v43 = vadd.f32 %v2749_v34, %v2741_v21 }
0x31be   :  { %5425 = vtanh.f32 %v2751_v43 }
0x31cb   :  { %v5426_v16 = vpop.eup %5425 }
0x31cc   :  { %2754 = vrot.lane.b32.xlu0 %v5426_v16, %s5784_s28  ;;  %v5525_v16 = vld [vmem:[#allocation8 + $0x38] sm:$0xff] }
0x323e   :  { %v2755_v29 = vpop.permute.xlu0 %2754 }
0x323f   :  { %v6841_v36 = vmul.f32 %v5424_v23, %v2755_v29  ;;  %v5526_v29 = vld [vmem:[#allocation8 + $0x30] sm:$0xff] }
0x3241   :  { %2762 = vrot.lane.b32.xlu0 %v6841_v36, %s5784_s28  ;;  %2759 = vrot.lane.b32.xlu1 %v6841_v36, %s5785_s13 }
0x32b3   :  { %v2763_v39 = vpop.permute.xlu0 %2762  ;;  %v6847_v40 = vpop.permute.xlu1 %2759 }
0x32b4   :  { %v2765_v47 = vsel %vm388_vm8, %v6847_v40, %v2763_v39  ;;  %v5527_v39 = vld [vmem:[#allocation8 + $0x28] sm:$0xff] }
0x32b5   :  { %v2766_v46 = vmul.f32 %v6166_v9, %v2765_v47  ;;  %v5528_v47 = vld [vmem:[#allocation8 + $0x20] sm:$0xff] }
0x32b7   :  { %5096 = vmatmul.mubr.msk.f32.vlgmr.msra.gmra.mxu0 %vm518_vm1, %v2766_v46  ;;  %v5529_v46 = vld [vmem:[#allocation8 + $0x18] sm:$0xff] }
0x32b8   :  { %5118 = vmatpush3.msra.mxu0 %v6503_v45  ;;  %5133 = vmatprep.mubr.msk.f32.mxu0 %vm5783_vm7, %v5782_v1 }
0x32b9   :  { %5119 = vmatprep.subr.mxu0 %v5782_v1 }
0x32ba   :  { %5120 = vmatpush3.msra.mxu0 %v6509_v55 }
0x32bb   :  { %5121 = vmatprep.subr.mxu0 %v5782_v1 }
0x32bc   :  { %5122 = vmatpush3.msra.mxu0 %v6515_v59 }
0x32bd   :  { %5123 = vmatprep.subr.mxu0 %v5782_v1 }
0x32be   :  { %5124 = vmatpush3.msra.mxu0 %v6520_v48 }
0x32bf   :  { %5125 = vmatprep.subr.mxu0 %v5782_v1 }
0x32c0   :  { %5126 = vmatpush3.msra.mxu0 %v6525_v62 }
0x32c1   :  { %5127 = vmatprep.subr.mxu0 %v5782_v1 }
0x32c2   :  { %5128 = vmatpush3.msra.mxu0 %v6530_v14 }
0x32c3   :  { %5129 = vmatprep.subr.mxu0 %v5782_v1 }
0x32c4   :  { %5130 = vmatpush3.msra.mxu0 %v6535_v19 }
0x32c5   :  { %5131 = vmatprep.subr.mxu0 %v5782_v1 }
0x32c6   :  { %5132 = vmatpush3.msra.mxu0 %v6538_v2 }
0x32c7   :  { %5155 = vmatprep.subr.mxu0 %v5782_v1 }
0x3377   :  { %v2837_v58 = vpop.f32.mrf.mxu0 }
0x3378   :  { %v2841_v49 = vadd.f32 %v2837_v58, %v6630_v33  ;;  %v5530_v58 = vld [vmem:[#allocation8 + $0x10] sm:$0xff] }
0x3379   :  { %v5097_v60 = vpop.f32.mrf.mxu0 }
0x337a   :  { %5427 = vtanh.f32 %v2841_v49  ;;  %v4392_v63 = vmul.f32 -1.442695, %v2841_v49  ;;  %v5531_v49 = vld [vmem:[#allocation8 + $0x8] sm:$0xff]  ;;  %v5532_v60 = vld [vmem:[#allocation8] sm:$0xff] }
0x337c   :  { %5429 = vpow2.f32 %v4392_v63 }
0x3387   :  { %v5428_v25 = vpop.eup %5427 }
0x3388   :  { %2851 = vrot.lane.b32.xlu1 %v5428_v25, %s5784_s28 }
0x3389   :  { %v5430_v0 = vpop.eup %5429 }
0x338a   :  { %v2845_v31 = vadd.f32 1.0, %v5430_v0 }
0x338c   :  { %5431 = vrcp.f32 %v2845_v31 }
0x3399   :  { %v5432_v42 = vpop.eup %5431 }
0x339a   :  { %v2849_v5 = vmul.f32 %v5432_v42, %v2751_v43 }
0x33fa   :  { %v2852_v8 = vpop.permute.xlu1 %2851 }
0x33fb   :  { %v2854_v57 = vmul.f32 %v5432_v42, %v2852_v8 }
0x33fd   :  { %2856 = vrot.lane.b32.xlu0 %v2854_v57, %s5785_s13 }
0x346f   :  { %v2857_v50 = vpop.permute.xlu0 %2856 }
0x3470   :  { %v2859_v52 = vadd.f32 %v2857_v50, %v2849_v5 }
0x3472   :  { %5433 = vtanh.f32 %v2859_v52 }
0x347f   :  { %v5434_v33 = vpop.eup %5433 }
0x3480   :  { %2862 = vrot.lane.b32.xlu1 %v5434_v33, %s5784_s28 }
0x34f2   :  { %v2863_v54 = vpop.permute.xlu1 %2862 }
0x34f3   :  { %v6875_v56 = vmul.f32 %v5432_v42, %v2863_v54 }
0x34f5   :  { %2870 = vrot.lane.b32.xlu1 %v6875_v56, %s5784_s28  ;;  %2867 = vrot.lane.b32.xlu0 %v6875_v56, %s5785_s13 }
0x3567   :  { %v2871_v7 = vpop.permute.xlu1 %2870  ;;  %v6881_v18 = vpop.permute.xlu0 %2867 }
0x3568   :  { %v2873_v11 = vsel %vm388_vm8, %v6881_v18, %v2871_v7 }
0x3569   :  { %v2874_v20 = vmul.f32 %v6166_v9, %v2873_v11 }
0x356b   :  { %5115 = vmatmul.mubr.msk.f32.vlgmr.msra.gmra.mxu1 %vm518_vm1, %v2874_v20 }
0x356c   :  { %5137 = vmatpush3.msra.mxu1 %v6503_v45  ;;  %5152 = vmatprep.mubr.msk.f32.mxu1 %vm5783_vm7, %v5782_v1 }
0x356d   :  { %5138 = vmatprep.subr.mxu1 %v5782_v1 }
0x356e   :  { %5139 = vmatpush3.msra.mxu1 %v6509_v55 }
0x356f   :  { %5140 = vmatprep.subr.mxu1 %v5782_v1 }
0x3570   :  { %5141 = vmatpush3.msra.mxu1 %v6515_v59 }
0x3571   :  { %5142 = vmatprep.subr.mxu1 %v5782_v1 }
0x3572   :  { %5143 = vmatpush3.msra.mxu1 %v6520_v48 }
0x3573   :  { %5144 = vmatprep.subr.mxu1 %v5782_v1 }
0x3574   :  { %5145 = vmatpush3.msra.mxu1 %v6525_v62 }
0x3575   :  { %5146 = vmatprep.subr.mxu1 %v5782_v1 }
0x3576   :  { %5147 = vmatpush3.msra.mxu1 %v6530_v14 }
0x3577   :  { %5148 = vmatprep.subr.mxu1 %v5782_v1 }
0x3578   :  { %5149 = vmatpush3.msra.mxu1 %v6535_v19 }
0x3579   :  { %5150 = vmatprep.subr.mxu1 %v5782_v1 }
0x357a   :  { %5151 = vmatpush3.msra.mxu1 %v6538_v2 }
0x357b   :  { %5174 = vmatprep.subr.mxu1 %v5782_v1 }
0x362b   :  { %v2951_v45 = vpop.f32.mrf.mxu1 }
0x362c   :  { %v2955_v55 = vadd.f32 %v2951_v45, %v6636_v61 }
0x362d   :  { %v5116_v59 = vpop.f32.mrf.mxu1 }
0x362e   :  { %5435 = vtanh.f32 %v2955_v55  ;;  %v4394_v62 = vmul.f32 -1.442695, %v2955_v55 }
0x3630   :  { %5437 = vpow2.f32 %v4394_v62 }
0x363b   :  { %v5436_v48 = vpop.eup %5435 }
0x363c   :  { %2965 = vrot.lane.b32.xlu0 %v5436_v48, %s5784_s28 }
0x363d   :  { %v5438_v14 = vpop.eup %5437 }
0x363e   :  { %v2959_v41 = vadd.f32 1.0, %v5438_v14 }
0x3640   :  { %5439 = vrcp.f32 %v2959_v41 }
0x364d   :  { %v5440_v19 = vpop.eup %5439 }
0x364e   :  { %v2963_v2 = vmul.f32 %v5440_v19, %v2859_v52 }
0x36ae   :  { %v2966_v51 = vpop.permute.xlu0 %2965 }
0x36af   :  { %v2968_v22 = vmul.f32 %v5440_v19, %v2966_v51 }
0x36b1   :  { %2970 = vrot.lane.b32.xlu1 %v2968_v22, %s5785_s13 }
0x3723   :  { %v2971_v30 = vpop.permute.xlu1 %2970 }
0x3724   :  { %v2973_v4 = vadd.f32 %v2971_v30, %v2963_v2 }
0x3726   :  { %5441 = vtanh.f32 %v2973_v4 }
0x3733   :  { %v5442_v61 = vpop.eup %5441 }
0x3734   :  { %2976 = vrot.lane.b32.xlu0 %v5442_v61, %s5784_s28 }
0x37a6   :  { %v2977_v23 = vpop.permute.xlu0 %2976 }
0x37a7   :  { %v6909_v24 = vmul.f32 %v5440_v19, %v2977_v23 }
0x37a9   :  { %2984 = vrot.lane.b32.xlu0 %v6909_v24, %s5784_s28  ;;  %2981 = vrot.lane.b32.xlu1 %v6909_v24, %s5785_s13 }
0x381b   :  { %v2985_v28 = vpop.permute.xlu0 %2984  ;;  %v6915_v21 = vpop.permute.xlu1 %2981 }
0x381c   :  { %v2987_v34 = vsel %vm388_vm8, %v6915_v21, %v2985_v28 }
0x381d   :  { %v2988_v43 = vmul.f32 %v6166_v9, %v2987_v34 }
0x381f   :  { %5134 = vmatmul.mubr.msk.f32.vlgmr.msra.gmra.mxu0 %vm518_vm1, %v2988_v43 }
0x3820   :  { %5156 = vmatpush3.msra.mxu0 %v5525_v16  ;;  %5171 = vmatprep.mubr.msk.f32.mxu0 %vm5783_vm7, %v5782_v1 }
0x3821   :  { %5157 = vmatprep.subr.mxu0 %v5782_v1 }
0x3822   :  { %5158 = vmatpush3.msra.mxu0 %v5526_v29 }
0x3823   :  { %5159 = vmatprep.subr.mxu0 %v5782_v1 }
0x3824   :  { %5160 = vmatpush3.msra.mxu0 %v5527_v39 }
0x3825   :  { %5161 = vmatprep.subr.mxu0 %v5782_v1 }
0x3826   :  { %5162 = vmatpush3.msra.mxu0 %v5528_v47 }
0x3827   :  { %5163 = vmatprep.subr.mxu0 %v5782_v1 }
0x3828   :  { %5164 = vmatpush3.msra.mxu0 %v5529_v46 }
0x3829   :  { %5165 = vmatprep.subr.mxu0 %v5782_v1 }
0x382a   :  { %5166 = vmatpush3.msra.mxu0 %v5530_v58 }
0x382b   :  { %5167 = vmatprep.subr.mxu0 %v5782_v1 }
0x382c   :  { %5168 = vmatpush3.msra.mxu0 %v5531_v49 }
0x382d   :  { %5169 = vmatprep.subr.mxu0 %v5782_v1 }
0x382e   :  { %5170 = vmatpush3.msra.mxu0 %v5532_v60 }
0x38df   :  { %v3059_v25 = vpop.f32.mrf.mxu0 }
0x38e0   :  { %v3063_v63 = vadd.f32 %v3059_v25, %v6642_v35 }
0x38e1   :  { %v5135_v0 = vpop.f32.mrf.mxu0 }
0x38e2   :  { %5443 = vtanh.f32 %v3063_v63  ;;  %v4396_v42 = vmul.f32 -1.442695, %v3063_v63 }
0x38e4   :  { %5445 = vpow2.f32 %v4396_v42 }
0x38ef   :  { %v5444_v31 = vpop.eup %5443 }
0x38f0   :  { %3073 = vrot.lane.b32.xlu1 %v5444_v31, %s5784_s28 }
0x38f1   :  { %v5446_v8 = vpop.eup %5445 }
0x38f2   :  { %v3067_v57 = vadd.f32 1.0, %v5446_v8 }
0x38f4   :  { %5447 = vrcp.f32 %v3067_v57 }
0x3901   :  { %v5448_v5 = vpop.eup %5447 }
0x3902   :  { %v3071_v33 = vmul.f32 %v5448_v5, %v2973_v4 }
0x3962   :  { %v3074_v50 = vpop.permute.xlu1 %3073 }
0x3963   :  { %v3076_v52 = vmul.f32 %v5448_v5, %v3074_v50 }
0x3965   :  { %3078 = vrot.lane.b32.xlu0 %v3076_v52, %s5785_s13 }
0x39d7   :  { %v3079_v54 = vpop.permute.xlu0 %3078 }
0x39d8   :  { %v3081_v7 = vadd.f32 %v3079_v54, %v3071_v33 }
0x39da   :  { %5449 = vtanh.f32 %v3081_v7 }
0x39e7   :  { %v5450_v35 = vpop.eup %5449 }
0x39e8   :  { %3084 = vrot.lane.b32.xlu1 %v5450_v35, %s5784_s28 }
0x3a5a   :  { %v3085_v11 = vpop.permute.xlu1 %3084 }
0x3a5b   :  { %v6934_v20 = vmul.f32 %v5448_v5, %v3085_v11 }
0x3a5d   :  { %3092 = vrot.lane.b32.xlu1 %v6934_v20, %s5784_s28  ;;  %3089 = vrot.lane.b32.xlu0 %v6934_v20, %s5785_s13 }
0x3acf   :  { %v3093_v45 = vpop.permute.xlu1 %3092  ;;  %v6940_v55 = vpop.permute.xlu0 %3089 }
0x3ad0   :  { %v3095_v59 = vsel %vm388_vm8, %v6940_v55, %v3093_v45 }
0x3ad1   :  { %v3096_v48 = vmul.f32 %v6166_v9, %v3095_v59 }
0x3ad3   :  { %5153 = vmatmul.mubr.msk.f32.vlgmr.msra.gmra.mxu1 %vm518_vm1, %v3096_v48 }
0x3ad4   :  { %5175 = vmatpush3.msra.mxu1 %v5525_v16  ;;  %5190 = vmatprep.mubr.msk.f32.mxu1 %vm5783_vm7, %v5782_v1 }
0x3ad5   :  { %5176 = vmatprep.subr.mxu1 %v5782_v1 }
0x3ad6   :  { %5177 = vmatpush3.msra.mxu1 %v5526_v29 }
0x3ad7   :  { %5178 = vmatprep.subr.mxu1 %v5782_v1 }
0x3ad8   :  { %5179 = vmatpush3.msra.mxu1 %v5527_v39 }
0x3ad9   :  { %5180 = vmatprep.subr.mxu1 %v5782_v1 }
0x3ada   :  { %5181 = vmatpush3.msra.mxu1 %v5528_v47 }
0x3adb   :  { %5182 = vmatprep.subr.mxu1 %v5782_v1 }
0x3adc   :  { %5183 = vmatpush3.msra.mxu1 %v5529_v46 }
0x3add   :  { %5184 = vmatprep.subr.mxu1 %v5782_v1 }
0x3ade   :  { %5185 = vmatpush3.msra.mxu1 %v5530_v58 }
0x3adf   :  { %5186 = vmatprep.subr.mxu1 %v5782_v1 }
0x3ae0   :  { %5187 = vmatpush3.msra.mxu1 %v5531_v49 }
0x3ae1   :  { %5188 = vmatprep.subr.mxu1 %v5782_v1 }
0x3ae2   :  { %5189 = vmatpush3.msra.mxu1 %v5532_v60 }
0x3b93   :  { %v3173_v62 = vpop.f32.mrf.mxu1 }
0x3b94   :  { %v3177_v14 = vadd.f32 %v3173_v62, %v6648_v27 }
0x3b95   :  { %v5154_v41 = vpop.f32.mrf.mxu1 }
0x3b96   :  { %5451 = vtanh.f32 %v3177_v14  ;;  %v4398_v51 = vmul.f32 -1.442695, %v3177_v14 }
0x3b98   :  { %5453 = vpow2.f32 %v4398_v51 }
0x3ba3   :  { %v5452_v19 = vpop.eup %5451 }
0x3ba4   :  { %3187 = vrot.lane.b32.xlu0 %v5452_v19, %s5784_s28 }
0x3ba5   :  { %v5454_v22 = vpop.eup %5453 }
0x3ba6   :  { %v3181_v2 = vadd.f32 1.0, %v5454_v22 }
0x3ba8   :  { %5455 = vrcp.f32 %v3181_v2 }
0x3bb5   :  { %v5456_v30 = vpop.eup %5455 }
0x3bb6   :  { %v3185_v23 = vmul.f32 %v5456_v30, %v3081_v7 }
0x3c16   :  { %v3188_v4 = vpop.permute.xlu0 %3187 }
0x3c17   :  { %v3190_v61 = vmul.f32 %v5456_v30, %v3188_v4 }
0x3c19   :  { %3192 = vrot.lane.b32.xlu1 %v3190_v61, %s5785_s13 }
0x3c8b   :  { %v3193_v28 = vpop.permute.xlu1 %3192 }
0x3c8c   :  { %v3195_v34 = vadd.f32 %v3193_v28, %v3185_v23 }
0x3c8e   :  { %5457 = vtanh.f32 %v3195_v34 }
0x3c9b   :  { %v5458_v27 = vpop.eup %5457 }
0x3c9c   :  { %3198 = vrot.lane.b32.xlu0 %v5458_v27, %s5784_s28 }
0x3d0e   :  { %v3199_v43 = vpop.permute.xlu0 %3198 }
0x3d0f   :  { %v6959_v16 = vmul.f32 %v5456_v30, %v3199_v43  ;;  %v3519_v43 = vld [vmem:[#allocation11 + $0x38] sm:$0xff] }
0x3d10   :  { %5193 = vmatprep.subr.mxu0 %v3519_v43 }
0x3d11   :  { %3206 = vrot.lane.b32.xlu0 %v6959_v16, %s5784_s28  ;;  %3203 = vrot.lane.b32.xlu1 %v6959_v16, %s5785_s13  ;;  %v3435_v27 = vrot.slane %v6959_v16, 4  ;;  %v3514_v16 = vld [vmem:[#allocation11 + $0x10] sm:$0xff] }
0x3d83   :  { %v3207_v29 = vpop.permute.xlu0 %3206  ;;  %v6965_v39 = vpop.permute.xlu1 %3203 }
0x3d84   :  { %v3209_v47 = vsel %vm388_vm8, %v6965_v39, %v3207_v29  ;;  %v3518_v29 = vld [vmem:[#allocation11 + $0x30] sm:$0xff] }
0x3d85   :  { %v3210_v46 = vmul.f32 %v6166_v9, %v3209_v47  ;;  %v3460_v47 = vrot.slane %v6807_v12, 4  ;;  %v3513_v12 = vld [vmem:[#allocation11 + $0x8] sm:$0xff] }
0x3d87   :  { %5172 = vmatmul.mubr.msk.f32.vlgmr.msra.gmra.mxu0 %vm518_vm1, %v3210_v46  ;;  %v3516_v46 = vld [vmem:[#allocation11 + $0x20] sm:$0xff] }
0x3d88   :  { %5194 = vmatpush3.msra.mxu0 %v3519_v43 }
0x3d89   :  { %5195 = vmatprep.subr.mxu0 %v3518_v29 }
0x3d8a   :  { %5196 = vmatpush3.msra.mxu0 %v3518_v29 }
0x3e47   :  { %v3281_v58 = vpop.f32.mrf.mxu0 }
0x3e48   :  { %v3285_v49 = vadd.f32 %v3281_v58, %v6654_v13  ;;  %v3455_v58 = vrot.slane %v6841_v36, 4 }
0x3e49   :  { %v5173_v60 = vpop.f32.mrf.mxu0 }
0x3e4a   :  { %5459 = vtanh.f32 %v3285_v49  ;;  %v4400_v63 = vmul.f32 -1.442695, %v3285_v49  ;;  %v3512_v49 = vld [vmem:[#allocation11] sm:$0xff] }
0x3e4c   :  { %5461 = vpow2.f32 %v4400_v63  ;;  %v3465_v63 = vrot.slane %v6772_v37, 4 }
0x3e57   :  { %v5460_v25 = vpop.eup %5459 }
0x3e58   :  { %3295 = vrot.lane.b32.xlu1 %v5460_v25, %s5784_s28 }
0x3e59   :  { %v5462_v0 = vpop.eup %5461 }
0x3e5a   :  { %v3289_v31 = vadd.f32 1.0, %v5462_v0  ;;  %v3445_v0 = vrot.slane %v6909_v24, 4 }
0x3e5c   :  { %5463 = vrcp.f32 %v3289_v31  ;;  %v3470_v31 = vrot.slane %v6736_v32, 4 }
0x3e69   :  { %v5464_v42 = vpop.eup %5463 }
0x3e6a   :  { %v3293_v5 = vmul.f32 %v5464_v42, %v3195_v34  ;;  %v3440_v34 = vrot.slane %v6934_v20, 4  ;;  %v3515_v20 = vld [vmem:[#allocation11 + $0x18] sm:$0xff] }
0x3eca   :  { %v3296_v8 = vpop.permute.xlu1 %3295 }
0x3ecb   :  { %v3298_v57 = vmul.f32 %v5464_v42, %v3296_v8  ;;  %v3475_v8 = vrot.slane %v6700_v17, 4 }
0x3ecd   :  { %3300 = vrot.lane.b32.xlu0 %v3298_v57, %s5785_s13 }
0x3f3f   :  { %v3301_v50 = vpop.permute.xlu0 %3300 }
0x3f40   :  { %v3303_v52 = vadd.f32 %v3301_v50, %v3293_v5 }
0x3f42   :  { %5465 = vtanh.f32 %v3303_v52 }
0x3f4f   :  { %v5466_v13 = vpop.eup %5465 }
0x3f50   :  { %3306 = vrot.lane.b32.xlu1 %v5466_v13, %s5784_s28 }
0x3fc2   :  { %v3307_v33 = vpop.permute.xlu1 %3306 }
0x3fc3   :  { %v3309_v54 = vmul.f32 %v5464_v42, %v3307_v33  ;;  %v3483_v42 = vrot.slane %v6665_v3, 4 }
0x3fc5   :  { %3314 = vrot.lane.b32.xlu1 %v3309_v54, %s5784_s28  ;;  %3311 = vrot.lane.b32.xlu0 %v3309_v54, %s5785_s13 }
0x4037   :  { %v3315_v7 = vpop.permute.xlu1 %3314  ;;  %v6977_v35 = vpop.permute.xlu0 %3311 }
0x4038   :  { %v3317_v11 = vsel %vm388_vm8, %v6977_v35, %v3315_v7 }
0x4039   :  { %v3318_v45 = vmul.f32 %v6166_v9, %v3317_v11  ;;  %v3430_v9 = vrot.slane %v3309_v54, 4 }
0x403b   :  { %5191 = vmatmul.mubr.msk.f32.vlgmr.msra.gmra.mxu1 %vm518_vm1, %v3318_v45 }
0x40fb   :  { %v3395_v59 = vpop.f32.mrf.mxu1 }
0x40fc   :  { %v3399_v48 = vadd.f32 %v3395_v59, %v6658_v26  ;;  %v3450_v26 = vrot.slane %v6875_v56, 4  ;;  %v3517_v56 = vld [vmem:[#allocation11 + $0x28] sm:$0xff] }
0x40fd   :  { %v5192_v62 = vpop.f32.mrf.mxu1  ;;  %5197 = vmatprep.subr.mxu0 %v3517_v56 }
0x40fe   :  { %5467 = vtanh.f32 %v3399_v48  ;;  %v4402_v41 = vmul.f32 -1.442695, %v3399_v48  ;;  %5198 = vmatpush3.msra.mxu0 %v3517_v56 }
0x40ff   :  { %5199 = vmatprep.subr.mxu0 %v3516_v46 }
0x4100   :  { %5469 = vpow2.f32 %v4402_v41  ;;  %5200 = vmatpush3.msra.mxu0 %v3516_v46 }
0x4101   :  { %5201 = vmatprep.subr.mxu0 %v3515_v20 }
0x4102   :  { %5202 = vmatpush3.msra.mxu0 %v3515_v20 }
0x4103   :  { %5203 = vmatprep.subr.mxu0 %v3514_v16 }
0x4104   :  { %5204 = vmatpush3.msra.mxu0 %v3514_v16 }
0x4105   :  { %5205 = vmatprep.subr.mxu0 %v3513_v12 }
0x4106   :  { %5206 = vmatpush3.msra.mxu0 %v3513_v12 }
0x4107   :  { %5207 = vmatprep.subr.mxu0 %v3512_v49 }
0x4108   :  { %5208 = vmatpush3.msra.mxu0 %v3512_v49 }
0x4109   :  { %5218 = vmatprep.subr.mxu0 %v5782_v1 }
0x410b   :  { %v5468_v14 = vpop.eup %5467 }
0x410c   :  { %3409 = vrot.lane.b32.xlu0 %v5468_v14, %s5784_s28 }
0x410d   :  { %v5470_v19 = vpop.eup %5469 }
0x410e   :  { %v3403_v51 = vadd.f32 1.0, %v5470_v19 }
0x4110   :  { %5471 = vrcp.f32 %v3403_v51 }
0x411d   :  { %v5472_v22 = vpop.eup %5471 }
0x411e   :  { %v3407_v4 = vmul.f32 %v5472_v22, %v3303_v52 }
0x417e   :  { %v3410_v2 = vpop.permute.xlu0 %3409 }
0x417f   :  { %v3412_v30 = vmul.f32 %v5472_v22, %v3410_v2 }
0x4181   :  { %3414 = vrot.lane.b32.xlu1 %v3412_v30, %s5785_s13 }
0x4185   :  { %3431 = vrot.lane.b32.xlu1 %v3430_v9, %s5784_s28 }
0x4189   :  { %3451 = vrot.lane.b32.xlu1 %v3450_v26, %s5784_s28 }
0x41f3   :  { %v3415_v61 = vpop.permute.xlu1 %3414 }
0x41f4   :  { %v3417_v23 = vadd.f32 %v3415_v61, %v3407_v4 }
0x41f6   :  { %5473 = vtanh.f32 %v3417_v23 }
0x41f7   :  { %v3432_v5 = vpop.permute.xlu1 %3431 }
0x41f8   :  { %v7013_v52 = vsel %vm388_vm8, %v6706_v44, %v3432_v5 }
0x41f9   :  { %v3489_v13 = vrot.slane %v7013_v52, 4 }
0x41fb   :  { %v3452_v50 = vpop.permute.xlu1 %3451 }
0x41fc   :  { %v7026_v54 = vsel %vm388_vm8, %v6847_v40, %v3452_v50 }
0x4203   :  { %v5474_v28 = vpop.eup %5473 }
0x4204   :  { %3420 = vrot.lane.b32.xlu0 %v5474_v28, %s5784_s28 }
0x4208   :  { %3441 = vrot.lane.b32.xlu0 %v3440_v34, %s5784_s28 }
0x420c   :  { %3436 = vrot.lane.b32.xlu0 %v3435_v27, %s5784_s28 }
0x4210   :  { %3461 = vrot.lane.b32.xlu0 %v3460_v47, %s5784_s28 }
0x4214   :  { %3456 = vrot.lane.b32.xlu0 %v3455_v58, %s5784_s28 }
0x4276   :  { %v3421_v60 = vpop.permute.xlu0 %3420 }
0x4277   :  { %v3423_v25 = vmul.f32 %v5472_v22, %v3421_v60 }
0x4279   :  { %v3425_v36 = vrot.slane %v3423_v25, 4  ;;  %3480 = vrot.lane.b32.xlu0 %v3423_v25, %s5785_s13 }
0x427a   :  { %v3442_v37 = vpop.permute.xlu0 %3441 }
0x427b   :  { %3426 = vrot.lane.b32.xlu1 %v3425_v36, %s5784_s28  ;;  %v7017_v32 = vsel %vm388_vm8, %v6778_v38, %v3442_v37 }
0x427c   :  { %v3492_v7 = vrot.slane %v7017_v32, 4 }
0x427d   :  { %3466 = vrot.lane.b32.xlu0 %v3465_v63, %s5784_s28 }
0x427e   :  { %v3437_v57 = vpop.permute.xlu0 %3436 }
0x427f   :  { %3446 = vrot.lane.b32.xlu1 %v3445_v0, %s5784_s28  ;;  %v7022_v17 = vsel %vm388_vm8, %v6742_v10, %v3437_v57 }
0x4280   :  { %v3507_v40 = vsel %vm516_vm9, %v7022_v17, %v3492_v7 }
0x4282   :  { %v3462_v24 = vpop.permute.xlu0 %3461 }
0x4283   :  { %3471 = vrot.lane.b32.xlu1 %v3470_v31, %s5784_s28  ;;  %v7035_v38 = vsel %vm388_vm8, %v6915_v21, %v3462_v24 }
0x4284   :  { %v3498_v59 = vrot.slane %v7035_v38, 4 }
0x4286   :  { %v3457_v3 = vpop.permute.xlu0 %3456 }
0x4287   :  { %3484 = vrot.lane.b32.xlu1 %v3483_v42, %s5784_s28  ;;  %v7049_v45 = vsel %vm388_vm8, %v6881_v18, %v3457_v3 }
0x4288   :  { %v3509_v18 = vsel %vm516_vm9, %v7049_v45, %v3498_v59 }
0x428b   :  { %3476 = vrot.lane.b32.xlu1 %v3475_v8, %s5784_s28 }
0x42eb   :  { %v3481_v11 = vpop.permute.xlu0 %3480 }
0x42ed   :  { %v3427_v33 = vpop.permute.xlu1 %3426 }
0x42ee   :  { %v7031_v44 = vsel %vm388_vm8, %v6671_v6, %v3427_v33  ;;  %v3495_v6 = vrot.slane %v7026_v54, 4 }
0x42ef   :  { %v3506_v10 = vsel %vm516_vm9, %v7031_v44, %v3489_v13  ;;  %v3467_v14 = vpop.permute.xlu0 %3466 }
0x42f0   :  { %5209 = vmatprep.mubr.msk.f32.mxu0 %vm518_vm1, %v3506_v10  ;;  %v7074_v51 = vsel %vm388_vm8, %v6940_v55, %v3467_v14 }
0x42f1   :  { %5210 = vmatmul.mubr.msk.f32.vlgmr.msra.gmra.mxu0 %vm518_vm1, %v3507_v40  ;;  %v3447_v21 = vpop.permute.xlu1 %3446 }
0x42f2   :  { %v7055_v48 = vsel %vm388_vm8, %v6813_v15, %v3447_v21 }
0x42f3   :  { %v3508_v62 = vsel %vm516_vm9, %v7055_v48, %v3495_v6 }
0x42f4   :  { %5212 = vmatprep.mubr.msk.f32.mxu0 %vm518_vm1, %v3508_v62 }
0x42f5   :  { %5213 = vmatmul.mubr.msk.f32.gmra.mxu0 %vm518_vm1, %v3509_v18  ;;  %v3472_v41 = vpop.permute.xlu1 %3471 }
0x42f6   :  { %v7069_v15 = vsel %vm388_vm8, %v6965_v39, %v3472_v41 }
0x42f7   :  { %v3501_v19 = vrot.slane %v7069_v15, 4 }
0x42f9   :  { %v3485_v22 = vpop.permute.xlu1 %3484  ;;  %v3510_v2 = vsel %vm516_vm9, %v7074_v51, %v3501_v19 }
0x42fa   :  { %v7081_v30 = vsel %vm388_vm8, %v3481_v11, %v3485_v22  ;;  %5215 = vmatprep.mubr.msk.f32.mxu0 %vm518_vm1, %v3510_v2 }
0x42fb   :  { %v3504_v39 = vrot.slane %v7081_v30, 4  ;;  %v4124_v30 = vld [vmem:[#allocation16 + $0x28] sm:$0xff] }
0x42fd   :  { %v3477_v9 = vpop.permute.xlu1 %3476 }
0x42fe   :  { %v7087_v26 = vsel %vm388_vm8, %v6977_v35, %v3477_v9  ;;  %v4409_v35 = vld [vmem:[%s7186_s10] ss:$0 sm:$0xff] }
0x42ff   :  { %v3511_v55 = vsel %vm516_vm9, %v7087_v26, %v3504_v39 }
0x4300   :  { %5216 = vmatmul.mubr.msk.f32.gmra.mxu0 %vm518_vm1, %v3511_v55 }
0x4301   :  { %5222 = vmatprep.mubr.msk.f32.mxu0 %vm5783_vm7, %v5782_v1 }
0x43b1   :  { %v5211_v4 = vpop.f32.mrf.mxu0 }
0x43b2   :  { %5475 = vtanh.f32 %v5211_v4 }
0x43b3   :  { %v3604_v61 = vpop.f32.mrf.mxu0 }
0x43b4   :  { %5477 = vtanh.f32 %v3604_v61  ;;  %v3681_v61 = vsel %vm3680_vm4, -1e+30, %v5782_v1 }
0x43b5   :  { %v5214_v23 = vpop.f32.mrf.mxu0 }
0x43b6   :  { %5479 = vtanh.f32 %v5214_v23 }
0x43b7   :  { %v3614_v28 = vpop.f32.mrf.mxu0 }
0x43b8   :  { %5481 = vtanh.f32 %v3614_v28 }
0x43bf   :  { %v5476_v34 = vpop.eup %5475 }
0x43c0   :  { %v5217_v27 = vpop.f32.mrf.mxu0  ;;  %v3655_v43 = vmul.f32 %v5476_v34, %v4409_v35 }
0x43c1   :  { %v5478_v29 = vpop.eup %5477  ;;  %5483 = vtanh.f32 %v5217_v27 }
0x43c2   :  { %v3624_v56 = vpop.f32.mrf.mxu0  ;;  %v3656_v47 = vsel %vm3647_vm2, %v3655_v43, 0.0  ;;  %v3646_v46 = vmul.f32 %v5478_v29, %v4409_v35  ;;  %v3659_v36 = vsel %vm3651_vm3, %v3655_v43, 0.0  ;;  %v3687_v43 = vrot.slane %v3681_v61, 4 }
0x43c3   :  { %5485 = vtanh.f32 %v3624_v56  ;;  %3657 = vadd.xlane.f32.xlu0 %v3656_v47  ;;  %v5480_v20 = vpop.eup %5479 }
0x43c4   :  { %v3648_v58 = vsel %vm3647_vm2, %v3646_v46, 0.0  ;;  %v3652_v12 = vsel %vm3651_vm3, %v3646_v46, 0.0  ;;  %v3669_v25 = vmul.f32 %v5480_v20, %v4409_v35 }
0x43c5   :  { %v5482_v16 = vpop.eup %5481  ;;  %3649 = vadd.xlane.f32.xlu1 %v3648_v58 }
0x43c6   :  { %v3662_v49 = vmul.f32 %v5482_v16, %v4409_v35  ;;  %v3670_v63 = vsel %vm3647_vm2, %v3669_v25, 0.0  ;;  %v3673_v37 = vsel %vm3651_vm3, %v3669_v25, 0.0 }
0x43c7   :  { %3653 = vadd.xlane.f32.xlu0 %v3652_v12 }
0x43c8   :  { %v3663_v60 = vsel %vm3647_vm2, %v3662_v49, 0.0  ;;  %v3666_v0 = vsel %vm3651_vm3, %v3662_v49, 0.0 }
0x43c9   :  { %3664 = vadd.xlane.f32.xlu1 %v3663_v60 }
0x43cb   :  { %3660 = vadd.xlane.f32.xlu0 %v3659_v36 }
0x43cd   :  { %3671 = vadd.xlane.f32.xlu1 %v3670_v63 }
0x43ce   :  { %v5484_v31 = vpop.eup %5483 }
0x43cf   :  { %3667 = vadd.xlane.f32.xlu0 %v3666_v0  ;;  %v3690_v5 = vmul.f32 %v5484_v31, %v4409_v35 }
0x43d0   :  { %v5486_v42 = vpop.eup %5485 }
0x43d1   :  { %v3676_v8 = vmul.f32 %v5486_v42, %v4409_v35  ;;  %v3691_v50 = vsel %vm3647_vm2, %v3690_v5, 0.0  ;;  %v3695_v3 = vsel %vm3651_vm3, %v3690_v5, 0.0 }
0x43d3   :  { %3674 = vadd.xlane.f32.xlu0 %v3673_v37  ;;  %v3677_v57 = vsel %vm3647_vm2, %v3676_v8, 0.0  ;;  %v3683_v24 = vsel %vm3651_vm3, %v3676_v8, 0.0 }
0x43d4   :  { %3678 = vadd.xlane.f32.xlu1 %v3677_v57 }
0x43d7   :  { %3684 = vadd.xlane.f32.xlu0 %v3683_v24 }
0x43d8   :  { %3692 = vadd.xlane.f32.xlu1 %v3691_v50 }
0x43db   :  { %3696 = vadd.xlane.f32.xlu0 %v3695_v3 }
0x444c   :  { %v3658_v33 = vpop.xlane.xlu0 %3657 }
0x444e   :  { %v3650_v11 = vpop.xlane.xlu1 %3649 }
0x4450   :  { %v3654_v10 = vpop.xlane.xlu0 %3653 }
0x4451   :  { %v3700_v40 = vrot.slane %v3654_v10, 4 }
0x4452   :  { %v3665_v62 = vpop.xlane.xlu1 %3664 }
0x4453   :  { %v3702_v21 = vmax.f32 %v3650_v11, %v3700_v40 }
0x4454   :  { %v3661_v18 = vpop.xlane.xlu0 %3660 }
0x4455   :  { %v3703_v14 = vmax.f32 %v3702_v21, %v3658_v33  ;;  %v3705_v41 = vrot.slane %v3661_v18, 4 }
0x4456   :  { %v3672_v9 = vpop.xlane.xlu1 %3671 }
0x4457   :  { %v3707_v22 = vmax.f32 %v3703_v14, %v3705_v41 }
0x4458   :  { %v3668_v2 = vpop.xlane.xlu0 %3667 }
0x4459   :  { %v3708_v55 = vmax.f32 %v3707_v22, %v3665_v62  ;;  %v3710_v4 = vrot.slane %v3668_v2, 4 }
0x445b   :  { %v3712_v23 = vmax.f32 %v3708_v55, %v3710_v4 }
0x445c   :  { %v3675_v28 = vpop.xlane.xlu0 %3674 }
0x445d   :  { %v3713_v35 = vmax.f32 %v3712_v23, %v3672_v9  ;;  %v3715_v34 = vrot.slane %v3675_v28, 4  ;;  %v3679_v27 = vpop.xlane.xlu1 %3678 }
0x445e   :  { %v3682_v56 = vadd.f32 %v3681_v61, %v3679_v27 }
0x445f   :  { %v3717_v29 = vmax.f32 %v3713_v35, %v3715_v34 }
0x4460   :  { %v3685_v47 = vpop.xlane.xlu0 %3684 }
0x4461   :  { %v3689_v46 = vadd.f32 %v3687_v43, %v3685_v47  ;;  %v3693_v20 = vpop.xlane.xlu1 %3692  ;;  %v3718_v58 = vmax.f32 %v3717_v29, %v3682_v56 }
0x4462   :  { %v3694_v49 = vadd.f32 %v3693_v20, %v3681_v61 }
0x4463   :  { %v3720_v16 = vrot.slane %v3689_v46, 4 }
0x4464   :  { %v3697_v53 = vpop.xlane.xlu0 %3696 }
0x4465   :  { %v3722_v12 = vmax.f32 %v3718_v58, %v3720_v16  ;;  %v3698_v60 = vadd.f32 %v3697_v53, %v3687_v43 }
0x4467   :  { %v3723_v25 = vmax.f32 %v3722_v12, %v3694_v49  ;;  %v3725_v36 = vrot.slane %v3698_v60, 4 }
0x4469   :  { %v3727_v63 = vmax.f32 %v3723_v25, %v3725_v36 }
0x446b   :  { %v3728_v0 = vsub.f32 %v3650_v11, %v3727_v63  ;;  %v3740_v31 = vrot.slane %v3727_v63, 4  ;;  %v3758_v42 = vsub.f32 %v3658_v33, %v3727_v63  ;;  %v3785_v8 = vsub.f32 %v3665_v62, %v3727_v63 }
0x446c   :  { %v3812_v3 = vsub.f32 %v3672_v9, %v3727_v63  ;;  %v3866_v61 = vsub.f32 %v3694_v49, %v3727_v63 }
0x446d   :  { %v3729_v37 = vmul.f32 1.442695, %v3728_v0  ;;  %v3742_v57 = vsub.f32 %v3654_v10, %v3740_v31  ;;  %v3759_v5 = vmul.f32 1.442695, %v3758_v42  ;;  %v3769_v24 = vsub.f32 %v3661_v18, %v3740_v31 }
0x446e   :  { %v3796_v50 = vsub.f32 %v3668_v2, %v3740_v31  ;;  %v3786_v14 = vmul.f32 1.442695, %v3785_v8  ;;  %v3813_v22 = vmul.f32 1.442695, %v3812_v3  ;;  %v3823_v11 = vsub.f32 %v3675_v28, %v3740_v31  ;;  %v4027_v3 = vld [vmem:[#allocation13 + $0x8] sm:$0x3f] }
0x446f   :  { %5487 = vpow2.f32 %v3729_v37  ;;  %v3743_v40 = vmul.f32 1.442695, %v3742_v57  ;;  %v3770_v21 = vmul.f32 1.442695, %v3769_v24  ;;  %v3850_v62 = vsub.f32 %v3689_v46, %v3740_v31  ;;  %5219 = vmatpush3.msk.msra.mxu0 %vm4039_vm5, %v4027_v3 }
0x4470   :  { %5489 = vpow2.f32 %v3759_v5  ;;  %v3797_v41 = vmul.f32 1.442695, %v3796_v50  ;;  %v3824_v33 = vmul.f32 1.442695, %v3823_v11  ;;  %v3839_v10 = vsub.f32 %v3682_v56, %v3727_v63  ;;  %5220 = vmatprep.subr.mxu0 %v5782_v1  ;;  %v3929_v11 = vld [vmem:[#allocation14 + $0x70] sm:$0xff] }
0x4471   :  { %5491 = vpow2.f32 %v3743_v40  ;;  %v3877_v18 = vsub.f32 %v3698_v60, %v3740_v31  ;;  %v3851_v2 = vmul.f32 1.442695, %v3850_v62  ;;  %v3867_v43 = vmul.f32 1.442695, %v3866_v61  ;;  %v4026_v40 = vld [vmem:[#allocation13] sm:$0xff]  ;;  %v3928_v62 = vld [vmem:[#allocation14 + $0x68] sm:$0xff] }
0x4472   :  { %5493 = vpow2.f32 %v3770_v21  ;;  %v3840_v4 = vmul.f32 1.442695, %v3839_v10  ;;  %v4025_v21 = vld [vmem:[%s7206_s15] sm:$0x3]  ;;  %5221 = vmatpush3.msra.mxu0 %v4026_v40  ;;  %v3943_v10 = vld [vmem:[#allocation14 + $0xe0] sm:$0xff] }
0x4473   :  { %5495 = vpow2.f32 %v3786_v14  ;;  %v3878_v34 = vmul.f32 1.442695, %v3877_v18  ;;  %v3946_v14 = vld [vmem:[#allocation14 + $0xf8] sm:$0xff]  ;;  %5223 = vmatmul.mubr.msk.f32.vlgmr.msra.gmra.mxu0 %vm4035_vm6, %v4025_v21  ;;  %5225 = vmatprep.subr.mxu0 %v5782_v1  ;;  %v3927_v18 = vld [vmem:[#allocation14 + $0x60] sm:$0xff]  ;;  %v3940_v61 = vld [vmem:[#allocation14 + $0xc8] sm:$0xff] }
0x4474   :  { %5497 = vpow2.f32 %v3797_v41  ;;  %4662 = vmatprep.subr.mxu1 %v3946_v14  ;;  %v3930_v41 = vld [vmem:[#allocation14 + $0x78] sm:$0xff]  ;;  %5241 = vmatprep.mubr.msk.f32.mxu0 %vm5783_vm7, %v5782_v1 }
0x4475   :  { %5499 = vpow2.f32 %v3813_v22  ;;  %v3945_v22 = vld [vmem:[#allocation14 + $0xf0] sm:$0xff]  ;;  %4663 = vmatpush3.msra.mxu1 %v3930_v41 }
0x4476   :  { %5501 = vpow2.f32 %v3824_v33  ;;  %v3944_v33 = vld [vmem:[#allocation14 + $0xe8] sm:$0xff]  ;;  %4664 = vmatprep.subr.mxu1 %v3945_v22 }
0x4477   :  { %5503 = vpow2.f32 %v3851_v2  ;;  %4665 = vmatpush3.msra.mxu1 %v3929_v11  ;;  %v3942_v2 = vld [vmem:[#allocation14 + $0xd8] sm:$0xff] }
0x4478   :  { %5505 = vpow2.f32 %v3840_v4  ;;  %4666 = vmatprep.subr.mxu1 %v3944_v33  ;;  %v3925_v4 = vld [vmem:[#allocation14 + $0x50] sm:$0xff] }
0x4479   :  { %5507 = vpow2.f32 %v3878_v34  ;;  %4667 = vmatpush3.msra.mxu1 %v3928_v62  ;;  %v3923_v34 = vld [vmem:[#allocation14 + $0x40] sm:$0xff] }
0x447a   :  { %5509 = vpow2.f32 %v3867_v43  ;;  %4668 = vmatprep.subr.mxu1 %v3943_v10  ;;  %v3937_v43 = vld [vmem:[#allocation14 + $0xb0] sm:$0xff] }
0x447b   :  { %4669 = vmatpush3.msra.mxu1 %v3927_v18 }
0x447c   :  { %v5488_v9 = vpop.eup %5487  ;;  %4670 = vmatprep.subr.mxu1 %v3942_v2 }
0x447d   :  { %v5490_v55 = vpop.eup %5489  ;;  %3734 = vperm.xlu0 %5276, %v5488_v9  }
0x447e   :  { %v5492_v23 = vpop.eup %5491  ;;  %3764 = vperm.xlu1 %5277, %v5490_v55  }
0x447f   :  { %v5494_v35 = vpop.eup %5493  ;;  %v3746_v27 = vrot.slane %v5492_v23, 4 }
0x4480   :  { %v5496_v28 = vpop.eup %5495  ;;  %v3773_v46 = vrot.slane %v5494_v35, 4 }
0x4481   :  { %3791 = vperm.xlu0 %5276, %v5496_v28   ;;  %v3748_v29 = vadd.f32 %v5488_v9, %v3746_v27  ;;  %v5498_v56 = vpop.eup %5497  ;;  %v3926_v9 = vld [vmem:[#allocation14 + $0x58] sm:$0xff] }
0x4482   :  { %3750 = vperm.xlu1 %5277, %v5492_v23   ;;  %v5500_v20 = vpop.eup %5499  ;;  %v3800_v53 = vrot.slane %v5498_v56, 4  ;;  %4671 = vmatpush3.msra.mxu1 %v3926_v9  ;;  %v3924_v23 = vld [vmem:[#allocation14 + $0x48] sm:$0xff]  ;;  %v3938_v27 = vld [vmem:[#allocation14 + $0xb8] sm:$0xff] }
0x4483   :  { %v3761_v47 = vadd.f32 %v5490_v55, %v3748_v29  ;;  %v5502_v12 = vpop.eup %5501  ;;  %v3941_v55 = vld [vmem:[#allocation14 + $0xd0] sm:$0xff] }
0x4484   :  { %v3827_v25 = vrot.slane %v5502_v12, 4  ;;  %v5504_v36 = vpop.eup %5503  ;;  %4672 = vmatprep.subr.mxu1 %v3941_v55  ;;  %v3921_v29 = vld [vmem:[#allocation14 + $0x30] sm:$0xff]  ;;  %v3932_v55 = vld [vmem:[#allocation14 + $0x88] sm:$0xff] }
0x4485   :  { %3818 = vperm.xlu0 %5276, %v5500_v20   ;;  %v3775_v58 = vadd.f32 %v3773_v46, %v3761_v47  ;;  %v5506_v0 = vpop.eup %5505  ;;  %v3854_v42 = vrot.slane %v5504_v36, 4  ;;  %4673 = vmatpush3.msra.mxu1 %v3925_v4  ;;  %v3920_v47 = vld [vmem:[#allocation14 + $0x28] sm:$0xff]  ;;  %v3935_v46 = vld [vmem:[#allocation14 + $0xa0] sm:$0xff] }
0x4486   :  { %3777 = vperm.xlu1 %5277, %v5494_v35   ;;  %v5508_v8 = vpop.eup %5507  ;;  %v3939_v35 = vld [vmem:[#allocation14 + $0xc0] sm:$0xff]  ;;  %4674 = vmatprep.subr.mxu1 %v3940_v61  ;;  %v3916_v4 = vld [vmem:[#allocation14 + $0x8] sm:$0xff] }
0x4487   :  { %v3788_v16 = vadd.f32 %v5496_v28, %v3775_v58  ;;  %v5510_v57 = vpop.eup %5509  ;;  %v3881_v24 = vrot.slane %v5508_v8, 4  ;;  %4675 = vmatpush3.msra.mxu1 %v3924_v23  ;;  %v3922_v28 = vld [vmem:[#allocation14 + $0x38] sm:$0xff]  ;;  %v3931_v61 = vld [vmem:[#allocation14 + $0x80] sm:$0xff] }
0x4488   :  { %4676 = vmatprep.subr.mxu1 %v3939_v35  ;;  %v3934_v58 = vld [vmem:[#allocation14 + $0x98] sm:$0xff] }
0x4489   :  { %v3802_v49 = vadd.f32 %v3800_v53, %v3788_v16  ;;  %4677 = vmatpush3.msra.mxu1 %v3923_v34  ;;  %v3918_v16 = vld [vmem:[#allocation14 + $0x18] sm:$0xff]  ;;  %v3933_v53 = vld [vmem:[#allocation14 + $0x90] sm:$0xff] }
0x448a   :  { %3804 = vperm.xlu1 %5277, %v5498_v56   ;;  %4678 = vmatprep.subr.mxu1 %v3938_v27  ;;  %v3936_v56 = vld [vmem:[#allocation14 + $0xa8] sm:$0xff]  ;;  %v4126_v34 = vld [vmem:[#allocation16 + $0x38] sm:$0xf]  ;;  %v4125_v27 = vld [vmem:[#allocation16 + $0x30] sm:$0xff] }
0x448b   :  { %v3815_v60 = vadd.f32 %v5500_v20, %v3802_v49  ;;  %4679 = vmatpush3.msra.mxu1 %v3922_v28  ;;  %v3919_v20 = vld [vmem:[#allocation14 + $0x20] sm:$0xff]  ;;  %5226 = vmatpush3.msk.msra.mxu0 %vm516_vm9, %v4126_v34  ;;  %vm4296_vm9 = vcmask 9216  }
0x448c   :  { %4680 = vmatprep.subr.mxu1 %v3937_v43  ;;  %5227 = vmatprep.subr.mxu0 %v5782_v1 }
0x448d   :  { %v3829_v63 = vadd.f32 %v3827_v25, %v3815_v60  ;;  %4681 = vmatpush3.msra.mxu1 %v3921_v29  ;;  %5228 = vmatpush3.msra.mxu0 %v4125_v27  ;;  %v4411_v29 = vld [vmem:[%s7188_s12] ss:$0 sm:$0xff] }
0x448e   :  { %3831 = vperm.xlu1 %5277, %v5502_v12   ;;  %4682 = vmatprep.subr.mxu1 %v3936_v56  ;;  %v3917_v12 = vld [vmem:[#allocation14 + $0x10] sm:$0xff] }
0x448f   :  { %v3842_v31 = vadd.f32 %v5506_v0, %v3829_v63  ;;  %4683 = vmatpush3.msra.mxu1 %v3920_v47  ;;  %5229 = vmatprep.subr.mxu0 %v5782_v1 }
0x4490   :  { %4684 = vmatprep.subr.mxu1 %v3935_v46  ;;  %5230 = vmatpush3.msra.mxu0 %v4124_v30 }
0x4491   :  { %v3856_v37 = vadd.f32 %v3854_v42, %v3842_v31  ;;  %4685 = vmatpush3.msra.mxu1 %v3919_v20  ;;  %5231 = vmatprep.subr.mxu0 %v5782_v1 }
0x4492   :  { %3845 = vperm.xlu1 %5277, %v5506_v0   ;;  %4686 = vmatprep.subr.mxu1 %v3934_v58 }
0x4493   :  { %v3869_v5 = vadd.f32 %v5510_v57, %v3856_v37  ;;  %4687 = vmatpush3.msra.mxu1 %v3918_v16 }
0x4494   :  { %4688 = vmatprep.subr.mxu1 %v3933_v53 }
0x4495   :  { %v3883_v50 = vadd.f32 %v3881_v24, %v3869_v5  ;;  %4689 = vmatpush3.msra.mxu1 %v3917_v12 }
0x4496   :  { %3872 = vperm.xlu1 %5277, %v5510_v57   ;;  %4690 = vmatprep.subr.mxu1 %v3932_v55 }
0x4497   :  { %3895 = vperm.xlu0 %5276, %v3883_v50   ;;  %4691 = vmatpush3.msra.mxu1 %v3916_v4 }
0x4498   :  { %4692 = vmatprep.subr.mxu1 %v3931_v61 }
0x449b   :  { %3858 = vperm.xlu0 %5276, %v5504_v36  }
0x449f   :  { %3885 = vperm.xlu0 %5276, %v5508_v8  }
0x44f8   :  { %v3735_v60 = vpop.permute.xlu0 %3734 }
0x44f9   :  { %v3765_v49 = vpop.permute.xlu1 %3764  ;;  %v3737_v63 = vmul.f32 %v3735_v60, %v7031_v44 }
0x44fa   :  { %v3767_v42 = vmul.f32 %v3765_v49, %v7022_v17 }
0x44fc   :  { %v3792_v57 = vpop.permute.xlu0 %3791 }
0x44fd   :  { %v3751_v25 = vpop.permute.xlu1 %3750  ;;  %v3794_v52 = vmul.f32 %v3792_v57, %v7055_v48  ;;  %v4410_v57 = vld [vmem:[%s7190_s14] ss:$0 sm:$0xff] }
0x44fe   :  { %v3753_v36 = vmul.f32 %v3751_v25, %v3489_v13 }
0x4500   :  { %v3755_v0 = vrot.slane %v3753_v36, 4  ;;  %v3819_v14 = vpop.permute.xlu0 %3818  ;;  %v4123_v36 = vld [vmem:[#allocation16 + $0x20] sm:$0xff] }
0x4501   :  { %v3778_v31 = vpop.permute.xlu1 %3777  ;;  %v3821_v32 = vmul.f32 %v3819_v14, %v7049_v45  ;;  %5232 = vmatpush3.msra.mxu0 %v4123_v36  ;;  %v4414_v14 = vld [vmem:[%s7192_s16] ss:$0 sm:$0xff]  ;;  %s5787_s16 = smov [#allocation19]  }
0x4502   :  { %v3757_v8 = vadd.f32 %v3755_v0, %v3737_v63  ;;  %v3780_v37 = vmul.f32 %v3778_v31, %v3492_v7  ;;  %5233 = vmatprep.subr.mxu0 %v5782_v1  ;;  %v4122_v63 = vld [vmem:[#allocation16 + $0x18] sm:$0xff]  ;;  %v4121_v0 = vld [vmem:[#allocation16 + $0x10] sm:$0xff]  ;;  %v4120_v31 = vld [vmem:[#allocation16 + $0x8] sm:$0xff] }
0x4503   :  { %5234 = vmatpush3.msra.mxu0 %v4122_v63 }
0x4504   :  { %v3768_v5 = vadd.f32 %v3767_v42, %v3757_v8  ;;  %v3782_v24 = vrot.slane %v3780_v37, 4  ;;  %5235 = vmatprep.subr.mxu0 %v5782_v1  ;;  %v4215_v42 = vld [vmem:[#allocation17 + $0x18] sm:$0xff]  ;;  %v4119_v8 = vld [vmem:[#allocation16] sm:$0xff] }
0x4505   :  { %v3805_v50 = vpop.permute.xlu1 %3804  ;;  %5236 = vmatpush3.msra.mxu0 %v4121_v0 }
0x4506   :  { %v3784_v3 = vadd.f32 %v3782_v24, %v3768_v5  ;;  %v3807_v40 = vmul.f32 %v3805_v50, %v3495_v6  ;;  %5237 = vmatprep.subr.mxu0 %v5782_v1 }
0x4507   :  { %5238 = vmatpush3.msra.mxu0 %v4120_v31 }
0x4508   :  { %v3795_v13 = vadd.f32 %v3794_v52, %v3784_v3  ;;  %v3809_v44 = vrot.slane %v3807_v40, 4  ;;  %5239 = vmatprep.subr.mxu0 %v5782_v1 }
0x4509   :  { %v3832_v21 = vpop.permute.xlu1 %3831  ;;  %5240 = vmatpush3.msra.mxu0 %v4119_v8 }
0x450a   :  { %v3811_v41 = vadd.f32 %v3809_v44, %v3795_v13  ;;  %v3834_v17 = vmul.f32 %v3832_v21, %v3498_v59  ;;  %v4214_v13 = vld [vmem:[#allocation17 + $0x10] sm:$0xff]  ;;  %v4213_v44 = vld [vmem:[#allocation17 + $0x8] sm:$0xff]  ;;  %v4212_v21 = vld [vmem:[#allocation17] sm:$0xff] }
0x450c   :  { %v3822_v7 = vadd.f32 %v3821_v32, %v3811_v41  ;;  %v3836_v22 = vrot.slane %v3834_v17, 4 }
0x450d   :  { %v3846_v11 = vpop.permute.xlu1 %3845 }
0x450e   :  { %v3838_v62 = vadd.f32 %v3836_v22, %v3822_v7  ;;  %v3848_v54 = vmul.f32 %v3846_v11, %v7074_v51  ;;  %v3915_v51 = vld [vmem:[#allocation14] sm:$0xff]  ;;  %v4417_v22 = vld [vmem:[%s7194_s18] ss:$0 sm:$0xff]  ;;  %s4317_s18 = sshll.u32 %s5787_s16, 4  ;;  %s4318_s18 = int_to_ptr.vmem [resolvable:$true] %s4317_s18 }
0x450f   :  { %4693 = vmatpush3.msra.mxu1 %v3915_v51  ;;  %s5733_s21 = scalar_lea.vmem %s4318_s18, 32  ;;  %p5738_p9 = scmp.lt.s32.totalorder %s4318_s18, %s4318_s18 }
0x4510   :  { %v3849_v18 = vadd.f32 %v3848_v54, %v3838_v62  ;;  %5244 = vmatprep.subr.mxu1 %v5782_v1  ;;  %p5734_p8 = scmp.ne.s32.totalorder %s4318_s18, %s5733_s21  ;;  %p5739_p10 = scmp.lt.s32.totalorder %s5733_s21, %s5733_s21 }
0x4511   :  { %v3873_v10 = vpop.permute.xlu1 %3872 }
0x4512   :  { %v3896_v33 = vpop.permute.xlu0 %3895  ;;  %v3875_v38 = vmul.f32 %v3873_v10, %v7087_v26  ;;  %p5740_p11 = por %p5739_p10, %p5738_p9 }
0x4513   :  { %5511 = vrcp.f32 %v3896_v33 }
0x4514   :  { %p5741_p12 = pnand %p5740_p11, %p5734_p8 }
0x4516   :  { %v3859_v6 = vpop.permute.xlu0 %3858 }
0x4517   :  { %v3861_v48 = vmul.f32 %v3859_v6, %v3501_v19 }
0x4519   :  { %v3863_v2 = vrot.slane %v3861_v48, 4 }
0x451a   :  { %v3886_v9 = vpop.permute.xlu0 %3885 }
0x451b   :  { %v3865_v59 = vadd.f32 %v3863_v2, %v3849_v18  ;;  %v3888_v45 = vmul.f32 %v3886_v9, %v3504_v39 }
0x451d   :  { %v3876_v23 = vadd.f32 %v3875_v38, %v3865_v59  ;;  %v3890_v35 = vrot.slane %v3888_v45, 4 }
0x451f   :  { %v3892_v15 = vadd.f32 %v3890_v35, %v3876_v23 }
0x4520   :  { %v5512_v19 = vpop.eup %5511 }
0x4521   :  { %v3899_v28 = vmul.f32 %v5512_v19, %v3892_v15 }
0x4523   :  { %v3901_v39 = vrot.slane %v3899_v28, 2 }
0x4525   :  { %v3905_v26 = vmul.f32 %v3901_v39, %v3899_v28  ;;  %v3903_v58 = vsub.f32 %v3899_v28, %v3901_v39 }
0x4527   :  { %v5278_v43 = vpack.i.bf16 %v3901_v39, %v3905_v26  ;;  %v3904_v49 = vand.u32 2147483647, %v3903_v58 }
0x4529   :  { %5279 = vrot.lane.b32.xlu1 %v5278_v43, %s5784_s28 }
0x4533   :  { %v4109_v56 = vpop.f32.mrf.mxu0 }
0x4534   :  { %v4110_v47 = vadd.f32 %v4411_v29, %v4109_v56 }
0x4535   :  { %v5224_v46 = vpop.f32.mrf.mxu0 }
0x4536   :  { %v4113_v20 = vmax.f32 %v4110_v47, 0.0 }
0x4538   :  { %4115 = vrot.lane.b32.xlu0 %v4113_v20, %s5785_s13 }
0x459b   :  { %v5280_v16 = vpop.permute.xlu1 %5279 }
0x459c   :  { %v5282_v53 = vunpack.i.h.bf16 %v5280_v16  ;;  %v5281_v12 = vunpack.i.l.bf16 %v5280_v16 }
0x459e   :  { %v3914_v60 = vsel %vm518_vm1, %v3904_v49, %v5281_v12  ;;  %v3913_v25 = vsel %vm518_vm1, %v3899_v28, %v5282_v53 }
0x459f   :  { %4018 = vmatprep.mubr.f32.mxu1 %v3914_v60 }
0x45a0   :  { %4019 = vmatmul.mubr.f32.vlgmr.msra.gmra.mxu1 %v3913_v25 }
0x45a1   :  { %5252 = vmatprep.mubr.msk.f32.mxu1 %vm5783_vm7, %v5782_v1  ;;  %5245 = vmatpush3.msra.mxu1 %v4215_v42  ;;  %vm4134_vm7 = vcmask 490496  }
0x45a2   :  { %5246 = vmatprep.subr.mxu1 %v5782_v1 }
0x45a3   :  { %5247 = vmatpush3.msra.mxu1 %v4214_v13 }
0x45a4   :  { %5248 = vmatprep.subr.mxu1 %v5782_v1 }
0x45a5   :  { %5249 = vmatpush3.msra.mxu1 %v4213_v44 }
0x45a6   :  { %5250 = vmatprep.subr.mxu1 %v5782_v1 }
0x45a7   :  { %5251 = vmatpush3.msra.mxu1 %v4212_v21 }
0x45aa   :  { %v4116_v3 = vpop.permute.xlu0 %4115 }
0x4660   :  { %v4694_v37 = vpop.f32.mrf.mxu1 }
0x4662   :  { %v4695_v5 = vpop.f32.mrf.mxu1 }
0x4663   :  { %v4696_v24 = vadd.f32 %v4695_v5, %v4694_v37 }
0x4665   :  { %v4021_v50 = vadd.f32 %v4696_v24, %v4410_v57 }
0x4667   :  { %v4024_v40 = vmax.f32 %v4021_v50, 0.0 }
0x4669   :  { %v4118_v52 = vsel %vm388_vm8, %v4024_v40, %v4116_v3 }
0x466a   :  { %5242 = vmatmul.mubr.msk.f32.vlgmr.msra.gmra.mxu0 %vm4134_vm7, %v4118_v52 }
0x472a   :  { %v4207_v41 = vpop.f32.mrf.mxu0 }
0x472b   :  { %v4208_v17 = vadd.f32 %v4414_v14, %v4207_v41 }
0x472c   :  { %v5243_v32 = vpop.f32.mrf.mxu0 }
0x472d   :  { %v4211_v7 = vmax.f32 %v4208_v17, 0.0 }
0x472f   :  { %5253 = vmatmul.mubr.msk.f32.vlgmr.msra.gmra.mxu1 %vm388_vm8, %v4211_v7 }
0x47ef   :  { %v4292_v11 = vpop.f32.mrf.mxu1 }
0x47f0   :  { %v4293_v33 = vadd.f32 %v4417_v22, %v4292_v11 }
0x47f1   :  { %v5254_v62 = vpop.f32.mrf.mxu1 }
0x47f2   :  { %v4297_v1 = vsel %vm4296_vm9, %v4293_v33, -inf }
0x47f3   :  { %4298 = vmax.xlane.f32.xlu1 %v4297_v1 }
0x487c   :  { %v4299_v54 = vpop.xlane.xlu1 %4298 }
0x487d   :  { %v4300_v6 = vsub.f32 %v4293_v33, %v4299_v54 }
0x487f   :  { %v4301_v48 = vmul.f32 1.442695, %v4300_v6 }
0x4881   :  { %5513 = vpow2.f32 %v4301_v48 }
0x488e   :  { %v5514_v10 = vpop.eup %5513 }
0x488f   :  { %v4303_v18 = vsel %vm4296_vm9, %v5514_v10, 0.0 }
0x4890   :  { %4304 = vadd.xlane.f32.xlu0 %v4303_v18 }
0x4919   :  { %v4305_v2 = vpop.xlane.xlu0 %4304 }
0x491a   :  { %5515 = vlog2.f32 %v4305_v2 }
0x4927   :  { %v5516_v9 = vpop.eup %5515 }
0x4928   :  { %v4307_v38 = vmul.f32 0.6931472, %v5516_v9 }
0x492a   :  { %v4308_v59 = vadd.f32 %v4307_v38, %v4299_v54 }
0x492c   :  { %v4309_v45 = vsub.f32 %v4293_v33, %v4308_v59 }
0x492e   :  { %4310 = vst.msk [vmem:[#allocation19] sm:$0x3] %vm4296_vm9, %v4309_v45 }
0x492f   :  { %5744 = shalt.err (!%p5741_p12)
}
0x4930   :  { %4320 = dma.vmem_to_hbm [thread:$0]  %s4318_s18, 32, %s7195_s19, [#allocation4]  }
0x4931   :  { %5765 = dma.done.wait [#allocation4], 32  }
0x4932   :  { %5766 = vsyncadd [#allocation4], 4294967264 }
0x4933   :  { %4324 = vsyncpa [#allocation3], 1 }
0x4934   :  { %4325 = vsyncpa [#allocation6], 1 }
0x4935   :  { %4326 = vsyncpa [#allocation9], 1 }
0x4936   :  { %4327 = vsyncpa [#allocation12], 1 }
0x4937   :  { %4328 = vsyncpa [#allocation15], 1 }
0x4938   :  { %4329 = vsyncpa [#allocation18], 1 }
0x4939   :  { %4330 = vsyncpa [#allocation4], 1 }

</bundles_post_ra>
